<compile_context>
chip_gen: v7x
topology: tpu7x:2x2x1
jax: 0.10.0
libtpu: 0.0.40
codegen_flags: <defaults>
</compile_context>

<pallas_src>
import functools

import jax
import jax.numpy as jnp
from jax.experimental import pallas as pl
from jax.experimental.pallas import tpu as pltpu

# Small but lane-dense, module-consistent hyper-parameters.
SEQ = 16
BATCH = 8
D_MODEL = 128        # multiple of 128 -> lane-dense activations / output
D_INNER = 256
LN_EPS = 1e-5        # torch.nn.LayerNorm default eps


def ff_kernel(x_ref, w1t_ref, w2t_ref, params_ref, out_ref, *, d_model, d_inner):
    """x_ref: (N, d_model) flattened tokens; params_ref: (1, d_inner + 3*d_model).

    params layout (all static, 128-aligned slices): [b1 | b2 | gamma | beta].
    """
    x = x_ref[...]                                                     # (N, D)

    # Static slices of the coalesced parameter row (zero runtime cost).
    b1 = params_ref[:, 0:d_inner]                                      # (1, D_inner)
    b2 = params_ref[:, d_inner:d_inner + d_model]                      # (1, D)
    gamma = params_ref[:, d_inner + d_model:d_inner + 2 * d_model]     # (1, D)
    beta = params_ref[:, d_inner + 2 * d_model:d_inner + 3 * d_model]  # (1, D)

    # CoreNet: Linear -> ReLU -> [Dropout=id] -> Linear -> [Dropout=id]
    h = jnp.dot(x, w1t_ref[...],
                preferred_element_type=jnp.float32,
                precision=jax.lax.Precision.HIGHEST)                   # (N, D_inner)
    h = jnp.maximum(h + b1, 0.0)
    core = jnp.dot(h, w2t_ref[...],
                   preferred_element_type=jnp.float32,
                   precision=jax.lax.Precision.HIGHEST)
    core = core + b2                                                   # (N, D)

    # post-norm path: LayerNorm(inp + core_out), single-pass statistics.
    y = x + core
    inv_d = 1.0 / d_model
    s1 = jnp.sum(y, axis=-1, keepdims=True)
    s2 = jnp.sum(y * y, axis=-1, keepdims=True)
    mean = s1 * inv_d
    var = s2 * inv_d - mean * mean
    yn = (y - mean) * jax.lax.rsqrt(var + LN_EPS)
    out_ref[...] = (yn * gamma + beta).astype(out_ref.dtype)


def prepare_params(w1, b1, w2, b2, gamma, beta):
    """One-time layout prep, done OUTSIDE the per-call jitted path.

    w1: (d_inner, d_model), w2: (d_model, d_inner)  -- torch Linear layout (out, in).
    Returns pre-transposed weights and a single coalesced parameter row.
    """
    w1t = jnp.asarray(w1.T)                                     # (d_model, d_inner)
    w2t = jnp.asarray(w2.T)                                     # (d_inner, d_model)
    params = jnp.concatenate([b1, b2, gamma, beta]).reshape(1, -1)
    return w1t, w2t, params


@jax.jit
def positionwise_ff(inp, w1t, w2t, params):
    """inp: (seq, batch, d_model); w1t/w2t/params from prepare_params()."""
    S, B, D = inp.shape
    N = S * B
    d_inner = w1t.shape[1]

    x2d = inp.reshape(N, D)                                     # pure layout, token-wise op

    kernel = functools.partial(ff_kernel, d_model=D, d_inner=d_inner)
    vmem = pl.BlockSpec(memory_space=pltpu.MemorySpace.VMEM)
    out2d = pl.pallas_call(
        kernel,
        out_shape=jax.ShapeDtypeStruct((N, D), inp.dtype),
        in_specs=[vmem, vmem, vmem, vmem],
        out_specs=vmem,
    )(x2d, w1t, w2t, params)

    return out2d.reshape(S, B, D)


def reference(inp, w1, b1, w2, b2, gamma, beta):
    """Pure-JAX mirror of PositionwiseFF.forward (pre_lnorm=False, eval mode)."""
    h = jnp.maximum(
        jnp.dot(inp, w1.T, precision=jax.lax.Precision.HIGHEST) + b1, 0.0)
    core = jnp.dot(h, w2.T, precision=jax.lax.Precision.HIGHEST) + b2
    y = inp + core
    mean = jnp.mean(y, axis=-1, keepdims=True)
    var = jnp.mean((y - mean) ** 2, axis=-1, keepdims=True)
    return (y - mean) * jax.lax.rsqrt(var + LN_EPS) * gamma + beta


if __name__ == "__main__":
    key = jax.random.PRNGKey(0)
    k_x, k_w1, k_b1, k_w2, k_b2 = jax.random.split(key, 5)

    # Deterministic synthetic parameters (torch Linear layout: (out_features, in_features)).
    inp = jax.random.normal(k_x, (SEQ, BATCH, D_MODEL), dtype=jnp.float32)
    w1 = 0.05 * jax.random.normal(k_w1, (D_INNER, D_MODEL), dtype=jnp.float32)
    b1 = 0.05 * jax.random.normal(k_b1, (D_INNER,), dtype=jnp.float32)
    w2 = 0.05 * jax.random.normal(k_w2, (D_MODEL, D_INNER), dtype=jnp.float32)
    b2 = 0.05 * jax.random.normal(k_b2, (D_MODEL,), dtype=jnp.float32)
    gamma = jnp.ones((D_MODEL,), dtype=jnp.float32)    # nn.LayerNorm default init
    beta = jnp.zeros((D_MODEL,), dtype=jnp.float32)

    # One-time parameter layout prep (weight transposes + coalesced param row).
    w1t, w2t, params = prepare_params(w1, b1, w2, b2, gamma, beta)

    out = positionwise_ff(inp, w1t, w2t, params)
    out = jax.block_until_ready(out)

    ref = reference(inp, w1, b1, w2, b2, gamma, beta)
    assert out.shape == (SEQ, BATCH, D_MODEL)
    assert jnp.allclose(out, ref, atol=1e-4, rtol=1e-4), "mismatch vs reference"

    # TODO(synk): dropout (train mode) and the pre_lnorm=True path are not
    # exercised here; forward defaults (eval, pre_lnorm=False) make them no-ops.
    print("KERNEL_OK")
</pallas_src>

<mosaic_0001>
module attributes {stable_mosaic.version = 11 : i64} {
  func.func @ff_kernel(%arg0: memref<128x128xf32, #tpu.memory_space<vmem>>, %arg1: memref<128x256xf32, #tpu.memory_space<vmem>>, %arg2: memref<256x128xf32, #tpu.memory_space<vmem>>, %arg3: memref<1x640xf32, #tpu.memory_space<vmem>>, %arg4: memref<128x128xf32, #tpu.memory_space<vmem>>) attributes {dimension_semantics = [], scalar_prefetch = 0 : i64, scratch_operands = 0 : i64, tpu.core_type = #tpu.core_type<tc>} {
    %c0 = arith.constant 0 : index
    %c0_0 = arith.constant 0 : index
    %0 = vector.load %arg0[%c0, %c0_0] : memref<128x128xf32, #tpu.memory_space<vmem>>, vector<128x128xf32>
    %c0_1 = arith.constant 0 : index
    %c0_2 = arith.constant 0 : index
    %1 = vector.load %arg3[%c0_1, %c0_2] : memref<1x640xf32, #tpu.memory_space<vmem>>, vector<1x256xf32>
    %c0_3 = arith.constant 0 : index
    %c256 = arith.constant 256 : index
    %2 = vector.load %arg3[%c0_3, %c256] : memref<1x640xf32, #tpu.memory_space<vmem>>, vector<1x128xf32>
    %c0_4 = arith.constant 0 : index
    %c384 = arith.constant 384 : index
    %3 = vector.load %arg3[%c0_4, %c384] : memref<1x640xf32, #tpu.memory_space<vmem>>, vector<1x128xf32>
    %c0_5 = arith.constant 0 : index
    %c512 = arith.constant 512 : index
    %4 = vector.load %arg3[%c0_5, %c512] : memref<1x640xf32, #tpu.memory_space<vmem>>, vector<1x128xf32>
    %c0_6 = arith.constant 0 : index
    %c0_7 = arith.constant 0 : index
    %5 = vector.load %arg1[%c0_6, %c0_7] : memref<128x256xf32, #tpu.memory_space<vmem>>, vector<128x256xf32>
    %cst = arith.constant dense<0.000000e+00> : vector<128x256xf32>
    %6 = tpu.matmul %0, %5, %cst {dimension_numbers = #tpu.dot_dimension_numbers<[1], [0], [0], [1], [0, 0, 1, 1], [], []>, precision = #tpu.contract_precision<fp32>} : vector<128x128xf32>, vector<128x256xf32>, vector<128x256xf32> -> vector<128x256xf32>
    %7 = vector.broadcast %1 : vector<1x256xf32> to vector<128x256xf32>
    %8 = arith.addf %6, %7 : vector<128x256xf32>
    %cst_8 = arith.constant 0.000000e+00 : f32
    %9 = vector.broadcast %cst_8 : f32 to vector<128x256xf32>
    %10 = arith.maximumf %8, %9 : vector<128x256xf32>
    %c0_9 = arith.constant 0 : index
    %c0_10 = arith.constant 0 : index
    %11 = vector.load %arg2[%c0_9, %c0_10] : memref<256x128xf32, #tpu.memory_space<vmem>>, vector<256x128xf32>
    %cst_11 = arith.constant dense<0.000000e+00> : vector<128x128xf32>
    %12 = tpu.matmul %10, %11, %cst_11 {dimension_numbers = #tpu.dot_dimension_numbers<[1], [0], [0], [1], [0, 0, 1, 1], [], []>, precision = #tpu.contract_precision<fp32>} : vector<128x256xf32>, vector<256x128xf32>, vector<128x128xf32> -> vector<128x128xf32>
    %13 = vector.broadcast %2 : vector<1x128xf32> to vector<128x128xf32>
    %14 = arith.addf %12, %13 : vector<128x128xf32>
    %15 = arith.addf %0, %14 : vector<128x128xf32>
    %cst_12 = arith.constant dense<0.000000e+00> : vector<128xf32>
    %16 = vector.multi_reduction <add>, %15, %cst_12 [1] : vector<128x128xf32> to vector<128xf32>
    %17 = vector.shape_cast %16 : vector<128xf32> to vector<128x1xf32>
    %18 = arith.mulf %15, %15 : vector<128x128xf32>
    %cst_13 = arith.constant dense<0.000000e+00> : vector<128xf32>
    %19 = vector.multi_reduction <add>, %18, %cst_13 [1] : vector<128x128xf32> to vector<128xf32>
    %20 = vector.shape_cast %19 : vector<128xf32> to vector<128x1xf32>
    %cst_14 = arith.constant 7.812500e-03 : f32
    %21 = vector.broadcast %cst_14 : f32 to vector<128x1xf32>
    %22 = arith.mulf %17, %21 : vector<128x1xf32>
    %cst_15 = arith.constant 7.812500e-03 : f32
    %23 = vector.broadcast %cst_15 : f32 to vector<128x1xf32>
    %24 = arith.mulf %20, %23 : vector<128x1xf32>
    %25 = arith.mulf %22, %22 : vector<128x1xf32>
    %26 = arith.subf %24, %25 : vector<128x1xf32>
    %27 = vector.broadcast %22 : vector<128x1xf32> to vector<128x128xf32>
    %28 = arith.subf %15, %27 : vector<128x128xf32>
    %cst_16 = arith.constant 9.99999974E-6 : f32
    %29 = vector.broadcast %cst_16 : f32 to vector<128x1xf32>
    %30 = arith.addf %26, %29 : vector<128x1xf32>
    %31 = math.rsqrt %30 : vector<128x1xf32>
    %32 = vector.broadcast %31 : vector<128x1xf32> to vector<128x128xf32>
    %33 = arith.mulf %28, %32 : vector<128x128xf32>
    %34 = vector.broadcast %3 : vector<1x128xf32> to vector<128x128xf32>
    %35 = arith.mulf %33, %34 : vector<128x128xf32>
    %36 = vector.broadcast %4 : vector<1x128xf32> to vector<128x128xf32>
    %37 = arith.addf %35, %36 : vector<128x128xf32>
    %c0_17 = arith.constant 0 : index
    %c0_18 = arith.constant 0 : index
    %38 = vector.load %arg4[%c0_17, %c0_18] : memref<128x128xf32, #tpu.memory_space<vmem>>, vector<128x128xf32>
    tpu.vector_store %arg4[%c0_17, %c0_18], %37 {strides = array<i32>} : memref<128x128xf32, #tpu.memory_space<vmem>>, vector<128x128xf32>,
    return
  }
}

</mosaic_0001>

<bundles_post_ra>
// kernel: positionwise_ff.1
= control target key start
LH: loop header
LB: loop body
LE: loop exit
PB: predicated region body
PF: predicated region fallthrough
CT: control target
= control target key end

     0   :  { %9 = vsyncpa [#allocation3], 0  ;;  %s7300_s0 = inlined_call_operand.hbm [shape: f32[128,128], index: 0, kind: input, shape index: {}]   ;;  %s7301_s1 = inlined_call_operand.hbm [shape: f32[128,256], index: 1, kind: input, shape index: {}]   ;;  %s7302_s2 = inlined_call_operand.hbm [shape: f32[256,128], index: 2, kind: input, shape index: {}]   ;;  %s7303_s3 = inlined_call_operand.vmem [shape: f32[1,640], index: 3, kind: input, shape index: {}]   ;;  %s7304_s4 = inlined_call_operand.hbm [shape: f32[128,128], index: 4, kind: output, shape index: {}]  }
   0x1   :  { %10 = vsyncpa [#allocation6], 0 }
   0x2   :  { %11 = vsyncpa [#allocation4], 0  ;;  %s4996_s15 = smov [#allocation5]   ;;  %s4902_s19 = scalar_lea.hbm %s7301_s1, 4096 }
   0x3   :  { %s29_s16 = sshll.u32 %s4996_s15, 4  ;;  %p4903_p0 = scmp.ne.s32.totalorder %s7301_s1, %s4902_s19  ;;  %s30_s16 = int_to_ptr.vmem [resolvable:$true] %s29_s16 }
   0x4   :  { %p4906_p1 = scmp.lt.u32.totalorder %s4902_s19, %s7301_s1 }
   0x6   :  { %p4908_p2 = pnand %p4906_p1, %p4903_p0 }
   0x8   :  { %4911 = shalt.err (!%p4908_p2)
}
   0x9   :  { %s4912_s24 = scalar_lea.vmem %s30_s16, 4096  ;;  %p4917_p4 = scmp.lt.s32.totalorder %s30_s16, %s30_s16 }
   0xa   :  { %p4913_p3 = scmp.ne.s32.totalorder %s30_s16, %s4912_s24  ;;  %p4918_p5 = scmp.lt.s32.totalorder %s4912_s24, %s4912_s24 }
   0xc   :  { %p4919_p6 = por %p4918_p5, %p4917_p4 }
   0xe   :  { %p4920_p7 = pnand %p4919_p6, %p4913_p3 }
  0x10   :  { %4923 = shalt.err (!%p4920_p7)
}
  0x11   :  { %s4997_s25 = smov 256   ;;  %s4998_s26 = smov 16  }
  0x12   :  { %35 = dma.hbm_to_vmem [thread:$0]  %s7301_s1, 4096, %s30_s16, [#allocation6], %s4997_s25, %s4997_s25, %s4998_s26  }
  0x13   :  { %s4999_s29 = smov [#allocation2]   ;;  %s4924_s7 = scalar_lea.hbm %s7300_s0, 2048 }
  0x14   :  { %s17_s30 = sshll.u32 %s4999_s29, 4  ;;  %p4925_p8 = scmp.ne.s32.totalorder %s7300_s0, %s4924_s7  ;;  %s18_s30 = int_to_ptr.vmem [resolvable:$true] %s17_s30 }
  0x15   :  { %p4928_p9 = scmp.lt.u32.totalorder %s4924_s7, %s7300_s0 }
  0x17   :  { %p4930_p10 = pnand %p4928_p9, %p4925_p8 }
  0x19   :  { %4933 = shalt.err (!%p4930_p10)
}
  0x1a   :  { %s4934_s12 = scalar_lea.vmem %s18_s30, 2048  ;;  %p4939_p12 = scmp.lt.s32.totalorder %s18_s30, %s18_s30 }
  0x1b   :  { %p4935_p11 = scmp.ne.s32.totalorder %s18_s30, %s4934_s12  ;;  %p4940_p13 = scmp.lt.s32.totalorder %s4934_s12, %s4934_s12 }
  0x1d   :  { %p4941_p0 = por %p4940_p13, %p4939_p12 }
  0x1f   :  { %p4942_p1 = pnand %p4941_p0, %p4935_p11 }
  0x21   :  { %4945 = shalt.err (!%p4942_p1)
}
  0x22   :  { %s5000_s1 = smov 128   ;;  %s5001_s13 = smov 8  }
  0x23   :  { %23 = dma.hbm_to_vmem [thread:$0]  %s7300_s0, 2048, %s18_s30, [#allocation3], %s5000_s1, %s5000_s1, %s5001_s13  }
  0x24   :  { %s5002_s16 = smov [#allocation7]   ;;  %s4946_s20 = scalar_lea.hbm %s7302_s2, 4096 }
  0x25   :  { %s41_s17 = sshll.u32 %s5002_s16, 4  ;;  %p4947_p2 = scmp.ne.s32.totalorder %s7302_s2, %s4946_s20  ;;  %s42_s17 = int_to_ptr.vmem [resolvable:$true] %s41_s17 }
  0x26   :  { %p4950_p3 = scmp.lt.u32.totalorder %s4946_s20, %s7302_s2 }
  0x28   :  { %p4952_p4 = pnand %p4950_p3, %p4947_p2 }
  0x2a   :  { %4955 = shalt.err (!%p4952_p4)
}
  0x2b   :  { %s4956_s25 = scalar_lea.vmem %s42_s17, 4096  ;;  %p4961_p6 = scmp.lt.s32.totalorder %s42_s17, %s42_s17 }
  0x2c   :  { %p4957_p5 = scmp.ne.s32.totalorder %s42_s17, %s4956_s25  ;;  %p4962_p7 = scmp.lt.s32.totalorder %s4956_s25, %s4956_s25 }
  0x2e   :  { %p4963_p8 = por %p4962_p7, %p4961_p6 }
  0x30   :  { %p4964_p9 = pnand %p4963_p8, %p4957_p5 }
  0x32   :  { %4967 = shalt.err (!%p4964_p9)
}
  0x33   :  { %47 = dma.hbm_to_vmem [thread:$0]  %s7302_s2, 4096, %s42_s17, [#allocation6], %s5000_s1, %s5000_s1, %s5001_s13  }
  0x34   :  { %4990 = dma.done.wait [#allocation3], 2048  }
  0x35   :  { %4991 = vsyncadd [#allocation3], 4294965248 }
  0x36   :  { %4992 = dma.done.wait [#allocation6], 8192  }
  0x37   :  { %4993 = vsyncadd [#allocation6], 4294959104  ;;  %v7306_v0 = vmov 0.0   ;;  %v80_v1 = vld [vmem:[#allocation5 + $0x8] sm:$0xff]  ;;  %v82_v2 = vld [vmem:[#allocation5 + $0x18] sm:$0xff] }
  0x38   :  { %218 = vmatprep.mubr.f32.mxu0 %v7306_v0  ;;  %v79_v3 = vld [vmem:[#allocation5] sm:$0xff]  ;;  %v122_v4 = vand.u32 4294901760, %v80_v1  ;;  %v126_v5 = vand.u32 4294901760, %v82_v2  ;;  %v81_v6 = vld [vmem:[#allocation5 + $0x10] sm:$0xff]  ;;  %v84_v8 = vld [vmem:[#allocation5 + $0x28] sm:$0xff] }
  0x39   :  { %v124_v7 = vand.u32 4294901760, %v79_v3  ;;  %v86_v9 = vld [vmem:[#allocation5 + $0x38] sm:$0xff]  ;;  %v128_v10 = vand.u32 4294901760, %v81_v6  ;;  %v130_v11 = vand.u32 4294901760, %v84_v8  ;;  %v83_v13 = vld [vmem:[#allocation5 + $0x20] sm:$0xff]  ;;  %v85_v14 = vld [vmem:[#allocation5 + $0x30] sm:$0xff] }
  0x3a   :  { %v134_v12 = vand.u32 4294901760, %v86_v9  ;;  %v88_v15 = vld [vmem:[#allocation5 + $0x48] sm:$0xff]  ;;  %v5073_v16 = vpack.c.bf16 %v126_v5, %v122_v4  ;;  %v90_v17 = vld [vmem:[#allocation5 + $0x58] sm:$0xff]  ;;  %v87_v18 = vld [vmem:[#allocation5 + $0x40] sm:$0xff]  ;;  %v132_v23 = vand.u32 4294901760, %v83_v13  ;;  %v136_v24 = vand.u32 4294901760, %v85_v14 }
  0x3b   :  { %v89_v19 = vld [vmem:[#allocation5 + $0x50] sm:$0xff]  ;;  %v5075_v20 = vpack.c.bf16 %v128_v10, %v124_v7  ;;  %v92_v22 = vld [vmem:[#allocation5 + $0x68] sm:$0xff]  ;;  %v138_v25 = vand.u32 4294901760, %v88_v15  ;;  %v142_v26 = vand.u32 4294901760, %v90_v17  ;;  %v140_v27 = vand.u32 4294901760, %v87_v18  ;;  %v94_v29 = vld [vmem:[#allocation5 + $0x78] sm:$0xff] }
  0x3c   :  { %7677 = vst [vmem:[#allocation12_spill] sm:$0xff] %v5073_v16  ;;  %v5077_v21 = vpack.c.bf16 %v134_v12, %v130_v11  ;;  %4270 = vmatprep.subr.bf16.mxu0 %v5073_v16  ;;  %v144_v28 = vand.u32 4294901760, %v89_v19  ;;  %v5082_v30 = vpack.c.bf16 %v136_v24, %v132_v23  ;;  %v146_v31 = vand.u32 4294901760, %v92_v22  ;;  %v91_v32 = vld [vmem:[#allocation5 + $0x60] sm:$0xff]  ;;  %v93_v33 = vld [vmem:[#allocation5 + $0x70] sm:$0xff]  ;;  %v96_v35 = vld [vmem:[#allocation5 + $0x88] sm:$0xff] }
  0x3d   :  { %7678 = vst [vmem:[#allocation13_spill] sm:$0xff] %v5075_v20  ;;  %4272 = vmatpush1.bf16.msra.mxu0 %v5075_v20  ;;  %v5084_v34 = vpack.c.bf16 %v142_v26, %v138_v25  ;;  %v98_v36 = vld [vmem:[#allocation5 + $0x98] sm:$0xff]  ;;  %v150_v37 = vand.u32 4294901760, %v94_v29  ;;  %v5086_v38 = vsub.f32 %v80_v1, %v122_v4  ;;  %v148_v40 = vand.u32 4294901760, %v91_v32  ;;  %v95_v46 = vld [vmem:[#allocation5 + $0x80] sm:$0xff]  ;;  %v97_v47 = vld [vmem:[#allocation5 + $0x90] sm:$0xff] }
  0x3e   :  { %7679 = vst [vmem:[#allocation14_spill] sm:$0xff] %v5077_v21  ;;  %4274 = vmatprep.subr.bf16.mxu0 %v5077_v21  ;;  %7680 = vst [vmem:[#allocation15_spill] sm:$0xff] %v5082_v30  ;;  %v5089_v39 = vpack.c.bf16 %v144_v28, %v140_v27  ;;  %v152_v41 = vand.u32 4294901760, %v93_v33  ;;  %v5091_v42 = vsub.f32 %v82_v2, %v126_v5  ;;  %v154_v44 = vand.u32 4294901760, %v96_v35  ;;  %v100_v52 = vld [vmem:[#allocation5 + $0xa8] sm:$0xff]  ;;  %v102_v53 = vld [vmem:[#allocation5 + $0xb8] sm:$0xff] }
  0x3f   :  { %7681 = vst [vmem:[#allocation16_spill] sm:$0xff] %v5084_v34  ;;  %v5094_v43 = vpack.c.bf16 %v150_v37, %v146_v31  ;;  %v158_v45 = vand.u32 4294901760, %v98_v36  ;;  %v5096_v48 = vsub.f32 %v79_v3, %v124_v7  ;;  %v5098_v49 = vsub.f32 %v81_v6, %v128_v10  ;;  %v5112_v58 = vld [vmem:[#allocation5 + $0xa0] sm:$0xff]  ;;  %v5119_v63 = vld [vmem:[#allocation5 + $0xb0] sm:$0xff]  ;;  %v5121_v1 = vld [vmem:[#allocation5 + $0xc8] sm:$0xff] }
  0x40   :  { %7682 = vst [vmem:[#allocation17_spill] sm:$0xff] %v5089_v39  ;;  %v5100_v50 = vsub.f32 %v84_v8, %v130_v11  ;;  %v5102_v51 = vsub.f32 %v86_v9, %v134_v12  ;;  %v5104_v54 = vsub.f32 %v83_v13, %v132_v23  ;;  %v5106_v55 = vsub.f32 %v85_v14, %v136_v24  ;;  %v5123_v2 = vld [vmem:[#allocation5 + $0xd8] sm:$0xff]  ;;  %v5138_v11 = vld [vmem:[#allocation5 + $0xc0] sm:$0xff]  ;;  %v5140_v12 = vld [vmem:[#allocation5 + $0xd0] sm:$0xff] }
  0x41   :  { %4276 = vmatpush1.bf16.msra.mxu0 %v5082_v30  ;;  %7683 = vst [vmem:[#allocation18_spill] sm:$0xff] %v5094_v43  ;;  %7684 = vst [vmem:[#allocation19_spill] sm:$0xff] %v5096_v48  ;;  %v5108_v56 = vsub.f32 %v88_v15, %v138_v25  ;;  %v5110_v57 = vsub.f32 %v90_v17, %v142_v26  ;;  %v5115_v59 = vsub.f32 %v87_v18, %v140_v27  ;;  %v59_v18 = vld [vmem:[#allocation2] sm:$0xff] }
  0x42   :  { %4278 = vmatprep.subr.bf16.mxu0 %v5084_v34  ;;  %7685 = vst [vmem:[#allocation20_spill] sm:$0xff] %v5098_v49  ;;  %v5117_v60 = vpack.c.bf16 %v152_v41, %v148_v40  ;;  %v156_v61 = vand.u32 4294901760, %v95_v46  ;;  %v160_v62 = vand.u32 4294901760, %v97_v47  ;;  %v5125_v3 = vsub.f32 %v89_v19, %v144_v28 }
  0x43   :  { %v5128_v4 = vpack.c.bf16 %v158_v45, %v154_v44  ;;  %v162_v5 = vand.u32 4294901760, %v100_v52  ;;  %v166_v6 = vand.u32 4294901760, %v102_v53  ;;  %v5130_v7 = vsub.f32 %v92_v22, %v146_v31  ;;  %v5164_v31 = vld [vmem:[#allocation5 + $0xf8] sm:$0xff] }
  0x44   :  { %7686 = vst [vmem:[#allocation21_spill] sm:$0xff] %v5117_v60  ;;  %7687 = vst [vmem:[#allocation22_spill] sm:$0xff] %v5125_v3  ;;  %v5132_v8 = vsub.f32 %v94_v29, %v150_v37  ;;  %v5134_v9 = vsub.f32 %v91_v32, %v148_v40  ;;  %v5136_v10 = vsub.f32 %v93_v33, %v152_v41  ;;  %v7312_v13 = vand.u32 4294901760, %v5112_v58  ;;  %v5162_v29 = vld [vmem:[#allocation5 + $0xe8] sm:$0xff] }
  0x45   :  { %4280 = vmatpush1.bf16.msra.mxu0 %v5089_v39  ;;  %7688 = vst [vmem:[#allocation23_spill] sm:$0xff] %v5128_v4  ;;  %v7310_v14 = vand.u32 4294901760, %v5119_v63  ;;  %v7308_v15 = vand.u32 4294901760, %v5121_v1  ;;  %v7305_v17 = vand.u32 4294901760, %v5123_v2  ;;  %v5147_v19 = vsub.f32 %v96_v35, %v154_v44  ;;  %v60_v37 = vld [vmem:[#allocation2 + $0x8] sm:$0xff] }
  0x46   :  { %4282 = vmatprep.subr.bf16.mxu0 %v5094_v43  ;;  %7689 = vst [vmem:[#allocation24_spill] sm:$0xff] %v5132_v8  ;;  %v5149_v22 = vsub.f32 %v98_v36, %v158_v45  ;;  %v5151_v23 = vpack.c.bf16 %v160_v62, %v156_v61  ;;  %v5153_v24 = vsub.f32 %v95_v46, %v156_v61  ;;  %v7315_v27 = vand.u32 4294901760, %v5138_v11  ;;  %v61_v46 = vld [vmem:[#allocation2 + $0x10] sm:$0xff] }
  0x47   :  { %7690 = vst [vmem:[#allocation25_spill] sm:$0xff] %v5147_v19  ;;  %v5156_v25 = vsub.f32 %v97_v47, %v160_v62  ;;  %v5158_v26 = vpack.c.bf16 %v166_v6, %v162_v5  ;;  %v7314_v28 = vand.u32 4294901760, %v5140_v12  ;;  %v5166_v32 = vand.u32 4294901760, %v59_v18  ;;  %v5192_v61 = vld [vmem:[#allocation5 + $0xf0] sm:$0xff] }
  0x48   :  { %7691 = vst [vmem:[#allocation26_spill] sm:$0xff] %v5149_v22  ;;  %7692 = vst [vmem:[#allocation27_spill] sm:$0xff] %v5151_v23  ;;  %v7309_v33 = vand.u32 4294901760, %v5086_v38  ;;  %v7311_v35 = vand.u32 4294901760, %v5091_v42  ;;  %v7313_v36 = vand.u32 4294901760, %v5096_v48  ;;  %v5171_v40 = vsub.f32 %v100_v52, %v162_v5 }
  0x49   :  { %4284 = vmatpush1.bf16.msra.mxu0 %v5117_v60  ;;  %7693 = vst [vmem:[#allocation28_spill] sm:$0xff] %v5158_v26  ;;  %v5173_v41 = vsub.f32 %v102_v53, %v166_v6  ;;  %v5179_v44 = vpack.c.bf16 %v7310_v14, %v7312_v13  ;;  %v5185_v45 = vpack.c.bf16 %v7305_v17, %v7308_v15  ;;  %v5190_v53 = vld [vmem:[#allocation5 + $0xe0] sm:$0xff]  ;;  %v7318_v0 = vand.u32 4294901760, %v5098_v49  ;;  %v62_v60 = vld [vmem:[#allocation2 + $0x18] sm:$0xff] }
  0x4a   :  { %4286 = vmatprep.subr.bf16.mxu0 %v5128_v4  ;;  %v5195_v62 = vsub.f32 %v59_v18, %v5166_v32  ;;  %v398_v5 = vsub.f32 %v5086_v38, %v7309_v33  ;;  %v410_v6 = vsub.f32 %v5091_v42, %v7311_v35  ;;  %v404_v17 = vsub.f32 %v5096_v48, %v7313_v36 }
  0x4b   :  { %7694 = vst [vmem:[#allocation29_spill] sm:$0xff] %v5173_v41  ;;  %7695 = vst [vmem:[#allocation30_spill] sm:$0xff] %v5179_v44  ;;  %v5208_v15 = vand.u32 4294901760, %v60_v37  ;;  %v5214_v18 = vpack.c.bf16 %v7314_v28, %v7315_v27  ;;  %v5217_v14 = vand.u32 4294901760, %v61_v46  ;;  %v416_v52 = vsub.f32 %v5098_v49, %v7318_v0 }
  0x4c   :  { %7696 = vst [vmem:[#allocation31_spill] sm:$0xff] %v5185_v45  ;;  %7697 = vst [vmem:[#allocation32_spill] sm:$0xff] %v5195_v62  ;;  %v7700_v28 = vand.u32 4294901760, %v5162_v29  ;;  %v7701_v27 = vand.u32 4294901760, %v5164_v31  ;;  %v399_v35 = vand.u32 4294901760, %v398_v5  ;;  %v7703_v13 = vand.u32 4294901760, %v5100_v50 }
  0x4d   :  { %4288 = vmatpush1.bf16.msra.mxu0 %v5151_v23  ;;  %7698 = vst [vmem:[#allocation33_spill] sm:$0xff] %v5214_v18  ;;  %v5226_v47 = vsub.f32 %v60_v37, %v5208_v15  ;;  %v7704_v37 = vand.u32 4294901760, %v5195_v62  ;;  %v405_v23 = vand.u32 4294901760, %v404_v17  ;;  %v5246_v5 = vsub.f32 %v61_v46, %v5217_v14 }
  0x4e   :  { %4290 = vmatprep.subr.bf16.mxu0 %v5158_v26  ;;  %v5233_v33 = vpack.c.bf16 %v7701_v27, %v7700_v28  ;;  %v422_v36 = vsub.f32 %v5100_v50, %v7703_v13  ;;  %v7331_v26 = vand.u32 4294901760, %v5102_v51  ;;  %v417_v27 = vand.u32 4294901760, %v416_v52 }
  0x4f   :  { %7699 = vst [vmem:[#allocation34_spill] sm:$0xff] %v5226_v47  ;;  %v222_v0 = vsub.f32 %v5195_v62, %v7704_v37  ;;  %7705 = vst [vmem:[#allocation36_spill] sm:$0xff] %v5246_v5  ;;  %v7706_v43 = vand.u32 4294901760, %v5112_v58  ;;  %v7707_v17 = vand.u32 4294901760, %v5119_v63  ;;  %v7709_v52 = vand.u32 4294901760, %v5190_v53 }
  0x50   :  { %7702 = vst [vmem:[#allocation35_spill] sm:$0xff] %v5233_v33  ;;  %v434_v13 = vsub.f32 %v5102_v51, %v7331_v26  ;;  %v7710_v46 = vand.u32 4294901760, %v5192_v61  ;;  %v7342_v4 = vand.u32 4294901760, %v5106_v55  ;;  %v423_v26 = vand.u32 4294901760, %v422_v36 }
  0x51   :  { %4292 = vmatpush1.bf16.msra.mxu0 %v5179_v44  ;;  %v411_v44 = vand.u32 4294901760, %v410_v6  ;;  %v5254_v37 = vsub.f32 %v5112_v58, %v7706_v43  ;;  %v5259_v6 = vsub.f32 %v5119_v63, %v7707_v17  ;;  %v7712_v43 = vand.u32 4294901760, %v5104_v54 }
  0x52   :  { %4294 = vmatprep.subr.bf16.mxu0 %v5185_v45  ;;  %v63_v45 = vld [vmem:[#allocation2 + $0x20] sm:$0xff]  ;;  %v5265_v28 = vpack.c.bf16 %v7710_v46, %v7709_v52  ;;  %v435_v39 = vand.u32 4294901760, %v434_v13  ;;  %v5272_v34 = vand.u32 4294901760, %v62_v60  ;;  %v440_v17 = vsub.f32 %v5106_v55, %v7342_v4 }
  0x53   :  { %7708 = vst [vmem:[#allocation37_spill] sm:$0xff] %v5259_v6  ;;  %v428_v58 = vsub.f32 %v5104_v54, %v7712_v43  ;;  %v4301_v63 = vpack.c.bf16 %v411_v44, %v399_v35  ;;  %v5278_v52 = vand.u32 4294901760, %v63_v45  ;;  %v7347_v46 = vand.u32 4294901760, %v5108_v56  ;;  %v65_v43 = vld [vmem:[#allocation2 + $0x30] sm:$0xff] }
  0x54   :  { %7711 = vst [vmem:[#allocation38_spill] sm:$0xff] %v5265_v28  ;;  %v4303_v36 = vpack.c.bf16 %v417_v27, %v405_v23  ;;  %v7714_v13 = vand.u32 4294901760, %v5226_v47  ;;  %v5286_v21 = vsub.f32 %v62_v60, %v5272_v34  ;;  %v7352_v44 = vand.u32 4294901760, %v5110_v57 }
  0x55   :  { %4296 = vmatpush1.bf16.msra.mxu0 %v5214_v18  ;;  %7713 = vst [vmem:[#allocation39_spill] sm:$0xff] %v5278_v52  ;;  %v223_v18 = vand.u32 4294901760, %v222_v0  ;;  %v446_v35 = vsub.f32 %v5108_v56, %v7347_v46  ;;  %v7353_v4 = vand.u32 4294901760, %v5115_v59  ;;  %v4305_v0 = vpack.c.bf16 %v435_v39, %v423_v26 }
  0x56   :  { %4298 = vmatprep.subr.bf16.mxu0 %v5233_v33  ;;  %v233_v30 = vsub.f32 %v5226_v47, %v7714_v13  ;;  %7715 = vst [vmem:[#allocation40_spill] sm:$0xff] %v5286_v21  ;;  %v64_v33 = vld [vmem:[#allocation2 + $0x28] sm:$0xff]  ;;  %v429_v23 = vand.u32 4294901760, %v428_v58  ;;  %v441_v27 = vand.u32 4294901760, %v440_v17  ;;  %v7356_v13 = vand.u32 4294901760, %v5125_v3 }
  0x57   :  { %v5296_v60 = vsub.f32 %v63_v45, %v5278_v52  ;;  %v447_v47 = vand.u32 4294901760, %v446_v35  ;;  %v458_v46 = vsub.f32 %v5110_v57, %v7352_v44  ;;  %v452_v20 = vsub.f32 %v5115_v59, %v7353_v4 }
  0x58   :  { %v7717_v39 = vand.u32 4294901760, %v5246_v5  ;;  %v464_v58 = vsub.f32 %v5125_v3, %v7356_v13  ;;  %v5310_v45 = vand.u32 4294901760, %v64_v33  ;;  %v5313_v35 = vand.u32 4294901760, %v65_v43 }
  0x59   :  { %4300 = vmatpush1.bf16.msra.mxu0 %v5265_v28  ;;  %7716 = vst [vmem:[#allocation41_spill] sm:$0xff] %v5296_v60  ;;  %v234_v28 = vand.u32 4294901760, %v233_v30  ;;  %v459_v17 = vand.u32 4294901760, %v458_v46  ;;  %v7366_v44 = vand.u32 4294901760, %v5130_v7  ;;  %v7719_v30 = vand.u32 4294901760, %v5121_v1 }
  0x5a   :  { %4302 = vmatprep.subr.bf16.mxu0 %v4301_v63  ;;  %v244_v26 = vsub.f32 %v5246_v5, %v7717_v39  ;;  %7718 = vst [vmem:[#allocation42_spill] sm:$0xff] %v5313_v35  ;;  %v7720_v39 = vmov 0.0   ;;  %v4307_v5 = vpack.c.bf16 %v441_v27, %v429_v23  ;;  %v453_v13 = vand.u32 4294901760, %v452_v20 }
  0x5b   :  { %v5319_v4 = vsub.f32 %v5121_v1, %v7719_v30  ;;  %v465_v62 = vand.u32 4294901760, %v464_v58  ;;  %v4309_v63 = vpack.c.bf16 %v459_v17, %v447_v47  ;;  %v470_v46 = vsub.f32 %v5130_v7, %v7366_v44  ;;  %v66_v17 = vld [vmem:[#allocation2 + $0x38] sm:$0xff] }
  0x5c   :  { %224 = vmatmul.mubr.f32.vlgmr.msra.gmra.mrb[0].mxu0 %v223_v18  ;;  %v7369_v18 = vand.u32 4294901760, %v5296_v60  ;;  %v7365_v16 = vand.u32 4294901760, %v5132_v8  ;;  %v245_v52 = vand.u32 4294901760, %v244_v26  ;;  %v5328_v1 = vsub.f32 %v64_v33, %v5310_v45 }
  0x5d   :  { %4304 = vmatpush1.bf16.msra.mxu0 %v4303_v36  ;;  %229 = vmatprep.mubr.f32.mxu0 %v7720_v39  ;;  %v7363_v36 = vand.u32 4294901760, %v5134_v9  ;;  %v7364_v23 = vand.u32 4294901760, %v5136_v10  ;;  %v7722_v20 = vand.u32 4294901760, %v5286_v21  ;;  %v5336_v47 = vsub.f32 %v65_v43, %v5313_v35 }
  0x5e   :  { %4306 = vmatprep.subr.bf16.mxu0 %v4305_v0  ;;  %7721 = vst [vmem:[#allocation43_spill] sm:$0xff] %v5328_v1  ;;  %v471_v27 = vand.u32 4294901760, %v470_v46  ;;  %v482_v26 = vsub.f32 %v5132_v8, %v7365_v16  ;;  %v4311_v33 = vpack.c.bf16 %v465_v62, %v453_v13  ;;  %v7724_v43 = vand.u32 4294901760, %v5123_v2 }
  0x5f   :  { %v255_v0 = vsub.f32 %v5286_v21, %v7722_v20  ;;  %7723 = vst [vmem:[#allocation44_spill] sm:$0xff] %v5336_v47  ;;  %v488_v58 = vsub.f32 %v5136_v10, %v7364_v23  ;;  %v266_v46 = vsub.f32 %v5296_v60, %v7369_v18  ;;  %v7372_v13 = vand.u32 4294901760, %v5328_v1 }
  0x60   :  { %235 = vmatmul.mubr.f32.gmra.mrb[2].mxu0 %v234_v28  ;;  %v476_v28 = vsub.f32 %v5134_v9, %v7363_v36  ;;  %v5351_v30 = vsub.f32 %v5123_v2, %v7724_v43  ;;  %v483_v62 = vand.u32 4294901760, %v482_v26  ;;  %v7370_v23 = vand.u32 4294901760, %v5149_v22  ;;  %v67_v2 = vld [vmem:[#allocation2 + $0x40] sm:$0xff] }
  0x61   :  { %240 = vmatprep.mubr.f32.mxu0 %v7720_v39  ;;  %4308 = vmatpush1.bf16.msra.mxu0 %v4307_v5  ;;  %v7371_v5 = vand.u32 4294901760, %v5147_v19  ;;  %v489_v36 = vand.u32 4294901760, %v488_v58  ;;  %v256_v16 = vand.u32 4294901760, %v255_v0  ;;  %v5359_v21 = vand.u32 4294901760, %v66_v17 }
  0x62   :  { %7725 = vst [vmem:[#allocation45_spill] sm:$0xff] %v5351_v30  ;;  %4310 = vmatprep.subr.bf16.mxu0 %v4309_v63  ;;  %v477_v20 = vand.u32 4294901760, %v476_v28  ;;  %v4313_v44 = vpack.c.bf16 %v483_v62, %v471_v27  ;;  %v7379_v63 = vand.u32 4294901760, %v5336_v47  ;;  %v506_v28 = vsub.f32 %v5149_v22, %v7370_v23 }
  0x63   :  { %7726 = vst [vmem:[#allocation46_spill] sm:$0xff] %v5359_v21  ;;  %v494_v43 = vsub.f32 %v5147_v19, %v7371_v5  ;;  %v7727_v0 = vand.u32 4294901760, %v5138_v11  ;;  %v7729_v58 = vand.u32 4294901760, %v5140_v12  ;;  %v5384_v18 = vand.u32 4294901760, %v67_v2 }
  0x64   :  { %246 = vmatmul.mubr.f32.gmra.mrb[4].mxu0 %v245_v52  ;;  %v4315_v26 = vpack.c.bf16 %v489_v36, %v477_v20  ;;  %v7373_v52 = vand.u32 4294901760, %v5153_v24  ;;  %v7374_v36 = vand.u32 4294901760, %v5156_v25  ;;  %v277_v20 = vsub.f32 %v5328_v1, %v7372_v13 }
  0x65   :  { %251 = vmatprep.mubr.f32.mxu0 %v7720_v39  ;;  %4312 = vmatpush1.bf16.msra.mxu0 %v4311_v33  ;;  %v5373_v27 = vsub.f32 %v5138_v11, %v7727_v0  ;;  %v5378_v62 = vsub.f32 %v5140_v12, %v7729_v58  ;;  %v495_v33 = vand.u32 4294901760, %v494_v43  ;;  %7731 = vst [vmem:[#allocation49_spill] sm:$0xff] %v5384_v18  ;;  %v507_v23 = vand.u32 4294901760, %v506_v28  ;;  %v68_v0 = vld [vmem:[#allocation2 + $0x48] sm:$0xff] }
  0x66   :  { %4314 = vmatprep.subr.bf16.mxu0 %v4313_v44  ;;  %v500_v11 = vsub.f32 %v5153_v24, %v7373_v52  ;;  %v267_v5 = vand.u32 4294901760, %v266_v46  ;;  %v5390_v12 = vsub.f32 %v66_v17, %v5359_v21  ;;  %v512_v44 = vsub.f32 %v5156_v25, %v7374_v36  ;;  %v69_v36 = vld [vmem:[#allocation2 + $0x50] sm:$0xff] }
  0x67   :  { %7728 = vst [vmem:[#allocation47_spill] sm:$0xff] %v5373_v27  ;;  %7730 = vst [vmem:[#allocation48_spill] sm:$0xff] %v5378_v62  ;;  %v7380_v43 = vand.u32 4294901760, %v5171_v40  ;;  %v7733_v58 = vand.u32 4294901760, %v5162_v29  ;;  %v4317_v17 = vpack.c.bf16 %v507_v23, %v495_v33  ;;  %v5405_v52 = vand.u32 4294901760, %v68_v0 }
  0x68   :  { %257 = vmatmul.mubr.f32.gmra.mrb[6].mxu0 %v256_v16  ;;  %7732 = vst [vmem:[#allocation50_spill] sm:$0xff] %v5390_v12  ;;  %v288_v16 = vsub.f32 %v5336_v47, %v7379_v63  ;;  %v501_v46 = vand.u32 4294901760, %v500_v11  ;;  %v513_v13 = vand.u32 4294901760, %v512_v44  ;;  %v5412_v60 = vsub.f32 %v67_v2, %v5384_v18 }
  0x69   :  { %v5399_v28 = vsub.f32 %v5162_v29, %v7733_v58  ;;  %262 = vmatprep.mubr.f32.mxu0 %v7720_v39  ;;  %4316 = vmatpush1.bf16.msra.mxu0 %v4315_v26  ;;  %7734 = vst [vmem:[#allocation51_spill] sm:$0xff] %v5405_v52  ;;  %v518_v1 = vsub.f32 %v5171_v40, %v7380_v43  ;;  %v7381_v29 = vand.u32 4294901760, %v5173_v41  ;;  %v278_v58 = vand.u32 4294901760, %v277_v20  ;;  %v70_v43 = vld [vmem:[#allocation2 + $0x58] sm:$0xff] }
  0x6a   :  { %7735 = vst [vmem:[#allocation52_spill] sm:$0xff] %v5412_v60  ;;  %4318 = vmatprep.subr.bf16.mxu0 %v4317_v17  ;;  %v7386_v63 = vand.u32 4294901760, %v5254_v37  ;;  %v7389_v23 = vand.u32 4294901760, %v5259_v6  ;;  %v4319_v33 = vpack.c.bf16 %v513_v13, %v501_v46  ;;  %v7736_v20 = vand.u32 4294901760, %v5164_v31 }
  0x6b   :  { %v519_v11 = vand.u32 4294901760, %v518_v1  ;;  %v530_v44 = vsub.f32 %v5173_v41, %v7381_v29  ;;  %v5426_v17 = vand.u32 4294901760, %v69_v36  ;;  %v289_v13 = vand.u32 4294901760, %v288_v16 }
  0x6c   :  { %268 = vmatmul.mubr.f32.gmra.mrb[8].mxu0 %v267_v5  ;;  %v5423_v2 = vsub.f32 %v5164_v31, %v7736_v20  ;;  %v524_v5 = vsub.f32 %v5254_v37, %v7386_v63  ;;  %v536_v1 = vsub.f32 %v5259_v6, %v7389_v23  ;;  %v5435_v46 = vsub.f32 %v68_v0, %v5405_v52  ;;  %v71_v20 = vld [vmem:[#allocation2 + $0x60] sm:$0xff] }
  0x6d   :  { %273 = vmatprep.mubr.f32.mxu0 %v7720_v39  ;;  %7738 = vst [vmem:[#allocation54_spill] sm:$0xff] %v5426_v17  ;;  %4320 = vmatpush1.bf16.msra.mxu0 %v4319_v33  ;;  %v531_v29 = vand.u32 4294901760, %v530_v44  ;;  %v7390_v31 = vand.u32 4294901760, %v5319_v4  ;;  %v5439_v18 = vand.u32 4294901760, %v70_v43  ;;  %v7741_v63 = vand.u32 4294901760, %v5390_v12 }
  0x6e   :  { %7737 = vst [vmem:[#allocation53_spill] sm:$0xff] %v5423_v2  ;;  %7739 = vst [vmem:[#allocation55_spill] sm:$0xff] %v5435_v46  ;;  %v525_v26 = vand.u32 4294901760, %v524_v5  ;;  %v537_v47 = vand.u32 4294901760, %v536_v1  ;;  %v7391_v16 = vand.u32 4294901760, %v5351_v30  ;;  %v5450_v33 = vsub.f32 %v69_v36, %v5426_v17 }
  0x6f   :  { %7740 = vst [vmem:[#allocation56_spill] sm:$0xff] %v5439_v18  ;;  %v299_v21 = vsub.f32 %v5390_v12, %v7741_v63  ;;  %v4321_v23 = vpack.c.bf16 %v531_v29, %v519_v11  ;;  %v542_v0 = vsub.f32 %v5319_v4, %v7390_v31  ;;  %v7392_v5 = vand.u32 4294901760, %v5373_v27 }
  0x70   :  { %279 = vmatmul.mubr.f32.gmra.mrb[10].mxu0 %v278_v58  ;;  %v4323_v44 = vpack.c.bf16 %v537_v47, %v525_v26  ;;  %v7395_v58 = vand.u32 4294901760, %v5378_v62  ;;  %v7742_v1 = vand.u32 4294901760, %v5190_v53  ;;  %v554_v31 = vsub.f32 %v5351_v30, %v7391_v16 }
  0x71   :  { %284 = vmatprep.mubr.f32.mxu0 %v7720_v39  ;;  %4322 = vmatprep.subr.bf16.mxu0 %v4321_v23  ;;  %v543_v11 = vand.u32 4294901760, %v542_v0  ;;  %v7743_v36 = vand.u32 4294901760, %v5192_v61  ;;  %v5469_v26 = vsub.f32 %v70_v43, %v5439_v18  ;;  %v300_v0 = vand.u32 4294901760, %v299_v21 }
  0x72   :  { %v5457_v63 = vsub.f32 %v5190_v53, %v7742_v1  ;;  %4324 = vmatpush1.bf16.msra.mxu0 %v4323_v44  ;;  %v548_v53 = vsub.f32 %v5373_v27, %v7392_v5  ;;  %v560_v23 = vsub.f32 %v5378_v62, %v7395_v58  ;;  %v7744_v1 = vand.u32 4294901760, %v5412_v60 }
  0x73   :  { %v5466_v47 = vsub.f32 %v5192_v61, %v7743_v36  ;;  %v555_v36 = vand.u32 4294901760, %v554_v31  ;;  %v7401_v44 = vand.u32 4294901760, %v5399_v28  ;;  %v7400_v5 = vand.u32 4294901760, %v5423_v2 }
  0x74   :  { %290 = vmatmul.mubr.f32.gmra.mrb[12].mxu0 %v289_v13  ;;  %v310_v61 = vsub.f32 %v5412_v60, %v7744_v1  ;;  %v549_v16 = vand.u32 4294901760, %v548_v53  ;;  %v561_v29 = vand.u32 4294901760, %v560_v23  ;;  %v7745_v12 = vand.u32 4294901760, %v5435_v46 }
  0x75   :  { %295 = vmatprep.mubr.f32.mxu0 %v7720_v39  ;;  %v5487_v21 = vand.u32 4294901760, %v71_v20  ;;  %v4325_v58 = vpack.c.bf16 %v555_v36, %v543_v11  ;;  %v566_v31 = vsub.f32 %v5399_v28, %v7401_v44  ;;  %v7406_v1 = vand.u32 4294901760, %v5469_v26 }
  0x76   :  { %v321_v13 = vsub.f32 %v5435_v46, %v7745_v12  ;;  %v4327_v60 = vpack.c.bf16 %v561_v29, %v549_v16  ;;  %v578_v53 = vsub.f32 %v5423_v2, %v7400_v5  ;;  %v7402_v23 = vand.u32 4294901760, %v5457_v63  ;;  %v72_v16 = vld [vmem:[#allocation2 + $0x68] sm:$0xff] }
  0x77   :  { %7746 = vst [vmem:[#allocation57_spill] sm:$0xff] %v5487_v21  ;;  %v311_v43 = vand.u32 4294901760, %v310_v61  ;;  %4326 = vmatprep.subr.bf16.mxu0 %v4325_v58  ;;  %v567_v12 = vand.u32 4294901760, %v566_v31  ;;  %v7403_v46 = vand.u32 4294901760, %v5466_v47  ;;  %v7747_v11 = vand.u32 4294901760, %v5450_v33 }
  0x78   :  { %301 = vmatmul.mubr.f32.gmra.mrb[14].mxu0 %v300_v0  ;;  %v579_v29 = vand.u32 4294901760, %v578_v53  ;;  %v572_v5 = vsub.f32 %v5457_v63, %v7402_v23  ;;  %v322_v44 = vand.u32 4294901760, %v321_v13  ;;  %v5506_v0 = vsub.f32 %v71_v20, %v5487_v21 }
  0x79   :  { %306 = vmatprep.mubr.f32.mxu0 %v7720_v39  ;;  %v332_v36 = vsub.f32 %v5450_v33, %v7747_v11  ;;  %4328 = vmatpush1.bf16.msra.mxu0 %v4327_v60  ;;  %v584_v58 = vsub.f32 %v5466_v47, %v7403_v46  ;;  %v4335_v61 = vpack.c.bf16 %v5098_v49, %v5096_v48  ;;  %v5518_v13 = vand.u32 4294901760, %v72_v16  ;;  %v73_v48 = vld [vmem:[#allocation2 + $0x70] sm:$0xff] }
  0x7a   :  { %v343_v60 = vsub.f32 %v5469_v26, %v7406_v1  ;;  %v4329_v31 = vpack.c.bf16 %v579_v29, %v567_v12  ;;  %v573_v53 = vand.u32 4294901760, %v572_v5  ;;  %v4337_v11 = vpack.c.bf16 %v5102_v51, %v5100_v50 }
  0x7b   :  { %7748 = vst [vmem:[#allocation58_spill] sm:$0xff] %v5518_v13  ;;  %v585_v20 = vand.u32 4294901760, %v584_v58  ;;  %v4339_v23 = vpack.c.bf16 %v5106_v55, %v5104_v54  ;;  %v4341_v46 = vpack.c.bf16 %v5110_v57, %v5108_v56  ;;  %v333_v49 = vand.u32 4294901760, %v332_v36 }
  0x7c   :  { %312 = vmatmul.mubr.f32.gmra.mrb[16].mxu0 %v311_v43  ;;  %4330 = vmatprep.subr.bf16.mxu0 %v4329_v31  ;;  %v4343_v5 = vpack.c.bf16 %v5125_v3, %v5115_v59  ;;  %v4345_v43 = vpack.c.bf16 %v5132_v8, %v5130_v7  ;;  %v4347_v12 = vpack.c.bf16 %v5136_v10, %v5134_v9 }
  0x7d   :  { %317 = vmatprep.mubr.f32.mxu0 %v7720_v39  ;;  %v4331_v29 = vpack.c.bf16 %v585_v20, %v573_v53  ;;  %v4333_v58 = vpack.c.bf16 %v5091_v42, %v5086_v38  ;;  %v4349_v1 = vpack.c.bf16 %v5149_v22, %v5147_v19  ;;  %v4351_v36 = vpack.c.bf16 %v5156_v25, %v5153_v24 }
  0x7e   :  { %v4353_v31 = vpack.c.bf16 %v5173_v41, %v5171_v40  ;;  %v4355_v3 = vpack.c.bf16 %v5259_v6, %v5254_v37  ;;  %v4357_v8 = vpack.c.bf16 %v5351_v30, %v5319_v4  ;;  %v4359_v53 = vpack.c.bf16 %v5378_v62, %v5373_v27  ;;  %v74_v6 = vld [vmem:[#allocation2 + $0x78] sm:$0xff] }
  0x7f   :  { %v7420_v20 = vand.u32 4294901760, %v5506_v0  ;;  %v5547_v22 = vsub.f32 %v72_v16, %v5518_v13  ;;  %v5549_v19 = vand.u32 4294901760, %v73_v48  ;;  %v4361_v41 = vpack.c.bf16 %v5423_v2, %v5399_v28  ;;  %4332 = vmatpush1.bf16.msra.mxu0 %v4331_v29 }
  0x80   :  { %323 = vmatmul.mubr.f32.gmra.mrb[18].mxu0 %v322_v44  ;;  %4334 = vmatprep.subr.bf16.mxu0 %v4333_v58  ;;  %v344_v30 = vand.u32 4294901760, %v343_v60  ;;  %v5561_v27 = vand.u32 4294901760, %v74_v6 }
  0x81   :  { %7749 = vst [vmem:[#allocation59_spill] sm:$0xff] %v5549_v19  ;;  %328 = vmatprep.mubr.f32.mxu0 %v7720_v39  ;;  %v354_v44 = vsub.f32 %v5506_v0, %v7420_v20  ;;  %v7417_v62 = vand.u32 4294901760, %v5547_v22  ;;  %v5559_v16 = vsub.f32 %v73_v48, %v5549_v19  ;;  %v7774_v20 = vld [vmem:[#allocation33_spill] sm:$0xff] }
  0x82   :  { %7750 = vst [vmem:[#allocation60_spill] sm:$0xff] %v5561_v27  ;;  %v5569_v29 = vsub.f32 %v74_v6, %v5561_v27 }
  0x83   :  { %v355_v2 = vand.u32 4294901760, %v354_v44  ;;  %v365_v60 = vsub.f32 %v5547_v22, %v7417_v62 }
  0x84   :  { %334 = vmatmul.mubr.f32.gmra.mrb[20].mxu0 %v333_v49  ;;  %v7419_v49 = vand.u32 4294901760, %v5559_v16 }
  0x85   :  { %339 = vmatprep.mubr.f32.mxu0 %v7720_v39  ;;  %v366_v48 = vand.u32 4294901760, %v365_v60  ;;  %v7766_v60 = vld [vmem:[#allocation23_spill] sm:$0xff] }
  0x86   :  { %v376_v58 = vsub.f32 %v5559_v16, %v7419_v49  ;;  %v7773_v49 = vld [vmem:[#allocation44_spill] sm:$0xff] }
  0x88   :  { %345 = vmatmul.mubr.f32.gmra.mrb[22].mxu0 %v344_v30  ;;  %v7418_v30 = vand.u32 4294901760, %v5569_v29  ;;  %v377_v44 = vand.u32 4294901760, %v376_v58  ;;  %v7768_v58 = vld [vmem:[#allocation27_spill] sm:$0xff] }
  0x89   :  { %350 = vmatprep.mubr.f32.mxu0 %v7720_v39 }
  0x8a   :  { %v387_v62 = vsub.f32 %v5569_v29, %v7418_v30  ;;  %v7772_v30 = vld [vmem:[#allocation31_spill] sm:$0xff] }
  0x8c   :  { %356 = vmatmul.mubr.f32.gmra.mrb[24].mxu0 %v355_v2  ;;  %v388_v6 = vand.u32 4294901760, %v387_v62  ;;  %v7751_v62 = vld [vmem:[#allocation39_spill] sm:$0xff]  ;;  %v4363_v2 = vpack.c.bf16 %v5466_v47, %v5457_v63 }
  0x8d   :  { %361 = vmatprep.mubr.f32.mxu0 %v7720_v39 }
  0x90   :  { %367 = vmatmul.mubr.f32.gmra.mrb[26].mxu0 %v366_v48  ;;  %v7767_v48 = vld [vmem:[#allocation41_spill] sm:$0xff] }
  0x91   :  { %372 = vmatprep.mubr.f32.mxu0 %v7720_v39 }
  0x94   :  { %378 = vmatmul.mubr.f32.gmra.mrb[28].mxu0 %v377_v44  ;;  %v7769_v44 = vld [vmem:[#allocation28_spill] sm:$0xff] }
  0x95   :  { %383 = vmatprep.mubr.f32.mxu0 %v7720_v39 }
  0x98   :  { %389 = vmatmul.mubr.f32.gmra.mrb[30].mxu0 %v388_v6  ;;  %v7770_v6 = vld [vmem:[#allocation43_spill] sm:$0xff] }
  0x99   :  { %619 = vmatprep.mubr.f32.mxu0 %v7720_v39 }
  0x9c   :  { %621 = vmatmul.mubr.f32.vlgmr.msra.gmra.mrb[0].mxu0 %v5166_v32 }
  0x9d   :  { %4336 = vmatpush1.bf16.msra.mxu0 %v4335_v61  ;;  %626 = vmatprep.mubr.f32.mxu0 %v7720_v39  ;;  %v7758_v61 = vld [vmem:[#allocation34_spill] sm:$0xff] }
  0x9e   :  { %4338 = vmatprep.subr.bf16.mxu0 %v4337_v11  ;;  %v7759_v11 = vld [vmem:[#allocation15_spill] sm:$0xff] }
  0xa0   :  { %628 = vmatmul.mubr.f32.gmra.mrb[2].mxu0 %v5208_v15 }
  0xa1   :  { %633 = vmatprep.mubr.f32.mxu0 %v7720_v39  ;;  %4340 = vmatpush1.bf16.msra.mxu0 %v4339_v23  ;;  %v7754_v23 = vld [vmem:[#allocation49_spill] sm:$0xff] }
  0xa2   :  { %4342 = vmatprep.subr.bf16.mxu0 %v4341_v46  ;;  %v7752_v46 = vld [vmem:[#allocation46_spill] sm:$0xff] }
  0xa4   :  { %635 = vmatmul.mubr.f32.gmra.mrb[4].mxu0 %v5217_v14 }
  0xa5   :  { %640 = vmatprep.mubr.f32.mxu0 %v7720_v39  ;;  %4344 = vmatpush1.bf16.msra.mxu0 %v4343_v5  ;;  %v7760_v5 = vld [vmem:[#allocation16_spill] sm:$0xff] }
  0xa6   :  { %4346 = vmatprep.subr.bf16.mxu0 %v4345_v43  ;;  %v7761_v43 = vld [vmem:[#allocation36_spill] sm:$0xff] }
  0xa8   :  { %642 = vmatmul.mubr.f32.gmra.mrb[6].mxu0 %v5272_v34 }
  0xa9   :  { %647 = vmatprep.mubr.f32.mxu0 %v7720_v39  ;;  %4348 = vmatpush1.bf16.msra.mxu0 %v4347_v12  ;;  %v7762_v12 = vld [vmem:[#allocation17_spill] sm:$0xff] }
  0xaa   :  { %4350 = vmatprep.subr.bf16.mxu0 %v4349_v1  ;;  %v7753_v1 = vld [vmem:[#allocation12_spill] sm:$0xff] }
  0xac   :  { %649 = vmatmul.mubr.f32.gmra.mrb[8].mxu0 %v7751_v62 }
  0xad   :  { %654 = vmatprep.mubr.f32.mxu0 %v7720_v39  ;;  %4352 = vmatpush1.bf16.msra.mxu0 %v4351_v36  ;;  %v7763_v36 = vld [vmem:[#allocation18_spill] sm:$0xff] }
  0xae   :  { %4354 = vmatprep.subr.bf16.mxu0 %v4353_v31  ;;  %v7764_v31 = vld [vmem:[#allocation40_spill] sm:$0xff] }
  0xb0   :  { %656 = vmatmul.mubr.f32.gmra.mrb[10].mxu0 %v5310_v45 }
  0xb1   :  { %661 = vmatprep.mubr.f32.mxu0 %v7720_v39  ;;  %4356 = vmatpush1.bf16.msra.mxu0 %v4355_v3  ;;  %v7755_v3 = vld [vmem:[#allocation32_spill] sm:$0xff] }
  0xb2   :  { %4358 = vmatprep.subr.bf16.mxu0 %v4357_v8  ;;  %v7756_v8 = vld [vmem:[#allocation13_spill] sm:$0xff] }
  0xb4   :  { %663 = vmatmul.mubr.f32.gmra.mrb[12].mxu0 %v5313_v35  ;;  %v7789_v35 = vand.u32 4294901760, %v5104_v54 }
  0xb5   :  { %668 = vmatprep.mubr.f32.mxu0 %v7720_v39  ;;  %4360 = vmatpush1.bf16.msra.mxu0 %v4359_v53  ;;  %v7765_v53 = vld [vmem:[#allocation21_spill] sm:$0xff] }
  0xb6   :  { %4362 = vmatprep.subr.bf16.mxu0 %v4361_v41  ;;  %v7757_v41 = vld [vmem:[#allocation14_spill] sm:$0xff] }
  0xb8   :  { %670 = vmatmul.mubr.f32.gmra.mrb[14].mxu0 %v7752_v46  ;;  %v7787_v46 = vand.u32 4294901760, %v5102_v51  ;;  %v7793_v51 = vand.u32 4294901760, %v7758_v61 }
  0xb9   :  { %675 = vmatprep.mubr.f32.mxu0 %v7720_v39  ;;  %4364 = vmatpush1.bf16.msra.mxu0 %v4363_v2  ;;  %v7771_v2 = vld [vmem:[#allocation30_spill] sm:$0xff] }
  0xba   :  { %4366 = vmatprep.subr.bf16.mxu0 %v7753_v1 }
  0xbc   :  { %677 = vmatmul.mubr.f32.gmra.mrb[16].mxu0 %v7754_v23  ;;  %v7781_v23 = vld [vmem:[#allocation55_spill] sm:$0xff] }
  0xbd   :  { %682 = vmatprep.mubr.f32.mxu0 %v7720_v39 }
  0xc0   :  { %684 = vmatmul.mubr.f32.gmra.mrb[18].mxu0 %v5405_v52  ;;  %v7780_v52 = vld [vmem:[#allocation52_spill] sm:$0xff] }
  0xc1   :  { %689 = vmatprep.mubr.f32.mxu0 %v7720_v39 }
  0xc4   :  { %691 = vmatmul.mubr.f32.gmra.mrb[20].mxu0 %v5426_v17  ;;  %v7779_v17 = vld [vmem:[#allocation38_spill] sm:$0xff] }
  0xc5   :  { %696 = vmatprep.mubr.f32.mxu0 %v7720_v39 }
  0xc8   :  { %698 = vmatmul.mubr.f32.gmra.mrb[22].mxu0 %v5439_v18  ;;  %v7778_v18 = vld [vmem:[#allocation50_spill] sm:$0xff] }
  0xc9   :  { %703 = vmatprep.mubr.f32.mxu0 %v7720_v39 }
  0xcc   :  { %705 = vmatmul.mubr.f32.gmra.mrb[24].mxu0 %v5487_v21 }
  0xcd   :  { %710 = vmatprep.mubr.f32.mxu0 %v7720_v39 }
  0xd0   :  { %712 = vmatmul.mubr.f32.gmra.mrb[26].mxu0 %v5518_v13  ;;  %v7777_v13 = vand.u32 4294901760, %v5091_v42 }
  0xd1   :  { %717 = vmatprep.mubr.f32.mxu0 %v7720_v39 }
  0xd4   :  { %719 = vmatmul.mubr.f32.gmra.mrb[28].mxu0 %v5549_v19  ;;  %v7776_v19 = vand.u32 4294901760, %v5086_v38  ;;  %v7782_v38 = vld [vmem:[#allocation19_spill] sm:$0xff] }
  0xd5   :  { %724 = vmatprep.mubr.f32.mxu0 %v7720_v39  ;;  %v7783_v42 = vand.u32 4294901760, %v7782_v38  ;;  %v7791_v38 = vand.u32 4294901760, %v5108_v56 }
  0xd6   :  { %v4397_v21 = vpack.c.bf16 %v7777_v13, %v7776_v19  ;;  %v7784_v19 = vld [vmem:[#allocation20_spill] sm:$0xff] }
  0xd8   :  { %726 = vmatmul.mubr.f32.gmra.mrb[30].mxu0 %v5561_v27  ;;  %v7775_v27 = vld [vmem:[#allocation35_spill] sm:$0xff] }
  0xd9   :  { %860 = vmatprep.mubr.f32.mxu0 %v7720_v39 }
  0xdc   :  { %863 = vmatmul.mubr.f32.vlgmr.msra.gmra.mrb[0].mxu0 %v7755_v3 }
  0xdd   :  { %4368 = vmatpush1.bf16.msra.mxu0 %v7756_v8  ;;  %868 = vmatprep.mubr.f32.mxu0 %v7720_v39 }
  0xde   :  { %4370 = vmatprep.subr.bf16.mxu0 %v7757_v41 }
  0xe0   :  { %871 = vmatmul.mubr.f32.gmra.mrb[2].mxu0 %v7758_v61  ;;  %v7803_v61 = vld [vmem:[#allocation25_spill] sm:$0xff] }
  0xe1   :  { %876 = vmatprep.mubr.f32.mxu0 %v7720_v39  ;;  %4372 = vmatpush1.bf16.msra.mxu0 %v7759_v11 }
  0xe2   :  { %4374 = vmatprep.subr.bf16.mxu0 %v7760_v5 }
  0xe4   :  { %879 = vmatmul.mubr.f32.gmra.mrb[4].mxu0 %v7761_v43 }
  0xe5   :  { %884 = vmatprep.mubr.f32.mxu0 %v7720_v39  ;;  %4376 = vmatpush1.bf16.msra.mxu0 %v7762_v12 }
  0xe6   :  { %4378 = vmatprep.subr.bf16.mxu0 %v7763_v36 }
  0xe8   :  { %887 = vmatmul.mubr.f32.gmra.mrb[6].mxu0 %v7764_v31 }
  0xe9   :  { %892 = vmatprep.mubr.f32.mxu0 %v7720_v39  ;;  %4380 = vmatpush1.bf16.msra.mxu0 %v7765_v53 }
  0xea   :  { %4382 = vmatprep.subr.bf16.mxu0 %v7766_v60 }
  0xec   :  { %895 = vmatmul.mubr.f32.gmra.mrb[8].mxu0 %v7767_v48 }
  0xed   :  { %900 = vmatprep.mubr.f32.mxu0 %v7720_v39  ;;  %4384 = vmatpush1.bf16.msra.mxu0 %v7768_v58 }
  0xee   :  { %4386 = vmatprep.subr.bf16.mxu0 %v7769_v44 }
  0xf0   :  { %903 = vmatmul.mubr.f32.gmra.mrb[10].mxu0 %v7770_v6 }
  0xf1   :  { %908 = vmatprep.mubr.f32.mxu0 %v7720_v39  ;;  %4388 = vmatpush1.bf16.msra.mxu0 %v7771_v2 }
  0xf2   :  { %4390 = vmatprep.subr.bf16.mxu0 %v7772_v30  ;;  %v7790_v30 = vand.u32 4294901760, %v5106_v55  ;;  %v7797_v55 = vand.u32 4294901760, %v5130_v7 }
  0xf4   :  { %911 = vmatmul.mubr.f32.gmra.mrb[12].mxu0 %v7773_v49  ;;  %v4403_v2 = vpack.c.bf16 %v7790_v30, %v7789_v35  ;;  %v7798_v35 = vld [vmem:[#allocation24_spill] sm:$0xff]  ;;  %v7801_v30 = vand.u32 4294901760, %v5134_v9 }
  0xf5   :  { %916 = vmatprep.mubr.f32.mxu0 %v7720_v39  ;;  %4392 = vmatpush1.bf16.msra.mxu0 %v7774_v20  ;;  %v7788_v20 = vand.u32 4294901760, %v7755_v3  ;;  %v7802_v3 = vand.u32 4294901760, %v5136_v10  ;;  %v7810_v10 = vand.u32 4294901760, %v5171_v40 }
  0xf6   :  { %4394 = vmatprep.subr.bf16.mxu0 %v7775_v27 }
  0xf8   :  { %919 = vmatmul.mubr.f32.gmra.mrb[14].mxu0 %v7778_v18 }
  0xf9   :  { %924 = vmatprep.mubr.f32.mxu0 %v7720_v39  ;;  %4396 = vmatpush1.bf16.msra.mxu0 %v7779_v17  ;;  %v7786_v17 = vand.u32 4294901760, %v5100_v50 }
  0xfa   :  { %4398 = vmatprep.subr.bf16.mxu0 %v4397_v21  ;;  %v7785_v21 = vand.u32 4294901760, %v7784_v19  ;;  %v7805_v19 = vld [vmem:[#allocation26_spill] sm:$0xff] }
  0xfb   :  { %v4401_v27 = vpack.c.bf16 %v7787_v46, %v7786_v17  ;;  %v7794_v17 = vand.u32 4294901760, %v5115_v59  ;;  %v4411_v59 = vpack.c.bf16 %v7802_v3, %v7801_v30  ;;  %v7825_v30 = vand.u32 4294901760, %v5399_v28  ;;  %v7826_v3 = vld [vmem:[#allocation53_spill] sm:$0xff] }
  0xfc   :  { %927 = vmatmul.mubr.f32.gmra.mrb[16].mxu0 %v7780_v52  ;;  %v4399_v13 = vpack.c.bf16 %v7785_v21, %v7783_v42  ;;  %v7792_v42 = vand.u32 4294901760, %v5110_v57  ;;  %v7800_v57 = vand.u32 4294901760, %v7761_v43  ;;  %v7806_v21 = vand.u32 4294901760, %v7805_v19 }
  0xfd   :  { %932 = vmatprep.mubr.f32.mxu0 %v7720_v39  ;;  %v7808_v43 = vand.u32 4294901760, %v5153_v24  ;;  %v7832_v28 = vand.u32 4294901760, %v7780_v52  ;;  %v7836_v52 = vand.u32 4294901760, %v5506_v0 }
  0xfe   :  { %v4405_v50 = vpack.c.bf16 %v7792_v42, %v7791_v38  ;;  %v7809_v38 = vand.u32 4294901760, %v5156_v25  ;;  %v7811_v42 = vld [vmem:[#allocation29_spill] sm:$0xff]  ;;  %v7817_v25 = vand.u32 4294901760, %v5319_v4 }
 0x100   :  { %935 = vmatmul.mubr.f32.gmra.mrb[18].mxu0 %v7781_v23  ;;  %v4415_v9 = vpack.c.bf16 %v7809_v38, %v7808_v43  ;;  %v1745_v43 = vld [vmem:[#allocation7 + $0x8] sm:$0xff]  ;;  %v1762_v38 = vld [vmem:[#allocation7 + $0x90] sm:$0xff] }
 0x101   :  { %940 = vmatprep.mubr.f32.mxu0 %v7720_v39 }
 0x104   :  { %943 = vmatmul.mubr.f32.gmra.mrb[20].mxu0 %v5450_v33 }
 0x105   :  { %948 = vmatprep.mubr.f32.mxu0 %v7720_v39 }
 0x108   :  { %951 = vmatmul.mubr.f32.gmra.mrb[22].mxu0 %v5469_v26 }
 0x109   :  { %956 = vmatprep.mubr.f32.mxu0 %v7720_v39 }
 0x10c   :  { %959 = vmatmul.mubr.f32.gmra.mrb[24].mxu0 %v5506_v0 }
 0x10d   :  { %964 = vmatprep.mubr.f32.mxu0 %v7720_v39 }
 0x110   :  { %967 = vmatmul.mubr.f32.gmra.mrb[26].mxu0 %v5547_v22 }
 0x111   :  { %972 = vmatprep.mubr.f32.mxu0 %v7720_v39 }
 0x114   :  { %975 = vmatmul.mubr.f32.gmra.mrb[28].mxu0 %v5559_v16 }
 0x115   :  { %980 = vmatprep.mubr.f32.mxu0 %v7720_v39 }
 0x118   :  { %983 = vmatmul.mubr.f32.gmra.mrb[30].mxu0 %v5569_v29 }
 0x119   :  { %1085 = vmatprep.mubr.f32.mxu0 %v7720_v39 }
 0x11c   :  { %1089 = vmatmul.mubr.f32.vlgmr.msra.gmra.mrb[0].mxu0 %v7788_v20  ;;  %v7795_v20 = vld [vmem:[#allocation22_spill] sm:$0xff] }
 0x11d   :  { %4400 = vmatpush1.bf16.msra.mxu0 %v4399_v13  ;;  %1094 = vmatprep.mubr.f32.mxu0 %v7720_v39  ;;  %v7796_v46 = vand.u32 4294901760, %v7795_v20  ;;  %v7807_v13 = vand.u32 4294901760, %v7764_v31  ;;  %v7814_v31 = vand.u32 4294901760, %v5254_v37  ;;  %v7815_v20 = vld [vmem:[#allocation37_spill] sm:$0xff] }
 0x11e   :  { %4402 = vmatprep.subr.bf16.mxu0 %v4401_v27  ;;  %v7799_v27 = vand.u32 4294901760, %v7798_v35  ;;  %v7820_v35 = vand.u32 4294901760, %v7770_v6  ;;  %v7829_v6 = vand.u32 4294901760, %v5457_v63  ;;  %v7834_v63 = vand.u32 4294901760, %v5450_v33 }
 0x11f   :  { %v4407_v54 = vpack.c.bf16 %v7796_v46, %v7794_v17  ;;  %v7813_v17 = vand.u32 4294901760, %v7767_v48  ;;  %v7816_v46 = vand.u32 4294901760, %v7815_v20  ;;  %v7821_v48 = vld [vmem:[#allocation47_spill] sm:$0xff]  ;;  %v7838_v33 = vand.u32 4294901760, %v5559_v16 }
 0x120   :  { %1098 = vmatmul.mubr.f32.gmra.mrb[2].mxu0 %v7793_v51  ;;  %v4409_v56 = vpack.c.bf16 %v7799_v27, %v7797_v55  ;;  %v7822_v27 = vand.u32 4294901760, %v7821_v48 }
 0x121   :  { %1103 = vmatprep.mubr.f32.mxu0 %v7720_v39  ;;  %4404 = vmatpush1.bf16.msra.mxu0 %v4403_v2  ;;  %v7804_v2 = vand.u32 4294901760, %v7803_v61  ;;  %v4419_v24 = vpack.c.bf16 %v7816_v46, %v7814_v31  ;;  %v7828_v61 = vand.u32 4294901760, %v7773_v49  ;;  %v7833_v49 = vand.u32 4294901760, %v7781_v23  ;;  %v1761_v23 = vld [vmem:[#allocation7 + $0x88] sm:$0xff] }
 0x122   :  { %4406 = vmatprep.subr.bf16.mxu0 %v4405_v50  ;;  %v7812_v50 = vand.u32 4294901760, %v7811_v42  ;;  %v1837_v42 = vand.u32 4294901760, %v1762_v38 }
 0x123   :  { %v4413_v7 = vpack.c.bf16 %v7806_v21, %v7804_v2  ;;  %v7830_v2 = vand.u32 4294901760, %v5466_v47  ;;  %v7831_v21 = vand.u32 4294901760, %v7778_v18  ;;  %v7835_v18 = vand.u32 4294901760, %v5469_v26 }
 0x124   :  { %1107 = vmatmul.mubr.f32.gmra.mrb[4].mxu0 %v7800_v57  ;;  %v4417_v51 = vpack.c.bf16 %v7812_v50, %v7810_v10  ;;  %v7837_v47 = vand.u32 4294901760, %v5547_v22  ;;  %v7839_v26 = vand.u32 4294901760, %v5569_v29  ;;  %v1786_v10 = vand.u32 4294901760, %v1745_v43  ;;  %v1746_v50 = vld [vmem:[#allocation7 + $0x10] sm:$0xff] }
 0x125   :  { %1112 = vmatprep.mubr.f32.mxu0 %v7720_v39  ;;  %4408 = vmatpush1.bf16.msra.mxu0 %v4407_v54  ;;  %v7818_v54 = vld [vmem:[#allocation45_spill] sm:$0xff]  ;;  %v4427_v19 = vpack.c.bf16 %v7830_v2, %v7829_v6  ;;  %v5793_v48 = vsub.f32 %v1762_v38, %v1837_v42  ;;  %v1750_v2 = vld [vmem:[#allocation7 + $0x30] sm:$0xff]  ;;  %v7858_v38 = vld [vmem:[#allocation51_spill] sm:$0xff] }
 0x126   :  { %4410 = vmatprep.subr.bf16.mxu0 %v4409_v56  ;;  %v7819_v55 = vand.u32 4294901760, %v7818_v54  ;;  %v7823_v56 = vld [vmem:[#allocation48_spill] sm:$0xff]  ;;  %v1749_v54 = vld [vmem:[#allocation7 + $0x28] sm:$0xff] }
 0x127   :  { %v7824_v57 = vand.u32 4294901760, %v7823_v56 }
 0x128   :  { %1116 = vmatmul.mubr.f32.gmra.mrb[6].mxu0 %v7807_v13  ;;  %v4421_v40 = vpack.c.bf16 %v7819_v55, %v7817_v25  ;;  %v1834_v13 = vand.u32 4294901760, %v1761_v23  ;;  %v1748_v25 = vld [vmem:[#allocation7 + $0x20] sm:$0xff] }
 0x129   :  { %1121 = vmatprep.mubr.f32.mxu0 %v7720_v39  ;;  %4412 = vmatpush1.bf16.msra.mxu0 %v4411_v59  ;;  %v4423_v37 = vpack.c.bf16 %v7824_v57, %v7822_v27  ;;  %v7827_v59 = vand.u32 4294901760, %v7826_v3  ;;  %v1766_v27 = vld [vmem:[#allocation7 + $0xb0] sm:$0xff]  ;;  %v1789_v57 = vand.u32 4294901760, %v1746_v50  ;;  %v1767_v3 = vld [vmem:[#allocation7 + $0xb8] sm:$0xff] }
 0x12a   :  { %4414 = vmatprep.subr.bf16.mxu0 %v4413_v7  ;;  %v1744_v7 = vld [vmem:[#allocation7] sm:$0xff]  ;;  %v5782_v20 = vsub.f32 %v1761_v23, %v1834_v13  ;;  %v1849_v6 = vand.u32 4294901760, %v1766_v27 }
 0x12b   :  { %v4425_v4 = vpack.c.bf16 %v7827_v59, %v7825_v30  ;;  %v1783_v22 = vand.u32 4294901760, %v1744_v7 }
 0x12c   :  { %1125 = vmatmul.mubr.f32.gmra.mrb[8].mxu0 %v7813_v17  ;;  %v1764_v17 = vld [vmem:[#allocation7 + $0xa0] sm:$0xff]  ;;  %7842 = vst [vmem:[#allocation32_spill] sm:$0xff] %v5782_v20 }
 0x12d   :  { %1130 = vmatprep.mubr.f32.mxu0 %v7720_v39  ;;  %4416 = vmatpush1.bf16.msra.mxu0 %v4415_v9  ;;  %v1763_v9 = vld [vmem:[#allocation7 + $0x98] sm:$0xff]  ;;  %v5784_v46 = vsub.f32 %v1744_v7, %v1783_v22  ;;  %v5787_v55 = vpack.c.bf16 %v1786_v10, %v1783_v22  ;;  %v1843_v30 = vand.u32 4294901760, %v1764_v17  ;;  %v7855_v22 = vld [vmem:[#allocation46_spill] sm:$0xff] }
 0x12e   :  { %4418 = vmatprep.subr.bf16.mxu0 %v4417_v51  ;;  %v1840_v16 = vand.u32 4294901760, %v1763_v9  ;;  %v1747_v51 = vld [vmem:[#allocation7 + $0x18] sm:$0xff] }
 0x12f   :  { %7843 = vst [vmem:[#allocation13_spill] sm:$0xff] %v5787_v55 }
 0x130   :  { %1134 = vmatmul.mubr.f32.gmra.mrb[10].mxu0 %v7820_v35  ;;  %v5791_v35 = vpack.c.bf16 %v1840_v16, %v1837_v42  ;;  %v5797_v56 = vsub.f32 %v1763_v9, %v1840_v16  ;;  %v7859_v9 = vld [vmem:[#allocation54_spill] sm:$0xff]  ;;  %v7861_v42 = vld [vmem:[#allocation57_spill] sm:$0xff] }
 0x131   :  { %1139 = vmatprep.mubr.f32.mxu0 %v7720_v39  ;;  %4420 = vmatpush1.bf16.msra.mxu0 %v4419_v24  ;;  %v1765_v24 = vld [vmem:[#allocation7 + $0xa8] sm:$0xff]  ;;  %v7862_v16 = vld [vmem:[#allocation58_spill] sm:$0xff] }
 0x132   :  { %4422 = vmatprep.subr.bf16.mxu0 %v4421_v40  ;;  %v5789_v40 = vsub.f32 %v1745_v43, %v1786_v10  ;;  %7844 = vst [vmem:[#allocation14_spill] sm:$0xff] %v5791_v35  ;;  %v1846_v59 = vand.u32 4294901760, %v1765_v24  ;;  %v7854_v43 = vld [vmem:[#allocation35_spill] sm:$0xff]  ;;  %v7860_v10 = vld [vmem:[#allocation56_spill] sm:$0xff] }
 0x134   :  { %1143 = vmatmul.mubr.f32.gmra.mrb[12].mxu0 %v7828_v61  ;;  %v1798_v61 = vand.u32 4294901760, %v1749_v54 }
 0x135   :  { %1148 = vmatprep.mubr.f32.mxu0 %v7720_v39  ;;  %4424 = vmatpush1.bf16.msra.mxu0 %v4423_v37  ;;  %v1792_v37 = vand.u32 4294901760, %v1747_v51 }
 0x136   :  { %4426 = vmatprep.subr.bf16.mxu0 %v4425_v4  ;;  %v1795_v4 = vand.u32 4294901760, %v1748_v25 }
 0x138   :  { %1152 = vmatmul.mubr.f32.gmra.mrb[14].mxu0 %v7831_v21  ;;  %v5806_v21 = vsub.f32 %v1747_v51, %v1792_v37  ;;  %v5828_v7 = vpack.c.bf16 %v1798_v61, %v1795_v4  ;;  %v7864_v51 = vld [vmem:[#allocation60_spill] sm:$0xff] }
 0x139   :  { %1157 = vmatprep.mubr.f32.mxu0 %v7720_v39  ;;  %4428 = vmatpush1.bf16.msra.mxu0 %v4427_v19  ;;  %v5804_v19 = vsub.f32 %v1746_v50, %v1789_v57  ;;  %v7863_v50 = vld [vmem:[#allocation59_spill] sm:$0xff] }
 0x13a   :  { %4430 = vmatprep.subr.bf16.mxu0 %v7753_v1  ;;  %v1760_v1 = vld [vmem:[#allocation7 + $0x80] sm:$0xff]  ;;  %7847 = vst [vmem:[#allocation16_spill] sm:$0xff] %v5828_v7 }
 0x13b   :  { %v1831_v0 = vand.u32 4294901760, %v1760_v1 }
 0x13c   :  { %1161 = vmatmul.mubr.f32.gmra.mrb[16].mxu0 %v7832_v28  ;;  %v5808_v28 = vsub.f32 %v1764_v17, %v1843_v30 }
 0x13d   :  { %1166 = vmatprep.mubr.f32.mxu0 %v7720_v39  ;;  %v5778_v31 = vpack.c.bf16 %v1834_v13, %v1831_v0  ;;  %v5780_v29 = vsub.f32 %v1760_v1, %v1831_v0 }
 0x13f   :  { %7840 = vst [vmem:[#allocation39_spill] sm:$0xff] %v5778_v31  ;;  %7841 = vst [vmem:[#allocation12_spill] sm:$0xff] %v5780_v29  ;;  %4462 = vmatprep.subr.bf16.mxu1 %v5778_v31 }
 0x140   :  { %1170 = vmatmul.mubr.f32.gmra.mrb[18].mxu0 %v7833_v49  ;;  %4464 = vmatpush3.bf16.msra.mxu1 %v5787_v55  ;;  %v1751_v49 = vld [vmem:[#allocation7 + $0x38] sm:$0xff] }
 0x141   :  { %1175 = vmatprep.mubr.f32.mxu0 %v7720_v39  ;;  %4466 = vmatprep.subr.bf16.mxu1 %v5791_v35  ;;  %v1804_v23 = vand.u32 4294901760, %v1751_v49 }
 0x143   :  { %v5836_v13 = vsub.f32 %v1751_v49, %v1804_v23  ;;  %v1773_v49 = vld [vmem:[#allocation7 + $0xe8] sm:$0xff] }
 0x144   :  { %1179 = vmatmul.mubr.f32.gmra.mrb[20].mxu0 %v7834_v63  ;;  %v5814_v63 = vsub.f32 %v1765_v24, %v1846_v59 }
 0x145   :  { %1184 = vmatprep.mubr.f32.mxu0 %v7720_v39 }
 0x148   :  { %1188 = vmatmul.mubr.f32.gmra.mrb[22].mxu0 %v7835_v18  ;;  %v1852_v18 = vand.u32 4294901760, %v1767_v3 }
 0x149   :  { %1193 = vmatprep.mubr.f32.mxu0 %v7720_v39 }
 0x14a   :  { %v5825_v1 = vsub.f32 %v1767_v3, %v1852_v18  ;;  %v1755_v3 = vld [vmem:[#allocation7 + $0x58] sm:$0xff] }
 0x14c   :  { %1197 = vmatmul.mubr.f32.gmra.mrb[24].mxu0 %v7836_v52  ;;  %v5818_v52 = vsub.f32 %v1748_v25, %v1795_v4  ;;  %v1816_v4 = vand.u32 4294901760, %v1755_v3 }
 0x14d   :  { %1202 = vmatprep.mubr.f32.mxu0 %v7720_v39 }
 0x150   :  { %1206 = vmatmul.mubr.f32.gmra.mrb[26].mxu0 %v7837_v47  ;;  %v5820_v47 = vsub.f32 %v1749_v54, %v1798_v61 }
 0x151   :  { %1211 = vmatprep.mubr.f32.mxu0 %v7720_v39 }
 0x154   :  { %1215 = vmatmul.mubr.f32.gmra.mrb[28].mxu0 %v7838_v33  ;;  %v5822_v33 = vsub.f32 %v1766_v27, %v1849_v6  ;;  %v1770_v27 = vld [vmem:[#allocation7 + $0xd0] sm:$0xff] }
 0x155   :  { %1220 = vmatprep.mubr.f32.mxu0 %v7720_v39 }
 0x158   :  { %1224 = vmatmul.mubr.f32.gmra.mrb[30].mxu0 %v7839_v26  ;;  %v1801_v26 = vand.u32 4294901760, %v1750_v2 }
 0x159   :  { %1390 = vmatprep.mubr.f32.mxu0 %v7720_v39 }
 0x15a   :  { %v5830_v0 = vsub.f32 %v1750_v2, %v1801_v26  ;;  %v1772_v2 = vld [vmem:[#allocation7 + $0xe0] sm:$0xff] }
 0x15c   :  { %1392 = vmatmul.mubr.f32.vlgmr.msra.gmra.mrb[0].mxu0 %v5166_v32 }
 0x15d   :  { %4432 = vmatpush1.bf16.msra.mxu0 %v7756_v8  ;;  %1397 = vmatprep.mubr.f32.mxu0 %v7720_v39  ;;  %v5802_v8 = vpack.c.bf16 %v1792_v37, %v1789_v57  ;;  %v1771_v57 = vld [vmem:[#allocation7 + $0xd8] sm:$0xff]  ;;  %v1861_v37 = vand.u32 4294901760, %v1770_v27 }
 0x15e   :  { %4434 = vmatprep.subr.bf16.mxu0 %v7757_v41  ;;  %v5812_v41 = vpack.c.bf16 %v1846_v59, %v1843_v30  ;;  %v1754_v30 = vld [vmem:[#allocation7 + $0x50] sm:$0xff] }
 0x15f   :  { %7845 = vst [vmem:[#allocation34_spill] sm:$0xff] %v5802_v8  ;;  %4468 = vmatpush3.bf16.msra.mxu1 %v5802_v8  ;;  %v1813_v59 = vand.u32 4294901760, %v1754_v30 }
 0x160   :  { %1399 = vmatmul.mubr.f32.gmra.mrb[2].mxu0 %v5208_v15  ;;  %7846 = vst [vmem:[#allocation15_spill] sm:$0xff] %v5812_v41  ;;  %4470 = vmatprep.subr.bf16.mxu1 %v5812_v41 }
 0x161   :  { %1404 = vmatprep.mubr.f32.mxu0 %v7720_v39  ;;  %4436 = vmatpush1.bf16.msra.mxu0 %v7759_v11  ;;  %v5834_v11 = vpack.c.bf16 %v1852_v18, %v1849_v6  ;;  %v5920_v6 = vpack.c.bf16 %v1816_v4, %v1813_v59  ;;  %v1867_v18 = vand.u32 4294901760, %v1772_v2 }
 0x162   :  { %4438 = vmatprep.subr.bf16.mxu0 %v7760_v5  ;;  %v5842_v5 = vpack.c.bf16 %v1804_v23, %v1801_v26  ;;  %v1870_v26 = vand.u32 4294901760, %v1773_v49  ;;  %v1756_v23 = vld [vmem:[#allocation7 + $0x60] sm:$0xff] }
 0x163   :  { %7848 = vst [vmem:[#allocation36_spill] sm:$0xff] %v5834_v11  ;;  %4472 = vmatpush3.bf16.msra.mxu1 %v5828_v7  ;;  %7868 = vst [vmem:[#allocation23_spill] sm:$0xff] %v5920_v6 }
 0x164   :  { %1406 = vmatmul.mubr.f32.gmra.mrb[4].mxu0 %v5217_v14  ;;  %7849 = vst [vmem:[#allocation17_spill] sm:$0xff] %v5842_v5  ;;  %4474 = vmatprep.subr.bf16.mxu1 %v5834_v11 }
 0x165   :  { %1411 = vmatprep.mubr.f32.mxu0 %v7720_v39  ;;  %4440 = vmatpush1.bf16.msra.mxu0 %v7762_v12  ;;  %v7850_v12 = vld [vmem:[#allocation30_spill] sm:$0xff] }
 0x166   :  { %4442 = vmatprep.subr.bf16.mxu0 %v7763_v36  ;;  %v7851_v36 = vld [vmem:[#allocation31_spill] sm:$0xff] }
 0x167   :  { %4476 = vmatpush3.bf16.msra.mxu1 %v5842_v5 }
 0x168   :  { %1413 = vmatmul.mubr.f32.gmra.mrb[6].mxu0 %v5272_v34 }
 0x169   :  { %1418 = vmatprep.mubr.f32.mxu0 %v7720_v39  ;;  %4444 = vmatpush1.bf16.msra.mxu0 %v7765_v53  ;;  %v7852_v53 = vld [vmem:[#allocation42_spill] sm:$0xff] }
 0x16a   :  { %4446 = vmatprep.subr.bf16.mxu0 %v7766_v60  ;;  %v7853_v60 = vld [vmem:[#allocation33_spill] sm:$0xff] }
 0x16c   :  { %1420 = vmatmul.mubr.f32.gmra.mrb[8].mxu0 %v7751_v62 }
 0x16d   :  { %1425 = vmatprep.mubr.f32.mxu0 %v7720_v39  ;;  %4448 = vmatpush1.bf16.msra.mxu0 %v7768_v58  ;;  %v7856_v58 = vld [vmem:[#allocation38_spill] sm:$0xff] }
 0x16e   :  { %4450 = vmatprep.subr.bf16.mxu0 %v7769_v44  ;;  %v7857_v44 = vld [vmem:[#allocation49_spill] sm:$0xff] }
 0x170   :  { %1427 = vmatmul.mubr.f32.gmra.mrb[10].mxu0 %v5310_v45 }
 0x171   :  { %1432 = vmatprep.mubr.f32.mxu0 %v7720_v39  ;;  %4452 = vmatpush1.bf16.msra.mxu0 %v7850_v12  ;;  %v1757_v12 = vld [vmem:[#allocation7 + $0x68] sm:$0xff] }
 0x172   :  { %4454 = vmatprep.subr.bf16.mxu0 %v7851_v36  ;;  %v1819_v36 = vand.u32 4294901760, %v1756_v23 }
 0x174   :  { %1434 = vmatmul.mubr.f32.gmra.mrb[12].mxu0 %v7852_v53 }
 0x175   :  { %1439 = vmatprep.mubr.f32.mxu0 %v7720_v39  ;;  %4456 = vmatpush1.bf16.msra.mxu0 %v7853_v60  ;;  %v5924_v60 = vpack.c.bf16 %v1870_v26, %v1867_v18 }
 0x176   :  { %4458 = vmatprep.subr.bf16.mxu0 %v7854_v43 }
 0x177   :  { %7869 = vst [vmem:[#allocation41_spill] sm:$0xff] %v5924_v60 }
 0x178   :  { %1441 = vmatmul.mubr.f32.gmra.mrb[14].mxu0 %v7855_v22 }
 0x179   :  { %1446 = vmatprep.mubr.f32.mxu0 %v7720_v39  ;;  %4460 = vmatpush1.bf16.msra.mxu0 %v7856_v58 }
 0x17c   :  { %1448 = vmatmul.mubr.f32.gmra.mrb[16].mxu0 %v7857_v44 }
 0x17d   :  { %1453 = vmatprep.mubr.f32.mxu0 %v7720_v39 }
 0x180   :  { %1455 = vmatmul.mubr.f32.gmra.mrb[18].mxu0 %v7858_v38 }
 0x181   :  { %1460 = vmatprep.mubr.f32.mxu0 %v7720_v39 }
 0x184   :  { %1462 = vmatmul.mubr.f32.gmra.mrb[20].mxu0 %v7859_v9 }
 0x185   :  { %1467 = vmatprep.mubr.f32.mxu0 %v7720_v39 }
 0x188   :  { %1469 = vmatmul.mubr.f32.gmra.mrb[22].mxu0 %v7860_v10 }
 0x189   :  { %1474 = vmatprep.mubr.f32.mxu0 %v7720_v39 }
 0x18c   :  { %1476 = vmatmul.mubr.f32.gmra.mrb[24].mxu0 %v7861_v42 }
 0x18d   :  { %1481 = vmatprep.mubr.f32.mxu0 %v7720_v39 }
 0x190   :  { %1483 = vmatmul.mubr.f32.gmra.mrb[26].mxu0 %v7862_v16 }
 0x191   :  { %1488 = vmatprep.mubr.f32.mxu0 %v7720_v39 }
 0x194   :  { %1490 = vmatmul.mubr.f32.gmra.mrb[28].mxu0 %v7863_v50 }
 0x195   :  { %1495 = vmatprep.mubr.f32.mxu0 %v7720_v39 }
 0x198   :  { %1497 = vmatmul.mubr.f32.gmra.mrb[30].mxu0 %v7864_v51 }
 0x199   :  { %1599 = vmatprep.mubr.f32.mxu0 %v7720_v39 }
 0x19c   :  { %1601 = vmatmul.mubr.f32.vlgmr.msra.gmra.mrb[0].mxu0 %v5166_v32 }
 0x19d   :  { %1606 = vmatprep.mubr.f32.mxu0 %v7720_v39 }
 0x1a0   :  { %1608 = vmatmul.mubr.f32.gmra.mrb[2].mxu0 %v5208_v15 }
 0x1a1   :  { %1613 = vmatprep.mubr.f32.mxu0 %v7720_v39 }
 0x1a4   :  { %1615 = vmatmul.mubr.f32.gmra.mrb[4].mxu0 %v5217_v14  ;;  %v1769_v14 = vld [vmem:[#allocation7 + $0xc8] sm:$0xff] }
 0x1a5   :  { %1620 = vmatprep.mubr.f32.mxu0 %v7720_v39  ;;  %v1858_v32 = vand.u32 4294901760, %v1769_v14 }
 0x1a8   :  { %1622 = vmatmul.mubr.f32.gmra.mrb[6].mxu0 %v5272_v34  ;;  %v1768_v34 = vld [vmem:[#allocation7 + $0xc0] sm:$0xff] }
 0x1a9   :  { %1627 = vmatprep.mubr.f32.mxu0 %v7720_v39  ;;  %v1855_v15 = vand.u32 4294901760, %v1768_v34 }
 0x1ab   :  { %v5912_v25 = vpack.c.bf16 %v1858_v32, %v1855_v15  ;;  %v5926_v43 = vsub.f32 %v1768_v34, %v1855_v15 }
 0x1ac   :  { %1629 = vmatmul.mubr.f32.gmra.mrb[8].mxu0 %v7751_v62  ;;  %v1753_v62 = vld [vmem:[#allocation7 + $0x48] sm:$0xff] }
 0x1ad   :  { %1634 = vmatprep.mubr.f32.mxu0 %v7720_v39  ;;  %v1810_v24 = vand.u32 4294901760, %v1753_v62  ;;  %7865 = vst [vmem:[#allocation18_spill] sm:$0xff] %v5912_v25  ;;  %4478 = vmatprep.subr.bf16.mxu1 %v5912_v25 }
 0x1b0   :  { %1636 = vmatmul.mubr.f32.gmra.mrb[10].mxu0 %v5310_v45  ;;  %v1752_v45 = vld [vmem:[#allocation7 + $0x40] sm:$0xff] }
 0x1b1   :  { %1641 = vmatprep.mubr.f32.mxu0 %v7720_v39  ;;  %v1807_v17 = vand.u32 4294901760, %v1752_v45 }
 0x1b3   :  { %v5914_v54 = vpack.c.bf16 %v1810_v24, %v1807_v17  ;;  %v5930_v58 = vsub.f32 %v1752_v45, %v1807_v17  ;;  %v5946_v45 = vsub.f32 %v1755_v3, %v1816_v4  ;;  %v5952_v17 = vsub.f32 %v1772_v2, %v1867_v18 }
 0x1b4   :  { %1643 = vmatmul.mubr.f32.gmra.mrb[12].mxu0 %v7852_v53  ;;  %v1822_v53 = vand.u32 4294901760, %v1757_v12  ;;  %v7454_v3 = vand.u32 4294901760, %v5780_v29  ;;  %v7448_v4 = vand.u32 4294901760, %v5784_v46  ;;  %v7445_v2 = vand.u32 4294901760, %v5789_v40 }
 0x1b5   :  { %1648 = vmatprep.mubr.f32.mxu0 %v7720_v39  ;;  %7866 = vst [vmem:[#allocation40_spill] sm:$0xff] %v5914_v54  ;;  %4480 = vmatpush3.bf16.msra.mxu1 %v5914_v54  ;;  %7870 = vst [vmem:[#allocation27_spill] sm:$0xff] %v5930_v58 }
 0x1b6   :  { %7876 = vst [vmem:[#allocation55_spill] sm:$0xff] %v5946_v45  ;;  %7878 = vst [vmem:[#allocation20_spill] sm:$0xff] %v5952_v17 }
 0x1b8   :  { %1650 = vmatmul.mubr.f32.gmra.mrb[14].mxu0 %v7855_v22  ;;  %v5928_v22 = vsub.f32 %v1769_v14, %v1858_v32  ;;  %v5940_v14 = vsub.f32 %v1770_v27, %v1861_v37  ;;  %v5944_v32 = vsub.f32 %v1754_v30, %v1813_v59  ;;  %v5958_v27 = vsub.f32 %v1757_v12, %v1822_v53 }
 0x1b9   :  { %1655 = vmatprep.mubr.f32.mxu0 %v7720_v39  ;;  %v7451_v59 = vand.u32 4294901760, %v5782_v20 }
 0x1ba   :  { %7873 = vst [vmem:[#allocation44_spill] sm:$0xff] %v5940_v14  ;;  %7875 = vst [vmem:[#allocation52_spill] sm:$0xff] %v5944_v32 }
 0x1bb   :  { %7881 = vst [vmem:[#allocation25_spill] sm:$0xff] %v5958_v27  ;;  %v2242_v18 = vsub.f32 %v5782_v20, %v7451_v59  ;;  %v7459_v59 = vand.u32 4294901760, %v5830_v0 }
 0x1bc   :  { %1657 = vmatmul.mubr.f32.gmra.mrb[16].mxu0 %v7857_v44  ;;  %v5932_v44 = vsub.f32 %v1753_v62, %v1810_v24  ;;  %v5954_v24 = vsub.f32 %v1773_v49, %v1870_v26  ;;  %v2235_v49 = vsub.f32 %v5780_v29, %v7454_v3 }
 0x1bd   :  { %1662 = vmatprep.mubr.f32.mxu0 %v7720_v39 }
 0x1be   :  { %7879 = vst [vmem:[#allocation22_spill] sm:$0xff] %v5954_v24  ;;  %v2236_v26 = vand.u32 4294901760, %v2235_v49 }
 0x1c0   :  { %1664 = vmatmul.mubr.f32.gmra.mrb[18].mxu0 %v7858_v38  ;;  %v1774_v38 = vld [vmem:[#allocation7 + $0xf0] sm:$0xff] }
 0x1c1   :  { %1669 = vmatprep.mubr.f32.mxu0 %v7720_v39 }
 0x1c4   :  { %1671 = vmatmul.mubr.f32.gmra.mrb[20].mxu0 %v7859_v9  ;;  %v1775_v9 = vld [vmem:[#allocation7 + $0xf8] sm:$0xff] }
 0x1c5   :  { %1676 = vmatprep.mubr.f32.mxu0 %v7720_v39 }
 0x1c8   :  { %1678 = vmatmul.mubr.f32.gmra.mrb[22].mxu0 %v7860_v10  ;;  %v5935_v10 = vpack.c.bf16 %v1822_v53, %v1819_v36 }
 0x1c9   :  { %1683 = vmatprep.mubr.f32.mxu0 %v7720_v39 }
 0x1ca   :  { %7871 = vst [vmem:[#allocation28_spill] sm:$0xff] %v5935_v10 }
 0x1cc   :  { %1685 = vmatmul.mubr.f32.gmra.mrb[24].mxu0 %v7861_v42  ;;  %v1873_v42 = vand.u32 4294901760, %v1774_v38 }
 0x1cd   :  { %1690 = vmatprep.mubr.f32.mxu0 %v7720_v39 }
 0x1d0   :  { %1692 = vmatmul.mubr.f32.gmra.mrb[26].mxu0 %v7862_v16  ;;  %v1876_v16 = vand.u32 4294901760, %v1775_v9 }
 0x1d1   :  { %1697 = vmatprep.mubr.f32.mxu0 %v7720_v39 }
 0x1d2   :  { %v5938_v34 = vpack.c.bf16 %v1876_v16, %v1873_v42 }
 0x1d4   :  { %1699 = vmatmul.mubr.f32.gmra.mrb[28].mxu0 %v7863_v50  ;;  %v1758_v50 = vld [vmem:[#allocation7 + $0x70] sm:$0xff]  ;;  %7872 = vst [vmem:[#allocation43_spill] sm:$0xff] %v5938_v34 }
 0x1d5   :  { %1704 = vmatprep.mubr.f32.mxu0 %v7720_v39  ;;  %v1864_v39 = vand.u32 4294901760, %v1771_v57 }
 0x1d7   :  { %v5918_v61 = vpack.c.bf16 %v1864_v39, %v1861_v37  ;;  %v5942_v15 = vsub.f32 %v1771_v57, %v1864_v39  ;;  %v5960_v57 = vsub.f32 %v1774_v38, %v1873_v42  ;;  %v5962_v37 = vsub.f32 %v1775_v9, %v1876_v16 }
 0x1d8   :  { %1706 = vmatmul.mubr.f32.gmra.mrb[30].mxu0 %v7864_v51  ;;  %v1759_v51 = vld [vmem:[#allocation7 + $0x78] sm:$0xff]  ;;  %v7443_v9 = vand.u32 4294901760, %v5793_v48  ;;  %v7444_v42 = vand.u32 4294901760, %v5797_v56  ;;  %v7446_v16 = vand.u32 4294901760, %v5804_v19 }
 0x1d9   :  { %7867 = vst [vmem:[#allocation21_spill] sm:$0xff] %v5918_v61  ;;  %4482 = vmatprep.subr.bf16.mxu1 %v5918_v61  ;;  %v1828_v61 = vand.u32 4294901760, %v1759_v51  ;;  %7874 = vst [vmem:[#allocation50_spill] sm:$0xff] %v5942_v15 }
 0x1da   :  { %4484 = vmatpush3.bf16.msra.mxu1 %v5920_v6  ;;  %v1825_v6 = vand.u32 4294901760, %v1758_v50  ;;  %7882 = vst [vmem:[#allocation26_spill] sm:$0xff] %v5960_v57  ;;  %7883 = vst [vmem:[#allocation29_spill] sm:$0xff] %v5962_v37  ;;  %v2256_v49 = vsub.f32 %v5797_v56, %v7444_v42  ;;  %v7450_v42 = vand.u32 4294901760, %v5814_v63 }
 0x1db   :  { %4486 = vmatprep.subr.bf16.mxu1 %v5924_v60  ;;  %v5966_v30 = vsub.f32 %v1759_v51, %v1828_v61  ;;  %v2249_v51 = vsub.f32 %v5793_v48, %v7443_v9  ;;  %v7449_v9 = vand.u32 4294901760, %v5808_v28 }
 0x1dc   :  { %v5949_v62 = vpack.c.bf16 %v1828_v61, %v1825_v6  ;;  %v5964_v39 = vsub.f32 %v1758_v50, %v1825_v6  ;;  %v2123_v61 = vsub.f32 %v5784_v46, %v7448_v4  ;;  %v2130_v6 = vsub.f32 %v5789_v40, %v7445_v2 }
 0x1dd   :  { %7885 = vst [vmem:[#allocation45_spill] sm:$0xff] %v5966_v30  ;;  %v7447_v50 = vand.u32 4294901760, %v5806_v21  ;;  %v7452_v2 = vand.u32 4294901760, %v5818_v52 }
 0x1de   :  { %4488 = vmatpush3.bf16.msra.mxu1 %v5935_v10  ;;  %7877 = vst [vmem:[#allocation19_spill] sm:$0xff] %v5949_v62  ;;  %v5956_v10 = vsub.f32 %v1756_v23, %v1819_v36  ;;  %7884 = vst [vmem:[#allocation37_spill] sm:$0xff] %v5964_v39  ;;  %v2243_v23 = vand.u32 4294901760, %v2242_v18  ;;  %v2124_v12 = vand.u32 4294901760, %v2123_v61  ;;  %v2131_v36 = vand.u32 4294901760, %v2130_v6 }
 0x1df   :  { %4490 = vmatprep.subr.bf16.mxu1 %v5938_v34  ;;  %v2137_v18 = vsub.f32 %v5804_v19, %v7446_v16  ;;  %v2144_v61 = vsub.f32 %v5806_v21, %v7447_v50  ;;  %v2250_v6 = vand.u32 4294901760, %v2249_v51  ;;  %v7453_v16 = vand.u32 4294901760, %v5820_v47 }
 0x1e0   :  { %7880 = vst [vmem:[#allocation24_spill] sm:$0xff] %v5956_v10  ;;  %v4493_v53 = vpack.c.bf16 %v2243_v23, %v2236_v26  ;;  %v5984_v38 = vpack.c.bf16 %v2131_v36, %v2124_v12  ;;  %v2257_v26 = vand.u32 4294901760, %v2256_v49  ;;  %v2263_v50 = vsub.f32 %v5808_v28, %v7449_v9 }
 0x1e1   :  { %v2138_v23 = vand.u32 4294901760, %v2137_v18  ;;  %v2145_v12 = vand.u32 4294901760, %v2144_v61  ;;  %v2270_v51 = vsub.f32 %v5814_v63, %v7450_v42  ;;  %v2151_v49 = vsub.f32 %v5818_v52, %v7452_v2 }
 0x1e2   :  { %4492 = vmatpush3.bf16.msra.mxu1 %v5949_v62  ;;  %v6002_v36 = vpack.c.bf16 %v2257_v26, %v2250_v6  ;;  %v2158_v18 = vsub.f32 %v5820_v47, %v7453_v16  ;;  %v2264_v61 = vand.u32 4294901760, %v2263_v50  ;;  %v7455_v9 = vand.u32 4294901760, %v5822_v33 }
 0x1e3   :  { %4494 = vmatprep.subr.bf16.mxu1 %v4493_v53  ;;  %v6004_v53 = vpack.c.bf16 %v2145_v12, %v2138_v23  ;;  %v2271_v6 = vand.u32 4294901760, %v2270_v51  ;;  %v2152_v26 = vand.u32 4294901760, %v2151_v49  ;;  %v7456_v42 = vand.u32 4294901760, %v5825_v1 }
 0x1e4   :  { %v2159_v23 = vand.u32 4294901760, %v2158_v18  ;;  %v7460_v2 = vand.u32 4294901760, %v5836_v13  ;;  %v2277_v16 = vsub.f32 %v5822_v33, %v7455_v9  ;;  %v2165_v51 = vsub.f32 %v5830_v0, %v7459_v59 }
 0x1e5   :  { %v6022_v12 = vpack.c.bf16 %v2271_v6, %v2264_v61  ;;  %v2284_v50 = vsub.f32 %v5825_v1, %v7456_v42  ;;  %v7461_v9 = vand.u32 4294901760, %v5926_v43  ;;  %v7466_v42 = vand.u32 4294901760, %v5928_v22 }
 0x1e6   :  { %v6024_v4 = vpack.c.bf16 %v2159_v23, %v2152_v26  ;;  %v2172_v49 = vsub.f32 %v5836_v13, %v7460_v2  ;;  %v2278_v18 = vand.u32 4294901760, %v2277_v16  ;;  %v2166_v6 = vand.u32 4294901760, %v2165_v51 }
 0x1e7   :  { %v2285_v61 = vand.u32 4294901760, %v2284_v50  ;;  %v7467_v62 = vand.u32 4294901760, %v5930_v58  ;;  %v7468_v59 = vand.u32 4294901760, %v5932_v44  ;;  %v2291_v2 = vsub.f32 %v5926_v43, %v7461_v9 }
 0x1e8   :  { %v2173_v26 = vand.u32 4294901760, %v2172_v49  ;;  %v2298_v16 = vsub.f32 %v5928_v22, %v7466_v42  ;;  %v7472_v9 = vand.u32 4294901760, %v5942_v15  ;;  %v7475_v42 = vand.u32 4294901760, %v5944_v32 }
 0x1e9   :  { %v6042_v23 = vpack.c.bf16 %v2285_v61, %v2278_v18  ;;  %v2179_v50 = vsub.f32 %v5930_v58, %v7467_v62  ;;  %v2186_v51 = vsub.f32 %v5932_v44, %v7468_v59  ;;  %v2292_v49 = vand.u32 4294901760, %v2291_v2 }
 0x1ea   :  { %v6044_v3 = vpack.c.bf16 %v2173_v26, %v2166_v6  ;;  %v2299_v18 = vand.u32 4294901760, %v2298_v16  ;;  %v7469_v26 = vand.u32 4294901760, %v5940_v14  ;;  %v7476_v62 = vand.u32 4294901760, %v5946_v45 }
 0x1eb   :  { %v2180_v61 = vand.u32 4294901760, %v2179_v50  ;;  %v2187_v6 = vand.u32 4294901760, %v2186_v51  ;;  %v2312_v2 = vsub.f32 %v5942_v15, %v7472_v9  ;;  %v2193_v16 = vsub.f32 %v5944_v32, %v7475_v42 }
 0x1ec   :  { %v6064_v34 = vpack.c.bf16 %v2299_v18, %v2292_v49  ;;  %v2305_v59 = vsub.f32 %v5940_v14, %v7469_v26  ;;  %v2200_v50 = vsub.f32 %v5946_v45, %v7476_v62  ;;  %v7481_v18 = vand.u32 4294901760, %v5952_v17 }
 0x1ed   :  { %v6066_v60 = vpack.c.bf16 %v2187_v6, %v2180_v61  ;;  %v2313_v49 = vand.u32 4294901760, %v2312_v2  ;;  %v7484_v61 = vand.u32 4294901760, %v5954_v24  ;;  %v2194_v6 = vand.u32 4294901760, %v2193_v16 }
 0x1ee   :  { %v2306_v51 = vand.u32 4294901760, %v2305_v59  ;;  %v2201_v26 = vand.u32 4294901760, %v2200_v50  ;;  %v7482_v54 = vand.u32 4294901760, %v5956_v10  ;;  %v7483_v9 = vand.u32 4294901760, %v5958_v27 }
 0x1ef   :  { %v2319_v42 = vsub.f32 %v5952_v17, %v7481_v18  ;;  %v2326_v59 = vsub.f32 %v5954_v24, %v7484_v61 }
 0x1f0   :  { %v6086_v25 = vpack.c.bf16 %v2313_v49, %v2306_v51  ;;  %v6094_v2 = vpack.c.bf16 %v2201_v26, %v2194_v6  ;;  %v2207_v16 = vsub.f32 %v5956_v10, %v7482_v54  ;;  %v2214_v50 = vsub.f32 %v5958_v27, %v7483_v9 }
 0x1f1   :  { %v2320_v51 = vand.u32 4294901760, %v2319_v42  ;;  %v2327_v49 = vand.u32 4294901760, %v2326_v59  ;;  %v75_v59 = vld [vmem:[%s7303_s3] sm:$0x3] }
 0x1f2   :  { %v2208_v62 = vand.u32 4294901760, %v2207_v16  ;;  %v2215_v5 = vand.u32 4294901760, %v2214_v50  ;;  %v112_v16 = vlaneseq }
 0x1f3   :  { %v6102_v11 = vpack.c.bf16 %v2327_v49, %v2320_v51 }
 0x1f4   :  { %v6104_v18 = vpack.c.bf16 %v2215_v5, %v2208_v62  ;;  %v113_v49 = vshrl.u32 %v112_v16, 7 }
 0x1f6   :  { %v114_v61 = vsub.s32 0, %v113_v49  ;;  %v118_v5 = vsub.s32 1, %v113_v49 }
 0x1f8   :  { %v6133_v9 = vrot.slane %v75_v59, %v114_v61  ;;  %v6135_v54 = vrot.slane %v75_v59, %v118_v5 }
 0x26f   :  { %v1602_v50 = vpop.f32.mrb[0].mxu0 }
 0x270   :  { %v4653_v51 = vadd.f32 %v1602_v50, %v6133_v9  ;;  %v1604_v16 = vpop.f32.mrb[1].mxu0 }
 0x271   :  { %v4654_v42 = vadd.f32 %v1604_v16, %v6135_v54 }
 0x272   :  { %v1712_v49 = vmax.f32 %v4653_v51, 0.0 }
 0x273   :  { %v1713_v7 = vmax.f32 %v4654_v42, 0.0  ;;  %v1609_v41 = vpop.f32.mrb[2].mxu0 }
 0x274   :  { %v6143_v62 = vand.u32 4294901760, %v1712_v49  ;;  %v4655_v61 = vadd.f32 %v1609_v41, %v6133_v9  ;;  %v1611_v59 = vpop.f32.mrb[3].mxu0 }
 0x275   :  { %v6146_v5 = vand.u32 4294901760, %v1713_v7  ;;  %v4656_v50 = vadd.f32 %v1611_v59, %v6135_v54 }
 0x276   :  { %7886 = vst [vmem:[#allocation47_spill] sm:$0xff] %v6143_v62  ;;  %v6150_v8 = vsub.f32 %v1712_v49, %v6143_v62  ;;  %v1714_v6 = vmax.f32 %v4655_v61, 0.0 }
 0x277   :  { %7887 = vst [vmem:[#allocation48_spill] sm:$0xff] %v6146_v5  ;;  %v6153_v16 = vsub.f32 %v1713_v7, %v6146_v5  ;;  %v1715_v26 = vmax.f32 %v4656_v50, 0.0  ;;  %v1616_v51 = vpop.f32.mrb[4].mxu0 }
 0x278   :  { %7888 = vst [vmem:[#allocation53_spill] sm:$0xff] %v6150_v8  ;;  %v6155_v42 = vand.u32 4294901760, %v1714_v6  ;;  %v4657_v35 = vadd.f32 %v1616_v51, %v6133_v9  ;;  %v1618_v55 = vpop.f32.mrb[5].mxu0  ;;  %v7509_v41 = vand.u32 4294901760, %v6150_v8 }
 0x279   :  { %7889 = vst [vmem:[#allocation30_spill] sm:$0xff] %v6153_v16  ;;  %v6159_v31 = vand.u32 4294901760, %v1715_v26  ;;  %v4658_v59 = vadd.f32 %v1618_v55, %v6135_v54  ;;  %v7512_v49 = vand.u32 4294901760, %v6153_v16 }
 0x27a   :  { %7890 = vst [vmem:[#allocation31_spill] sm:$0xff] %v6155_v42  ;;  %v6164_v61 = vsub.f32 %v1714_v6, %v6155_v42  ;;  %v1716_v7 = vmax.f32 %v4657_v35, 0.0  ;;  %v1887_v50 = vsub.f32 %v6150_v8, %v7509_v41 }
 0x27b   :  { %7891 = vst [vmem:[#allocation42_spill] sm:$0xff] %v6159_v31  ;;  %v6170_v10 = vsub.f32 %v1715_v26, %v6159_v31  ;;  %v1717_v51 = vmax.f32 %v4658_v59, 0.0  ;;  %v1623_v27 = vpop.f32.mrb[6].mxu0  ;;  %v1881_v17 = vsub.f32 %v6153_v16, %v7512_v49 }
 0x27c   :  { %7892 = vst [vmem:[#allocation33_spill] sm:$0xff] %v6164_v61  ;;  %v6175_v55 = vand.u32 4294901760, %v1716_v7  ;;  %v4659_v24 = vadd.f32 %v1623_v27, %v6133_v9  ;;  %v1625_v6 = vpop.f32.mrb[7].mxu0  ;;  %v7519_v35 = vand.u32 4294901760, %v6164_v61  ;;  %v1888_v16 = vand.u32 4294901760, %v1887_v50 }
 0x27d   :  { %7893 = vst [vmem:[#allocation35_spill] sm:$0xff] %v6170_v10  ;;  %v6180_v45 = vand.u32 4294901760, %v1717_v51  ;;  %v4660_v26 = vadd.f32 %v1625_v6, %v6135_v54  ;;  %v1882_v41 = vand.u32 4294901760, %v1881_v17  ;;  %v7522_v59 = vand.u32 4294901760, %v6170_v10 }
 0x27e   :  { %7894 = vst [vmem:[#allocation46_spill] sm:$0xff] %v6175_v55  ;;  %v6185_v8 = vsub.f32 %v1716_v7, %v6175_v55  ;;  %v1718_v49 = vmax.f32 %v4659_v24, 0.0  ;;  %v1902_v27 = vsub.f32 %v6164_v61, %v7519_v35 }
 0x27f   :  { %7895 = vst [vmem:[#allocation38_spill] sm:$0xff] %v6180_v45  ;;  %v6191_v14 = vsub.f32 %v1717_v51, %v6180_v45  ;;  %v1719_v32 = vmax.f32 %v4660_v26, 0.0  ;;  %v1630_v15 = vpop.f32.mrb[8].mxu0  ;;  %1883 = vmatprep.mubr.f32.mxu1 %v1882_v41  ;;  %v1896_v17 = vsub.f32 %v6170_v10, %v7522_v59 }
 0x280   :  { %7896 = vst [vmem:[#allocation49_spill] sm:$0xff] %v6185_v8  ;;  %v6197_v7 = vand.u32 4294901760, %v1718_v49  ;;  %v4661_v24 = vadd.f32 %v1630_v15, %v6133_v9  ;;  %v1632_v50 = vpop.f32.mrb[9].mxu0  ;;  %1889 = vmatmul.mubr.f32.vlgmr.msra.gmra.mrb[0].mxu1 %v1888_v16  ;;  %v7527_v35 = vand.u32 4294901760, %v6185_v8  ;;  %v1903_v15 = vand.u32 4294901760, %v1902_v27 }
 0x281   :  { %7897 = vst [vmem:[#allocation51_spill] sm:$0xff] %v6191_v14  ;;  %v6202_v61 = vand.u32 4294901760, %v1719_v32  ;;  %v4662_v41 = vadd.f32 %v1632_v50, %v6135_v54  ;;  %4496 = vmatpush3.bf16.msra.mxu1 %v5984_v38  ;;  %v1897_v26 = vand.u32 4294901760, %v1896_v17  ;;  %v7528_v59 = vand.u32 4294901760, %v6191_v14 }
 0x282   :  { %7898 = vst [vmem:[#allocation54_spill] sm:$0xff] %v6197_v7  ;;  %v6208_v6 = vsub.f32 %v1718_v49, %v6197_v7  ;;  %v1720_v10 = vmax.f32 %v4661_v24, 0.0  ;;  %v1917_v16 = vsub.f32 %v6185_v8, %v7527_v35  ;;  %4498 = vmatprep.subr.bf16.mxu1 %v6002_v36 }
 0x283   :  { %7899 = vst [vmem:[#allocation56_spill] sm:$0xff] %v6202_v61  ;;  %v6215_v51 = vsub.f32 %v1719_v32, %v6202_v61  ;;  %v1721_v50 = vmax.f32 %v4662_v41, 0.0  ;;  %v1637_v58 = vpop.f32.mrb[10].mxu0  ;;  %1898 = vmatprep.mubr.f32.mxu1 %v1897_v26  ;;  %v1911_v38 = vsub.f32 %v6191_v14, %v7528_v59  ;;  %v7903_v32 = vand.u32 4294901760, %v5960_v57 }
 0x284   :  { %7900 = vst [vmem:[#allocation57_spill] sm:$0xff] %v6208_v6  ;;  %v6221_v17 = vand.u32 4294901760, %v1720_v10  ;;  %v4663_v27 = vadd.f32 %v1637_v58, %v6133_v9  ;;  %v1639_v24 = vpop.f32.mrb[11].mxu0  ;;  %1904 = vmatmul.mubr.f32.gmra.mrb[2].mxu1 %v1903_v15  ;;  %v7533_v36 = vand.u32 4294901760, %v6208_v6  ;;  %v1918_v8 = vand.u32 4294901760, %v1917_v16 }
 0x285   :  { %7901 = vst [vmem:[#allocation58_spill] sm:$0xff] %v6215_v51  ;;  %v6228_v41 = vsub.f32 %v5960_v57, %v7903_v32  ;;  %v6230_v26 = vand.u32 4294901760, %v1721_v50  ;;  %v4664_v35 = vadd.f32 %v1639_v24, %v6135_v54  ;;  %v1912_v59 = vand.u32 4294901760, %v1911_v38  ;;  %4500 = vmatpush3.bf16.msra.mxu1 %v6004_v53 }
 0x286   :  { %7902 = vst [vmem:[#allocation59_spill] sm:$0xff] %v6221_v17  ;;  %v7536_v49 = vand.u32 4294901760, %v6215_v51  ;;  %v6236_v58 = vsub.f32 %v1720_v10, %v6221_v17  ;;  %v1722_v15 = vmax.f32 %v4663_v27, 0.0  ;;  %v1932_v14 = vsub.f32 %v6208_v6, %v7533_v36  ;;  %4502 = vmatprep.subr.bf16.mxu1 %v6022_v12 }
 0x287   :  { %7904 = vst [vmem:[#allocation60_spill] sm:$0xff] %v6230_v26  ;;  %v6243_v32 = vsub.f32 %v1721_v50, %v6230_v26  ;;  %v1723_v24 = vmax.f32 %v4664_v35, 0.0  ;;  %v1644_v38 = vpop.f32.mrb[12].mxu0  ;;  %1913 = vmatprep.mubr.f32.mxu1 %v1912_v59  ;;  %v7907_v10 = vand.u32 4294901760, %v5962_v37  ;;  %v7909_v35 = vand.u32 4294901760, %v5964_v39 }
 0x288   :  { %7905 = vst [vmem:[#allocation61_spill] sm:$0xff] %v6236_v58  ;;  %v1926_v53 = vsub.f32 %v6215_v51, %v7536_v49  ;;  %v6253_v27 = vand.u32 4294901760, %v1722_v15  ;;  %v4665_v36 = vadd.f32 %v1644_v38, %v6133_v9  ;;  %v1646_v12 = vpop.f32.mrb[13].mxu0  ;;  %1919 = vmatmul.mubr.f32.gmra.mrb[4].mxu1 %v1918_v8  ;;  %v7543_v50 = vand.u32 4294901760, %v6236_v58 }
 0x289   :  { %7906 = vst [vmem:[#allocation62_spill] sm:$0xff] %v6243_v32  ;;  %v6251_v16 = vsub.f32 %v5962_v37, %v7907_v10  ;;  %v6260_v59 = vsub.f32 %v5964_v39, %v7909_v35  ;;  %v6262_v6 = vand.u32 4294901760, %v1723_v24  ;;  %v4666_v49 = vadd.f32 %v1646_v12, %v6135_v54  ;;  %4504 = vmatpush3.bf16.msra.mxu1 %v6024_v4 }
 0x28a   :  { %7908 = vst [vmem:[#allocation63_spill] sm:$0xff] %v6253_v27  ;;  %v1927_v51 = vand.u32 4294901760, %v1926_v53  ;;  %v7546_v10 = vand.u32 4294901760, %v6243_v32  ;;  %v6268_v38 = vsub.f32 %v1722_v15, %v6253_v27  ;;  %v1724_v8 = vmax.f32 %v4665_v36, 0.0  ;;  %4506 = vmatprep.subr.bf16.mxu1 %v6042_v23 }
 0x28b   :  { %7910 = vst [vmem:[#allocation64_spill] sm:$0xff] %v6262_v6  ;;  %v1933_v37 = vand.u32 4294901760, %v1932_v14  ;;  %v1947_v57 = vsub.f32 %v6236_v58, %v7543_v50  ;;  %v6275_v35 = vsub.f32 %v1723_v24, %v6262_v6  ;;  %v1725_v12 = vmax.f32 %v4666_v49, 0.0  ;;  %v1651_v53 = vpop.f32.mrb[14].mxu0 }
 0x28c   :  { %7911 = vst [vmem:[#allocation65_spill] sm:$0xff] %v6268_v38  ;;  %1928 = vmatprep.mubr.f32.mxu1 %v1927_v51  ;;  %v1941_v4 = vsub.f32 %v6243_v32, %v7546_v10  ;;  %v7913_v15 = vand.u32 4294901760, %v5966_v30  ;;  %v6285_v36 = vand.u32 4294901760, %v1724_v8  ;;  %v4667_v50 = vadd.f32 %v1651_v53, %v6133_v9  ;;  %v1653_v23 = vpop.f32.mrb[15].mxu0 }
 0x28d   :  { %7912 = vst [vmem:[#allocation66_spill] sm:$0xff] %v6275_v35  ;;  %1934 = vmatmul.mubr.f32.gmra.mrb[6].mxu1 %v1933_v37  ;;  %v7553_v24 = vand.u32 4294901760, %v6268_v38  ;;  %v2334_v49 = vand.u32 4294901760, %v6228_v41  ;;  %v6290_v51 = vand.u32 4294901760, %v1725_v12  ;;  %v4668_v58 = vadd.f32 %v1653_v23, %v6135_v54 }
 0x28e   :  { %v6283_v14 = vsub.f32 %v5966_v30, %v7913_v15  ;;  %7914 = vst [vmem:[#allocation67_spill] sm:$0xff] %v6285_v36  ;;  %v1942_v10 = vand.u32 4294901760, %v1941_v4  ;;  %v7556_v32 = vand.u32 4294901760, %v6275_v35  ;;  %4508 = vmatpush3.bf16.msra.mxu1 %v6044_v3  ;;  %v6296_v15 = vsub.f32 %v1724_v8, %v6285_v36 }
 0x28f   :  { %7915 = vst [vmem:[#allocation68_spill] sm:$0xff] %v6290_v51  ;;  %v1726_v30 = vmax.f32 %v4667_v50, 0.0  ;;  %v1948_v53 = vand.u32 4294901760, %v1947_v57  ;;  %v1962_v37 = vsub.f32 %v6268_v38, %v7553_v24  ;;  %4510 = vmatprep.subr.bf16.mxu1 %v6064_v34  ;;  %v6303_v41 = vsub.f32 %v1725_v12, %v6290_v51  ;;  %v1658_v4 = vpop.f32.mrb[16].mxu0 }
 0x290   :  { %7916 = vst [vmem:[#allocation69_spill] sm:$0xff] %v6296_v15  ;;  %v1727_v23 = vmax.f32 %v4668_v58, 0.0  ;;  %1943 = vmatprep.mubr.f32.mxu1 %v1942_v10  ;;  %v1956_v3 = vsub.f32 %v6275_v35, %v7556_v32  ;;  %v2341_v8 = vand.u32 4294901760, %v6251_v16  ;;  %v4669_v57 = vadd.f32 %v1658_v4, %v6133_v9  ;;  %v1660_v39 = vpop.f32.mrb[17].mxu0 }
 0x291   :  { %7917 = vst [vmem:[#allocation70_spill] sm:$0xff] %v6303_v41  ;;  %v6309_v50 = vand.u32 4294901760, %v1726_v30  ;;  %1949 = vmatmul.mubr.f32.gmra.mrb[8].mxu1 %v1948_v53  ;;  %v7559_v34 = vand.u32 4294901760, %v6296_v15  ;;  %v2222_v12 = vand.u32 4294901760, %v6260_v59  ;;  %v4670_v58 = vadd.f32 %v1660_v39, %v6135_v54 }
 0x292   :  { %v6314_v24 = vand.u32 4294901760, %v1727_v23  ;;  %v1957_v10 = vand.u32 4294901760, %v1956_v3  ;;  %v7562_v38 = vand.u32 4294901760, %v6303_v41  ;;  %4512 = vmatpush3.bf16.msra.mxu1 %v6066_v60  ;;  %v1728_v32 = vmax.f32 %v4669_v57, 0.0 }
 0x293   :  { %7918 = vst [vmem:[#allocation71_spill] sm:$0xff] %v6309_v50  ;;  %v6320_v16 = vsub.f32 %v1726_v30, %v6309_v50  ;;  %v1963_v4 = vand.u32 4294901760, %v1962_v37  ;;  %v1977_v53 = vsub.f32 %v6296_v15, %v7559_v34  ;;  %4514 = vmatprep.subr.bf16.mxu1 %v6086_v25  ;;  %v1729_v39 = vmax.f32 %v4670_v58, 0.0  ;;  %v1665_v3 = vpop.f32.mrb[18].mxu0 }
 0x294   :  { %7919 = vst [vmem:[#allocation72_spill] sm:$0xff] %v6314_v24  ;;  %v6327_v59 = vsub.f32 %v1727_v23, %v6314_v24  ;;  %1958 = vmatprep.mubr.f32.mxu1 %v1957_v10  ;;  %v1971_v60 = vsub.f32 %v6303_v41, %v7562_v38  ;;  %v2229_v30 = vand.u32 4294901760, %v6283_v14  ;;  %v6333_v57 = vand.u32 4294901760, %v1728_v32  ;;  %v1667_v35 = vpop.f32.mrb[19].mxu0 }
 0x295   :  { %7920 = vst [vmem:[#allocation73_spill] sm:$0xff] %v6320_v16  ;;  %v4671_v37 = vadd.f32 %v1665_v3, %v6133_v9  ;;  %1964 = vmatmul.mubr.f32.gmra.mrb[10].mxu1 %v1963_v4  ;;  %v7565_v25 = vand.u32 4294901760, %v6320_v16  ;;  %v4521_v34 = vpack.c.bf16 %v2341_v8, %v2334_v49  ;;  %v6337_v23 = vand.u32 4294901760, %v1729_v39 }
 0x296   :  { %7921 = vst [vmem:[#allocation74_spill] sm:$0xff] %v6327_v59  ;;  %7922 = vst [vmem:[#allocation75_spill] sm:$0xff] %v6333_v57  ;;  %v4672_v58 = vadd.f32 %v1667_v35, %v6135_v54  ;;  %v1972_v10 = vand.u32 4294901760, %v1971_v60  ;;  %v7566_v15 = vand.u32 4294901760, %v6327_v59  ;;  %4516 = vmatpush3.bf16.msra.mxu1 %v6094_v2  ;;  %v6343_v14 = vsub.f32 %v1728_v32, %v6333_v57 }
 0x297   :  { %7923 = vst [vmem:[#allocation76_spill] sm:$0xff] %v6337_v23  ;;  %v1730_v38 = vmax.f32 %v4671_v37, 0.0  ;;  %v1978_v41 = vand.u32 4294901760, %v1977_v53  ;;  %v1992_v4 = vsub.f32 %v6320_v16, %v7565_v25  ;;  %4518 = vmatprep.subr.bf16.mxu1 %v6102_v11  ;;  %v6350_v49 = vsub.f32 %v1729_v39, %v6337_v23  ;;  %v1672_v8 = vpop.f32.mrb[20].mxu0 }
 0x298   :  { %7924 = vst [vmem:[#allocation77_spill] sm:$0xff] %v6343_v14  ;;  %v1731_v35 = vmax.f32 %v4672_v58, 0.0  ;;  %1973 = vmatprep.mubr.f32.mxu1 %v1972_v10  ;;  %v1986_v2 = vsub.f32 %v6327_v59, %v7566_v15  ;;  %v4673_v53 = vadd.f32 %v1672_v8, %v6133_v9  ;;  %v1674_v3 = vpop.f32.mrb[21].mxu0  ;;  %v7569_v60 = vand.u32 4294901760, %v6343_v14 }
 0x299   :  { %7925 = vst [vmem:[#allocation78_spill] sm:$0xff] %v6350_v49  ;;  %v6355_v32 = vand.u32 4294901760, %v1730_v38  ;;  %1979 = vmatmul.mubr.f32.gmra.mrb[12].mxu1 %v1978_v41  ;;  %v4523_v37 = vpack.c.bf16 %v2229_v30, %v2222_v12  ;;  %v4674_v39 = vadd.f32 %v1674_v3, %v6135_v54  ;;  %v7570_v10 = vand.u32 4294901760, %v6350_v49 }
 0x29a   :  { %v6359_v11 = vand.u32 4294901760, %v1731_v35  ;;  %v1987_v58 = vand.u32 4294901760, %v1986_v2  ;;  %4520 = vmatpush3.bf16.msra.mxu1 %v6104_v18  ;;  %v1732_v15 = vmax.f32 %v4673_v53, 0.0  ;;  %v1993_v16 = vand.u32 4294901760, %v1992_v4 }
 0x29b   :  { %7926 = vst [vmem:[#allocation79_spill] sm:$0xff] %v6355_v32  ;;  %v6365_v25 = vsub.f32 %v1730_v38, %v6355_v32  ;;  %v2007_v41 = vsub.f32 %v6343_v14, %v7569_v60  ;;  %4522 = vmatprep.subr.bf16.mxu1 %v4521_v34  ;;  %v1733_v30 = vmax.f32 %v4674_v39, 0.0  ;;  %v1679_v8 = vpop.f32.mrb[22].mxu0  ;;  %v2001_v18 = vsub.f32 %v6350_v49, %v7570_v10 }
 0x29c   :  { %7927 = vst [vmem:[#allocation80_spill] sm:$0xff] %v6359_v11  ;;  %v6371_v12 = vsub.f32 %v1731_v35, %v6359_v11  ;;  %1988 = vmatprep.mubr.f32.mxu1 %v1987_v58  ;;  %v6376_v2 = vand.u32 4294901760, %v1732_v15  ;;  %v4675_v38 = vadd.f32 %v1679_v8, %v6133_v9  ;;  %v1681_v4 = vpop.f32.mrb[23].mxu0 }
 0x29d   :  { %7928 = vst [vmem:[#allocation81_spill] sm:$0xff] %v6365_v25  ;;  %1994 = vmatmul.mubr.f32.gmra.mrb[14].mxu1 %v1993_v16  ;;  %v7573_v53 = vand.u32 4294901760, %v6365_v25  ;;  %v6380_v3 = vand.u32 4294901760, %v1733_v30  ;;  %v4676_v34 = vadd.f32 %v1681_v4, %v6135_v54  ;;  %v2002_v35 = vand.u32 4294901760, %v2001_v18 }
 0x29e   :  { %7929 = vst [vmem:[#allocation82_spill] sm:$0xff] %v6371_v12  ;;  %7930 = vst [vmem:[#allocation83_spill] sm:$0xff] %v6376_v2  ;;  %v7578_v39 = vand.u32 4294901760, %v6371_v12  ;;  %4524 = vmatpush3.bf16.msra.mxu1 %v4523_v37  ;;  %v6385_v58 = vsub.f32 %v1732_v15, %v6376_v2  ;;  %v1734_v60 = vmax.f32 %v4675_v38, 0.0  ;;  %v2008_v10 = vand.u32 4294901760, %v2007_v41 }
 0x29f   :  { %7931 = vst [vmem:[#allocation84_spill] sm:$0xff] %v6380_v3  ;;  %v2022_v8 = vsub.f32 %v6365_v25, %v7573_v53  ;;  %v7933_v16 = vpack.c.bf16 %v5782_v20, %v5780_v29  ;;  %v6394_v14 = vsub.f32 %v1733_v30, %v6380_v3  ;;  %v1735_v18 = vmax.f32 %v4676_v34, 0.0  ;;  %v1686_v4 = vpop.f32.mrb[24].mxu0  ;;  %2003 = vmatprep.mubr.f32.mxu1 %v2002_v35 }
 0x2a0   :  { %7932 = vst [vmem:[#allocation85_spill] sm:$0xff] %v6385_v58  ;;  %v2016_v15 = vsub.f32 %v6371_v12, %v7578_v39  ;;  %v6399_v37 = vand.u32 4294901760, %v1734_v60  ;;  %v4677_v41 = vadd.f32 %v1686_v4, %v6133_v9  ;;  %v1688_v38 = vpop.f32.mrb[25].mxu0  ;;  %v7583_v53 = vand.u32 4294901760, %v6385_v58 }
 0x2a1   :  { %4526 = vmatprep.subr.bf16.mxu1 %v7933_v16  ;;  %7934 = vst [vmem:[#allocation86_spill] sm:$0xff] %v6394_v14  ;;  %2009 = vmatmul.mubr.f32.gmra.mrb[16].mxu1 %v2008_v10  ;;  %v6403_v25 = vand.u32 4294901760, %v1735_v18  ;;  %v4678_v30 = vadd.f32 %v1688_v38, %v6135_v54  ;;  %v7586_v34 = vand.u32 4294901760, %v6394_v14  ;;  %v2023_v39 = vand.u32 4294901760, %v2022_v8 }
 0x2a2   :  { %7935 = vst [vmem:[#allocation87_spill] sm:$0xff] %v6399_v37  ;;  %v2017_v16 = vand.u32 4294901760, %v2016_v15  ;;  %v6408_v35 = vsub.f32 %v1734_v60, %v6399_v37  ;;  %v1736_v49 = vmax.f32 %v4677_v41, 0.0  ;;  %v2037_v4 = vsub.f32 %v6385_v58, %v7583_v53 }
 0x2a3   :  { %7936 = vst [vmem:[#allocation88_spill] sm:$0xff] %v6403_v25  ;;  %v6414_v10 = vsub.f32 %v1735_v18, %v6403_v25  ;;  %v1737_v12 = vmax.f32 %v4678_v30, 0.0  ;;  %v1693_v20 = vpop.f32.mrb[26].mxu0  ;;  %v2031_v15 = vsub.f32 %v6394_v14, %v7586_v34 }
 0x2a4   :  { %7937 = vst [vmem:[#allocation89_spill] sm:$0xff] %v6408_v35  ;;  %2018 = vmatprep.mubr.f32.mxu1 %v2017_v16  ;;  %v6419_v38 = vand.u32 4294901760, %v1736_v49  ;;  %v4679_v60 = vadd.f32 %v1693_v20, %v6133_v9  ;;  %v1695_v41 = vpop.f32.mrb[27].mxu0  ;;  %v7593_v8 = vand.u32 4294901760, %v6408_v35  ;;  %v2038_v34 = vand.u32 4294901760, %v2037_v4 }
 0x2a5   :  { %7938 = vst [vmem:[#allocation90_spill] sm:$0xff] %v6414_v10  ;;  %2024 = vmatmul.mubr.f32.gmra.mrb[18].mxu1 %v2023_v39  ;;  %v6423_v29 = vand.u32 4294901760, %v1737_v12  ;;  %v4680_v18 = vadd.f32 %v1695_v41, %v6135_v54  ;;  %v2032_v53 = vand.u32 4294901760, %v2031_v15  ;;  %v7596_v30 = vand.u32 4294901760, %v6414_v10 }
 0x2a6   :  { %7939 = vst [vmem:[#allocation91_spill] sm:$0xff] %v6419_v38  ;;  %v6428_v16 = vsub.f32 %v1736_v49, %v6419_v38  ;;  %v1738_v58 = vmax.f32 %v4679_v60, 0.0  ;;  %v2052_v20 = vsub.f32 %v6408_v35, %v7593_v8 }
 0x2a7   :  { %7940 = vst [vmem:[#allocation92_spill] sm:$0xff] %v6423_v29  ;;  %v6434_v39 = vsub.f32 %v1737_v12, %v6423_v29  ;;  %v1739_v14 = vmax.f32 %v4680_v18, 0.0  ;;  %v1700_v59 = vpop.f32.mrb[28].mxu0  ;;  %2033 = vmatprep.mubr.f32.mxu1 %v2032_v53  ;;  %v2046_v15 = vsub.f32 %v6414_v10, %v7596_v30 }
 0x2a8   :  { %7941 = vst [vmem:[#allocation93_spill] sm:$0xff] %v6428_v16  ;;  %v6439_v41 = vand.u32 4294901760, %v1738_v58  ;;  %v4681_v49 = vadd.f32 %v1700_v59, %v6133_v9  ;;  %v1702_v60 = vpop.f32.mrb[29].mxu0  ;;  %v7603_v4 = vand.u32 4294901760, %v6428_v16  ;;  %v2053_v30 = vand.u32 4294901760, %v2052_v20 }
 0x2a9   :  { %7942 = vst [vmem:[#allocation94_spill] sm:$0xff] %v6434_v39  ;;  %2039 = vmatmul.mubr.f32.gmra.mrb[20].mxu1 %v2038_v34  ;;  %v6443_v38 = vand.u32 4294901760, %v1739_v14  ;;  %v4682_v12 = vadd.f32 %v1702_v60, %v6135_v54  ;;  %v2047_v8 = vand.u32 4294901760, %v2046_v15  ;;  %v7606_v18 = vand.u32 4294901760, %v6434_v39 }
 0x2aa   :  { %7943 = vst [vmem:[#allocation95_spill] sm:$0xff] %v6439_v41  ;;  %v6448_v53 = vsub.f32 %v1738_v58, %v6439_v41  ;;  %v1740_v35 = vmax.f32 %v4681_v49, 0.0  ;;  %v2067_v59 = vsub.f32 %v6428_v16, %v7603_v4 }
 0x2ab   :  { %7944 = vst [vmem:[#allocation96_spill] sm:$0xff] %v6443_v38  ;;  %v6454_v34 = vsub.f32 %v1739_v14, %v6443_v38  ;;  %v1741_v10 = vmax.f32 %v4682_v12, 0.0  ;;  %v1707_v29 = vpop.f32.mrb[30].mxu0  ;;  %2048 = vmatprep.mubr.f32.mxu1 %v2047_v8  ;;  %v2061_v15 = vsub.f32 %v6434_v39, %v7606_v18 }
 0x2ac   :  { %7945 = vst [vmem:[#allocation97_spill] sm:$0xff] %v6448_v53  ;;  %v6459_v60 = vand.u32 4294901760, %v1740_v35  ;;  %v4683_v58 = vadd.f32 %v1707_v29, %v6133_v9  ;;  %v1709_v49 = vpop.f32.mrb[31].mxu0  ;;  %v7607_v20 = vand.u32 4294901760, %v6448_v53  ;;  %v2068_v18 = vand.u32 4294901760, %v2067_v59 }
 0x2ad   :  { %7946 = vst [vmem:[#allocation98_spill] sm:$0xff] %v6454_v34  ;;  %2054 = vmatmul.mubr.f32.gmra.mrb[22].mxu1 %v2053_v30  ;;  %v6463_v41 = vand.u32 4294901760, %v1741_v10  ;;  %v4684_v14 = vadd.f32 %v1709_v49, %v6135_v54  ;;  %v2062_v4 = vand.u32 4294901760, %v2061_v15  ;;  %v7608_v12 = vand.u32 4294901760, %v6454_v34 }
 0x2ae   :  { %7947 = vst [vmem:[#allocation99_spill] sm:$0xff] %v6459_v60  ;;  %v6468_v8 = vsub.f32 %v1740_v35, %v6459_v60  ;;  %v1742_v16 = vmax.f32 %v4683_v58, 0.0  ;;  %v2082_v29 = vsub.f32 %v6448_v53, %v7607_v20 }
 0x2af   :  { %7948 = vst [vmem:[#allocation100_spill] sm:$0xff] %v6463_v41  ;;  %v6474_v9 = vsub.f32 %v1741_v10, %v6463_v41  ;;  %v1743_v30 = vmax.f32 %v4684_v14, 0.0  ;;  %2063 = vmatprep.mubr.f32.mxu1 %v2062_v4  ;;  %v2076_v54 = vsub.f32 %v6454_v34, %v7608_v12 }
 0x2b0   :  { %v6479_v15 = vand.u32 4294901760, %v1742_v16  ;;  %v7611_v35 = vand.u32 4294901760, %v6468_v8  ;;  %v2083_v10 = vand.u32 4294901760, %v2082_v29 }
 0x2b1   :  { %7949 = vst [vmem:[#allocation101_spill] sm:$0xff] %v6474_v9  ;;  %2069 = vmatmul.mubr.f32.gmra.mrb[24].mxu1 %v2068_v18  ;;  %v6482_v58 = vand.u32 4294901760, %v1743_v30  ;;  %v2077_v59 = vand.u32 4294901760, %v2076_v54  ;;  %v7614_v49 = vand.u32 4294901760, %v6474_v9 }
 0x2b2   :  { %7950 = vst [vmem:[#allocation102_spill] sm:$0xff] %v6479_v15  ;;  %v6486_v20 = vsub.f32 %v1742_v16, %v6479_v15  ;;  %v2097_v4 = vsub.f32 %v6468_v8, %v7611_v35 }
 0x2b3   :  { %7951 = vst [vmem:[#allocation103_spill] sm:$0xff] %v6482_v58  ;;  %v6492_v14 = vsub.f32 %v1743_v30, %v6482_v58  ;;  %2078 = vmatprep.mubr.f32.mxu1 %v2077_v59  ;;  %v2091_v18 = vsub.f32 %v6474_v9, %v7614_v49  ;;  %v7972_v49 = vld [vmem:[#allocation26_spill] sm:$0xff] }
 0x2b4   :  { %v7612_v54 = vand.u32 4294901760, %v6486_v20  ;;  %v2098_v53 = vand.u32 4294901760, %v2097_v4  ;;  %v7957_v4 = vpack.c.bf16 %v5820_v47, %v5818_v52 }
 0x2b5   :  { %7952 = vst [vmem:[#allocation104_spill] sm:$0xff] %v6492_v14  ;;  %2084 = vmatmul.mubr.f32.gmra.mrb[26].mxu1 %v2083_v10  ;;  %v2092_v12 = vand.u32 4294901760, %v2091_v18  ;;  %v7613_v16 = vand.u32 4294901760, %v6492_v14  ;;  %v7953_v10 = vpack.c.bf16 %v5789_v40, %v5784_v46  ;;  %v7958_v18 = vpack.c.bf16 %v5825_v1, %v5822_v33 }
 0x2b6   :  { %v2112_v29 = vsub.f32 %v6486_v20, %v7612_v54  ;;  %v7970_v54 = vld [vmem:[#allocation20_spill] sm:$0xff] }
 0x2b7   :  { %2093 = vmatprep.mubr.f32.mxu1 %v2092_v12  ;;  %v2106_v30 = vsub.f32 %v6492_v14, %v7613_v16  ;;  %v7954_v12 = vpack.c.bf16 %v5797_v56, %v5793_v48 }
 0x2b8   :  { %v2113_v35 = vand.u32 4294901760, %v2112_v29  ;;  %v7959_v29 = vpack.c.bf16 %v5836_v13, %v5830_v0 }
 0x2b9   :  { %2099 = vmatmul.mubr.f32.gmra.mrb[28].mxu1 %v2098_v53  ;;  %v2107_v59 = vand.u32 4294901760, %v2106_v30  ;;  %v7955_v53 = vpack.c.bf16 %v5806_v21, %v5804_v19  ;;  %v7960_v30 = vpack.c.bf16 %v5928_v22, %v5926_v43 }
 0x2bb   :  { %2108 = vmatprep.mubr.f32.mxu1 %v2107_v59  ;;  %v7961_v59 = vld [vmem:[#allocation27_spill] sm:$0xff] }
 0x2bd   :  { %2114 = vmatmul.mubr.f32.gmra.mrb[30].mxu1 %v2113_v35  ;;  %v7956_v35 = vpack.c.bf16 %v5814_v63, %v5808_v28 }
 0x2be   :  { %2344 = vmatprep.mubr.f32.mxu1 %v6146_v5  ;;  %v8020_v5 = vld [vmem:[#allocation82_spill] sm:$0xff] }
 0x2c1   :  { %2346 = vmatmul.mubr.f32.vlgmr.msra.gmra.mrb[32].mxu1 %v6143_v62  ;;  %v8017_v62 = vld [vmem:[#allocation78_spill] sm:$0xff] }
 0x2c2   :  { %2351 = vmatprep.mubr.f32.mxu1 %v6159_v31  ;;  %4528 = vmatpush3.bf16.msra.mxu1 %v7953_v10  ;;  %v7962_v10 = vpack.c.bf16 %v5932_v44, %v7961_v59  ;;  %v8016_v31 = vld [vmem:[#allocation73_spill] sm:$0xff] }
 0x2c3   :  { %4530 = vmatprep.subr.bf16.mxu1 %v7954_v12  ;;  %v7963_v12 = vld [vmem:[#allocation50_spill] sm:$0xff] }
 0x2c5   :  { %2353 = vmatmul.mubr.f32.gmra.mrb[34].mxu1 %v6155_v42  ;;  %v8012_v42 = vld [vmem:[#allocation12_spill] sm:$0xff] }
 0x2c6   :  { %2358 = vmatprep.mubr.f32.mxu1 %v6180_v45  ;;  %4532 = vmatpush3.bf16.msra.mxu1 %v7955_v53  ;;  %v7964_v53 = vld [vmem:[#allocation44_spill] sm:$0xff]  ;;  %v8011_v45 = vld [vmem:[#allocation43_spill] sm:$0xff] }
 0x2c7   :  { %4534 = vmatprep.subr.bf16.mxu1 %v7956_v35  ;;  %v7965_v35 = vpack.c.bf16 %v7963_v12, %v7964_v53 }
 0x2c9   :  { %2360 = vmatmul.mubr.f32.gmra.mrb[36].mxu1 %v6175_v55  ;;  %v8004_v55 = vld [vmem:[#allocation65_spill] sm:$0xff] }
 0x2ca   :  { %2365 = vmatprep.mubr.f32.mxu1 %v6202_v61  ;;  %4536 = vmatpush3.bf16.msra.mxu1 %v7957_v4  ;;  %v7966_v4 = vld [vmem:[#allocation55_spill] sm:$0xff]  ;;  %v8003_v61 = vld [vmem:[#allocation21_spill] sm:$0xff] }
 0x2cb   :  { %4538 = vmatprep.subr.bf16.mxu1 %v7958_v18  ;;  %v7967_v18 = vld [vmem:[#allocation52_spill] sm:$0xff] }
 0x2cd   :  { %2367 = vmatmul.mubr.f32.gmra.mrb[38].mxu1 %v6197_v7 }
 0x2ce   :  { %2372 = vmatprep.mubr.f32.mxu1 %v6230_v26  ;;  %4540 = vmatpush3.bf16.msra.mxu1 %v7959_v29  ;;  %v7968_v29 = vpack.c.bf16 %v7966_v4, %v7967_v18  ;;  %v7978_v26 = vld [vmem:[#allocation45_spill] sm:$0xff] }
 0x2cf   :  { %4542 = vmatprep.subr.bf16.mxu1 %v7960_v30  ;;  %v7969_v30 = vld [vmem:[#allocation22_spill] sm:$0xff] }
 0x2d0   :  { %v7971_v16 = vpack.c.bf16 %v7969_v30, %v7970_v54 }
 0x2d1   :  { %2374 = vmatmul.mubr.f32.gmra.mrb[40].mxu1 %v6221_v17 }
 0x2d2   :  { %2379 = vmatprep.mubr.f32.mxu1 %v6262_v6  ;;  %4544 = vmatpush3.bf16.msra.mxu1 %v7962_v10  ;;  %v7973_v6 = vld [vmem:[#allocation29_spill] sm:$0xff] }
 0x2d3   :  { %4546 = vmatprep.subr.bf16.mxu1 %v7965_v35  ;;  %v4553_v17 = vpack.c.bf16 %v7973_v6, %v7972_v49  ;;  %v7974_v10 = vld [vmem:[#allocation25_spill] sm:$0xff]  ;;  %v7975_v35 = vld [vmem:[#allocation24_spill] sm:$0xff] }
 0x2d5   :  { %2381 = vmatmul.mubr.f32.gmra.mrb[42].mxu1 %v6253_v27  ;;  %v7976_v27 = vpack.c.bf16 %v7974_v10, %v7975_v35 }
 0x2d6   :  { %2386 = vmatprep.mubr.f32.mxu1 %v6290_v51  ;;  %4548 = vmatpush3.bf16.msra.mxu1 %v7968_v29  ;;  %v7977_v51 = vld [vmem:[#allocation37_spill] sm:$0xff]  ;;  %v7983_v29 = vld [vmem:[#allocation30_spill] sm:$0xff] }
 0x2d7   :  { %4550 = vmatprep.subr.bf16.mxu1 %v7971_v16  ;;  %v4555_v7 = vpack.c.bf16 %v7978_v26, %v7977_v51  ;;  %v7979_v16 = vld [vmem:[#allocation39_spill] sm:$0xff] }
 0x2d9   :  { %2388 = vmatmul.mubr.f32.gmra.mrb[44].mxu1 %v6285_v36  ;;  %v8002_v36 = vld [vmem:[#allocation40_spill] sm:$0xff] }
 0x2da   :  { %2393 = vmatprep.mubr.f32.mxu1 %v6314_v24  ;;  %4552 = vmatpush3.bf16.msra.mxu1 %v7976_v27  ;;  %v7981_v27 = vld [vmem:[#allocation91_spill] sm:$0xff]  ;;  %v8001_v24 = vld [vmem:[#allocation66_spill] sm:$0xff] }
 0x2db   :  { %4554 = vmatprep.subr.bf16.mxu1 %v4553_v17  ;;  %v7980_v17 = vld [vmem:[#allocation92_spill] sm:$0xff] }
 0x2dd   :  { %2395 = vmatmul.mubr.f32.gmra.mrb[46].mxu1 %v6309_v50  ;;  %v8000_v50 = vld [vmem:[#allocation61_spill] sm:$0xff] }
 0x2de   :  { %2400 = vmatprep.mubr.f32.mxu1 %v6337_v23  ;;  %4556 = vmatpush3.bf16.msra.mxu1 %v4555_v7  ;;  %v7982_v7 = vld [vmem:[#allocation95_spill] sm:$0xff]  ;;  %v7999_v23 = vld [vmem:[#allocation18_spill] sm:$0xff] }
 0x2df   :  { %4558 = vmatprep.subr.bf16.mxu1 %v7979_v16  ;;  %v8021_v16 = vld [vmem:[#allocation81_spill] sm:$0xff] }
 0x2e1   :  { %2402 = vmatmul.mubr.f32.gmra.mrb[48].mxu1 %v6333_v57  ;;  %v7998_v57 = vld [vmem:[#allocation17_spill] sm:$0xff] }
 0x2e2   :  { %2407 = vmatprep.mubr.f32.mxu1 %v6359_v11  ;;  %v7997_v11 = vld [vmem:[#allocation62_spill] sm:$0xff] }
 0x2e5   :  { %2409 = vmatmul.mubr.f32.gmra.mrb[50].mxu1 %v6355_v32  ;;  %v7996_v32 = vld [vmem:[#allocation57_spill] sm:$0xff] }
 0x2e6   :  { %2414 = vmatprep.mubr.f32.mxu1 %v6380_v3  ;;  %v7995_v3 = vld [vmem:[#allocation36_spill] sm:$0xff] }
 0x2e9   :  { %2416 = vmatmul.mubr.f32.gmra.mrb[52].mxu1 %v6376_v2  ;;  %v7994_v2 = vld [vmem:[#allocation16_spill] sm:$0xff] }
 0x2ea   :  { %2421 = vmatprep.mubr.f32.mxu1 %v6403_v25  ;;  %v7984_v25 = vld [vmem:[#allocation53_spill] sm:$0xff] }
 0x2ed   :  { %2423 = vmatmul.mubr.f32.gmra.mrb[54].mxu1 %v6399_v37  ;;  %v7985_v37 = vld [vmem:[#allocation35_spill] sm:$0xff] }
 0x2ee   :  { %2428 = vmatprep.mubr.f32.mxu1 %v7980_v17  ;;  %v7986_v17 = vld [vmem:[#allocation13_spill] sm:$0xff] }
 0x2f1   :  { %2430 = vmatmul.mubr.f32.gmra.mrb[56].mxu1 %v7981_v27  ;;  %v7987_v27 = vld [vmem:[#allocation14_spill] sm:$0xff] }
 0x2f2   :  { %2435 = vmatprep.mubr.f32.mxu1 %v6443_v38  ;;  %v7988_v38 = vld [vmem:[#allocation33_spill] sm:$0xff] }
 0x2f5   :  { %2437 = vmatmul.mubr.f32.gmra.mrb[58].mxu1 %v7982_v7  ;;  %v7989_v7 = vld [vmem:[#allocation51_spill] sm:$0xff] }
 0x2f6   :  { %2442 = vmatprep.mubr.f32.mxu1 %v6463_v41  ;;  %v7990_v41 = vld [vmem:[#allocation34_spill] sm:$0xff] }
 0x2f9   :  { %2444 = vmatmul.mubr.f32.gmra.mrb[60].mxu1 %v6459_v60  ;;  %v7991_v60 = vld [vmem:[#allocation15_spill] sm:$0xff] }
 0x2fa   :  { %2449 = vmatprep.mubr.f32.mxu1 %v6482_v58  ;;  %v7992_v58 = vld [vmem:[#allocation49_spill] sm:$0xff] }
 0x2fd   :  { %2451 = vmatmul.mubr.f32.gmra.mrb[62].mxu1 %v6479_v15  ;;  %v7993_v15 = vld [vmem:[#allocation58_spill] sm:$0xff] }
 0x2fe   :  { %2586 = vmatprep.mubr.f32.mxu1 %v7983_v29 }
 0x301   :  { %2589 = vmatmul.mubr.f32.vlgmr.msra.gmra.mrb[64].mxu1 %v7984_v25 }
 0x302   :  { %2595 = vmatprep.mubr.f32.mxu1 %v7985_v37  ;;  %4560 = vmatpush3.bf16.msra.mxu1 %v7986_v17 }
 0x303   :  { %4562 = vmatprep.subr.bf16.mxu1 %v7987_v27  ;;  %v8014_v27 = vld [vmem:[#allocation32_spill] sm:$0xff] }
 0x305   :  { %2598 = vmatmul.mubr.f32.gmra.mrb[66].mxu1 %v7988_v38 }
 0x306   :  { %2604 = vmatprep.mubr.f32.mxu1 %v7989_v7  ;;  %4564 = vmatpush3.bf16.msra.mxu1 %v7990_v41  ;;  %v8008_v41 = vld [vmem:[#allocation69_spill] sm:$0xff] }
 0x307   :  { %4566 = vmatprep.subr.bf16.mxu1 %v7991_v60  ;;  %v8007_v60 = vld [vmem:[#allocation41_spill] sm:$0xff] }
 0x309   :  { %2607 = vmatmul.mubr.f32.gmra.mrb[68].mxu1 %v7992_v58 }
 0x30a   :  { %2613 = vmatprep.mubr.f32.mxu1 %v7993_v15  ;;  %4568 = vmatpush3.bf16.msra.mxu1 %v7994_v2  ;;  %v8005_v2 = vld [vmem:[#allocation70_spill] sm:$0xff] }
 0x30b   :  { %4570 = vmatprep.subr.bf16.mxu1 %v7995_v3  ;;  %v8006_v3 = vld [vmem:[#allocation23_spill] sm:$0xff] }
 0x30d   :  { %2616 = vmatmul.mubr.f32.gmra.mrb[70].mxu1 %v7996_v32 }
 0x30e   :  { %2622 = vmatprep.mubr.f32.mxu1 %v7997_v11  ;;  %4572 = vmatpush3.bf16.msra.mxu1 %v7998_v57  ;;  %v8009_v57 = vld [vmem:[#allocation74_spill] sm:$0xff] }
 0x30f   :  { %4574 = vmatprep.subr.bf16.mxu1 %v7999_v23  ;;  %v8010_v23 = vld [vmem:[#allocation28_spill] sm:$0xff] }
 0x311   :  { %2625 = vmatmul.mubr.f32.gmra.mrb[72].mxu1 %v8000_v50 }
 0x312   :  { %2631 = vmatprep.mubr.f32.mxu1 %v8001_v24  ;;  %4576 = vmatpush3.bf16.msra.mxu1 %v8002_v36  ;;  %v8013_v36 = vand.u32 4294901760, %v8012_v42  ;;  %v8024_v42 = vld [vmem:[#allocation90_spill] sm:$0xff] }
 0x313   :  { %4578 = vmatprep.subr.bf16.mxu1 %v8003_v61  ;;  %v8015_v61 = vand.u32 4294901760, %v8014_v27  ;;  %v8028_v27 = vand.u32 4294901760, %v7983_v29  ;;  %v8035_v29 = vand.u32 4294901760, %v5804_v19  ;;  %v8042_v19 = vand.u32 4294901760, %v5820_v47 }
 0x314   :  { %v8049_v47 = vand.u32 4294901760, %v5926_v43  ;;  %v8056_v43 = vand.u32 4294901760, %v7963_v12 }
 0x315   :  { %2634 = vmatmul.mubr.f32.gmra.mrb[74].mxu1 %v8004_v55  ;;  %v4589_v17 = vpack.c.bf16 %v8015_v61, %v8013_v36  ;;  %v8025_v61 = vld [vmem:[#allocation89_spill] sm:$0xff] }
 0x316   :  { %2640 = vmatprep.mubr.f32.mxu1 %v8005_v2  ;;  %4580 = vmatpush3.bf16.msra.mxu1 %v8006_v3  ;;  %v8018_v3 = vld [vmem:[#allocation19_spill] sm:$0xff]  ;;  %v8026_v36 = vld [vmem:[#allocation93_spill] sm:$0xff] }
 0x317   :  { %4582 = vmatprep.subr.bf16.mxu1 %v8007_v60  ;;  %v8019_v60 = vld [vmem:[#allocation77_spill] sm:$0xff] }
 0x319   :  { %2643 = vmatmul.mubr.f32.gmra.mrb[76].mxu1 %v8008_v41 }
 0x31a   :  { %2649 = vmatprep.mubr.f32.mxu1 %v8009_v57  ;;  %4584 = vmatpush3.bf16.msra.mxu1 %v8010_v23  ;;  %v8022_v23 = vld [vmem:[#allocation86_spill] sm:$0xff] }
 0x31b   :  { %4586 = vmatprep.subr.bf16.mxu1 %v8011_v45  ;;  %v8023_v45 = vld [vmem:[#allocation85_spill] sm:$0xff] }
 0x31d   :  { %2652 = vmatmul.mubr.f32.gmra.mrb[78].mxu1 %v8016_v31 }
 0x31e   :  { %2658 = vmatprep.mubr.f32.mxu1 %v8017_v62  ;;  %4588 = vmatpush3.bf16.msra.mxu1 %v8018_v3  ;;  %v8029_v3 = vand.u32 4294901760, %v5784_v46 }
 0x31f   :  { %4590 = vmatprep.subr.bf16.mxu1 %v4589_v17  ;;  %v8027_v17 = vld [vmem:[#allocation97_spill] sm:$0xff] }
 0x321   :  { %2661 = vmatmul.mubr.f32.gmra.mrb[80].mxu1 %v8019_v60 }
 0x322   :  { %2667 = vmatprep.mubr.f32.mxu1 %v8020_v5 }
 0x325   :  { %2670 = vmatmul.mubr.f32.gmra.mrb[82].mxu1 %v8021_v16 }
 0x326   :  { %2676 = vmatprep.mubr.f32.mxu1 %v8022_v23 }
 0x329   :  { %2679 = vmatmul.mubr.f32.gmra.mrb[84].mxu1 %v8023_v45 }
 0x32a   :  { %2685 = vmatprep.mubr.f32.mxu1 %v8024_v42 }
 0x32d   :  { %2688 = vmatmul.mubr.f32.gmra.mrb[86].mxu1 %v8025_v61 }
 0x32e   :  { %2694 = vmatprep.mubr.f32.mxu1 %v6434_v39  ;;  %v8030_v39 = vand.u32 4294901760, %v5789_v40  ;;  %v8037_v40 = vand.u32 4294901760, %v5808_v28  ;;  %v8044_v28 = vand.u32 4294901760, %v5825_v1  ;;  %v8051_v1 = vand.u32 4294901760, %v7996_v32 }
 0x32f   :  { %v8058_v32 = vand.u32 4294901760, %v8001_v24  ;;  %v8064_v24 = vand.u32 4294901760, %v8005_v2  ;;  %v8070_v2 = vand.u32 4294901760, %v8009_v57  ;;  %v8075_v57 = vld [vmem:[#allocation39_spill] sm:$0xff] }
 0x331   :  { %2697 = vmatmul.mubr.f32.gmra.mrb[88].mxu1 %v8026_v36  ;;  %v4591_v36 = vpack.c.bf16 %v8030_v39, %v8029_v3 }
 0x332   :  { %2703 = vmatprep.mubr.f32.mxu1 %v6454_v34  ;;  %v8031_v34 = vand.u32 4294901760, %v5793_v48  ;;  %v8038_v48 = vand.u32 4294901760, %v5814_v63  ;;  %v8045_v63 = vand.u32 4294901760, %v7992_v58  ;;  %v8052_v58 = vand.u32 4294901760, %v7997_v11 }
 0x333   :  { %v8059_v11 = vand.u32 4294901760, %v7967_v18  ;;  %v8066_v18 = vand.u32 4294901760, %v7974_v10  ;;  %v8071_v10 = vand.u32 4294901760, %v7977_v51  ;;  %v8076_v51 = vand.u32 4294901760, %v8019_v60 }
 0x334   :  { %v4597_v3 = vpack.c.bf16 %v8038_v48, %v8037_v40  ;;  %v8080_v60 = vand.u32 4294901760, %v8023_v45 }
 0x335   :  { %2706 = vmatmul.mubr.f32.gmra.mrb[90].mxu1 %v8027_v17  ;;  %v8032_v17 = vand.u32 4294901760, %v5797_v56  ;;  %v8039_v56 = vand.u32 4294901760, %v7988_v38  ;;  %v8046_v38 = vand.u32 4294901760, %v7993_v15  ;;  %v8053_v15 = vand.u32 4294901760, %v7961_v59 }
 0x336   :  { %2712 = vmatprep.mubr.f32.mxu1 %v6474_v9  ;;  %v8033_v9 = vand.u32 4294901760, %v7984_v25  ;;  %v8040_v25 = vand.u32 4294901760, %v7989_v7  ;;  %v8060_v59 = vand.u32 4294901760, %v7966_v4  ;;  %v8065_v4 = vand.u32 4294901760, %v7975_v35 }
 0x337   :  { %v4593_v61 = vpack.c.bf16 %v8032_v17, %v8031_v34  ;;  %v8072_v35 = vand.u32 4294901760, %v7978_v26 }
 0x338   :  { %v4611_v17 = vpack.c.bf16 %v8060_v59, %v8059_v11  ;;  %v4615_v40 = vpack.c.bf16 %v8066_v18, %v8065_v4  ;;  %v8090_v11 = vld [vmem:[#allocation97_spill] sm:$0xff] }
 0x339   :  { %2715 = vmatmul.mubr.f32.gmra.mrb[92].mxu1 %v6468_v8  ;;  %v8091_v59 = vand.u32 4294901760, %v8090_v11 }
 0x33a   :  { %2721 = vmatprep.mubr.f32.mxu1 %v6492_v14  ;;  %v8034_v14 = vand.u32 4294901760, %v7985_v37  ;;  %v8041_v37 = vand.u32 4294901760, %v5818_v52  ;;  %v8048_v52 = vand.u32 4294901760, %v5836_v13  ;;  %v8055_v13 = vand.u32 4294901760, %v7964_v53 }
 0x33b   :  { %v8062_v53 = vand.u32 4294901760, %v7969_v30  ;;  %v8068_v30 = vand.u32 4294901760, %v7973_v6 }
 0x33c   :  { %v4599_v39 = vpack.c.bf16 %v8042_v19, %v8041_v37  ;;  %v4619_v37 = vpack.c.bf16 %v8072_v35, %v8071_v10  ;;  %v8073_v19 = vand.u32 4294901760, %v8016_v31  ;;  %v8101_v10 = vld [vmem:[#allocation13_spill] sm:$0xff]  ;;  %v8102_v35 = vld [vmem:[#allocation14_spill] sm:$0xff] }
 0x33d   :  { %2724 = vmatmul.mubr.f32.gmra.mrb[94].mxu1 %v6486_v20 }
 0x33e   :  { %2828 = vmatprep.mubr.f32.mxu1 %v8028_v27  ;;  %v8036_v27 = vand.u32 4294901760, %v5806_v21  ;;  %v8043_v21 = vand.u32 4294901760, %v5822_v33  ;;  %v8050_v33 = vand.u32 4294901760, %v5928_v22  ;;  %v8057_v22 = vand.u32 4294901760, %v8000_v50 }
 0x33f   :  { %v8063_v50 = vand.u32 4294901760, %v8004_v55 }
 0x340   :  { %v4595_v46 = vpack.c.bf16 %v8036_v27, %v8035_v29  ;;  %v4601_v34 = vpack.c.bf16 %v8044_v28, %v8043_v21  ;;  %v4605_v7 = vpack.c.bf16 %v8050_v33, %v8049_v47 }
 0x341   :  { %2832 = vmatmul.mubr.f32.vlgmr.msra.gmra.mrb[96].mxu1 %v8033_v9  ;;  %v8047_v9 = vand.u32 4294901760, %v5830_v0  ;;  %v8054_v0 = vand.u32 4294901760, %v5932_v44  ;;  %v8061_v44 = vand.u32 4294901760, %v7970_v54  ;;  %v8067_v54 = vand.u32 4294901760, %v7972_v49 }
 0x342   :  { %2839 = vmatprep.mubr.f32.mxu1 %v8034_v14  ;;  %4592 = vmatpush3.bf16.msra.mxu1 %v4591_v36  ;;  %v4609_v36 = vpack.c.bf16 %v8056_v43, %v8055_v13  ;;  %v8086_v13 = vld [vmem:[#allocation93_spill] sm:$0xff] }
 0x343   :  { %4594 = vmatprep.subr.bf16.mxu1 %v4593_v61  ;;  %v4603_v14 = vpack.c.bf16 %v8048_v52, %v8047_v9  ;;  %v4607_v61 = vpack.c.bf16 %v8054_v0, %v8053_v15  ;;  %v4613_v29 = vpack.c.bf16 %v8062_v53, %v8061_v44  ;;  %v4617_v48 = vpack.c.bf16 %v8068_v30, %v8067_v54  ;;  %v8084_v15 = vld [vmem:[#allocation94_spill] sm:$0xff]  ;;  %v8092_v44 = vld [vmem:[#allocation101_spill] sm:$0xff] }
 0x344   :  { %v8079_v9 = vand.u32 4294901760, %v8022_v23  ;;  %v8085_v23 = vand.u32 4294901760, %v8084_v15  ;;  %v8087_v45 = vand.u32 4294901760, %v8086_v13  ;;  %v8093_v53 = vand.u32 4294901760, %v8092_v44  ;;  %v8115_v15 = vld [vmem:[#allocation59_spill] sm:$0xff] }
 0x345   :  { %2843 = vmatmul.mubr.f32.gmra.mrb[98].mxu1 %v8039_v56  ;;  %v8069_v56 = vand.u32 4294901760, %v8008_v41  ;;  %v8074_v41 = vand.u32 4294901760, %v8017_v62  ;;  %v8097_v54 = vand.u32 4294901760, %v6486_v20  ;;  %v8103_v20 = vld [vmem:[#allocation31_spill] sm:$0xff]  ;;  %v6812_v13 = vld [vmem:[%s7303_s3 + $0x2] ss:$0 sm:$0xff] }
 0x346   :  { %2850 = vmatprep.mubr.f32.mxu1 %v8040_v25  ;;  %4596 = vmatpush3.bf16.msra.mxu1 %v4595_v46  ;;  %v8121_v44 = vld [vmem:[#allocation23_spill] sm:$0xff] }
 0x347   :  { %4598 = vmatprep.subr.bf16.mxu1 %v4597_v3 }
 0x349   :  { %2854 = vmatmul.mubr.f32.gmra.mrb[100].mxu1 %v8045_v63 }
 0x34a   :  { %2861 = vmatprep.mubr.f32.mxu1 %v8046_v38  ;;  %4600 = vmatpush3.bf16.msra.mxu1 %v4599_v39  ;;  %v8078_v38 = vand.u32 4294901760, %v8021_v16 }
 0x34b   :  { %4602 = vmatprep.subr.bf16.mxu1 %v4601_v34  ;;  %v8077_v34 = vand.u32 4294901760, %v8020_v5  ;;  %v8081_v5 = vand.u32 4294901760, %v8024_v42 }
 0x34d   :  { %2865 = vmatmul.mubr.f32.gmra.mrb[102].mxu1 %v8051_v1  ;;  %v8082_v1 = vld [vmem:[#allocation89_spill] sm:$0xff] }
 0x34e   :  { %2872 = vmatprep.mubr.f32.mxu1 %v8052_v58  ;;  %4604 = vmatpush3.bf16.msra.mxu1 %v4603_v14  ;;  %v8083_v16 = vand.u32 4294901760, %v8082_v1 }
 0x34f   :  { %4606 = vmatprep.subr.bf16.mxu1 %v4605_v7 }
 0x351   :  { %2876 = vmatmul.mubr.f32.gmra.mrb[104].mxu1 %v8057_v22 }
 0x352   :  { %2883 = vmatprep.mubr.f32.mxu1 %v8058_v32  ;;  %4608 = vmatpush3.bf16.msra.mxu1 %v4607_v61 }
 0x353   :  { %4610 = vmatprep.subr.bf16.mxu1 %v4609_v36  ;;  %v3821_v12 = vpop.f32.mrb[0].mxu1  ;;  %v8088_v36 = vld [vmem:[#allocation98_spill] sm:$0xff] }
 0x354   :  { %v3822_v27 = vpop.f32.mrb[1].mxu1  ;;  %v8089_v42 = vand.u32 4294901760, %v8088_v36 }
 0x355   :  { %2887 = vmatmul.mubr.f32.gmra.mrb[106].mxu1 %v8063_v50  ;;  %v6704_v46 = vadd.f32 %v3822_v27, %v3821_v12  ;;  %v8094_v27 = vand.u32 4294901760, %v6468_v8 }
 0x356   :  { %2894 = vmatprep.mubr.f32.mxu1 %v8064_v24  ;;  %4612 = vmatpush3.bf16.msra.mxu1 %v4611_v17  ;;  %v8095_v24 = vld [vmem:[#allocation104_spill] sm:$0xff] }
 0x357   :  { %4614 = vmatprep.subr.bf16.mxu1 %v4613_v29  ;;  %v3824_v3 = vpop.f32.mrb[2].mxu1  ;;  %v8096_v4 = vand.u32 4294901760, %v8095_v24  ;;  %v8123_v24 = vld [vmem:[#allocation67_spill] sm:$0xff] }
 0x358   :  { %v3825_v55 = vpop.f32.mrb[3].mxu1 }
 0x359   :  { %2898 = vmatmul.mubr.f32.gmra.mrb[108].mxu1 %v8069_v56  ;;  %v6718_v25 = vadd.f32 %v3825_v55, %v3824_v3  ;;  %v8099_v56 = vld [vmem:[#allocation47_spill] sm:$0xff] }
 0x35a   :  { %2905 = vmatprep.mubr.f32.mxu1 %v8070_v2  ;;  %4616 = vmatpush3.bf16.msra.mxu1 %v4615_v40  ;;  %v8100_v2 = vld [vmem:[#allocation42_spill] sm:$0xff] }
 0x35b   :  { %4618 = vmatprep.subr.bf16.mxu1 %v4617_v48  ;;  %v3827_v49 = vpop.f32.mrb[4].mxu1  ;;  %v8098_v48 = vld [vmem:[#allocation48_spill] sm:$0xff] }
 0x35c   :  { %v3828_v6 = vpop.f32.mrb[5].mxu1 }
 0x35d   :  { %2909 = vmatmul.mubr.f32.gmra.mrb[110].mxu1 %v8073_v19  ;;  %v6728_v39 = vadd.f32 %v3828_v6, %v3827_v49  ;;  %v8104_v19 = vld [vmem:[#allocation38_spill] sm:$0xff] }
 0x35e   :  { %2916 = vmatprep.mubr.f32.mxu1 %v8074_v41  ;;  %4620 = vmatpush3.bf16.msra.mxu1 %v4619_v37  ;;  %v8105_v41 = vld [vmem:[#allocation34_spill] sm:$0xff] }
 0x35f   :  { %4622 = vmatprep.subr.bf16.mxu1 %v8075_v57  ;;  %v8106_v57 = vld [vmem:[#allocation15_spill] sm:$0xff] }
 0x360   :  { %v3830_v21 = vpop.f32.mrb[6].mxu1 }
 0x361   :  { %v3831_v28 = vpop.f32.mrb[7].mxu1  ;;  %2920 = vmatmul.mubr.f32.gmra.mrb[112].mxu1 %v8076_v51  ;;  %v8107_v51 = vld [vmem:[#allocation46_spill] sm:$0xff] }
 0x362   :  { %v6735_v26 = vadd.f32 %v3831_v28, %v3830_v21  ;;  %2927 = vmatprep.mubr.f32.mxu1 %v8077_v34 }
 0x364   :  { %v3833_v31 = vpop.f32.mrb[8].mxu1 }
 0x365   :  { %v3834_v63 = vpop.f32.mrb[9].mxu1  ;;  %2931 = vmatmul.mubr.f32.gmra.mrb[114].mxu1 %v8078_v38  ;;  %v8110_v38 = vld [vmem:[#allocation36_spill] sm:$0xff] }
 0x366   :  { %v6741_v62 = vadd.f32 %v3834_v63, %v3833_v31  ;;  %2938 = vmatprep.mubr.f32.mxu1 %v8079_v9  ;;  %v8108_v31 = vld [vmem:[#allocation56_spill] sm:$0xff] }
 0x367   :  { %v8109_v63 = vld [vmem:[#allocation16_spill] sm:$0xff] }
 0x368   :  { %v3836_v52 = vpop.f32.mrb[10].mxu1 }
 0x369   :  { %v3837_v14 = vpop.f32.mrb[11].mxu1  ;;  %2942 = vmatmul.mubr.f32.gmra.mrb[116].mxu1 %v8080_v60 }
 0x36a   :  { %v6747_v47 = vadd.f32 %v3837_v14, %v3836_v52  ;;  %2949 = vmatprep.mubr.f32.mxu1 %v8081_v5  ;;  %v8111_v14 = vld [vmem:[#allocation54_spill] sm:$0xff]  ;;  %v8112_v5 = vld [vmem:[#allocation60_spill] sm:$0xff] }
 0x36c   :  { %v3839_v33 = vpop.f32.mrb[12].mxu1 }
 0x36d   :  { %v3840_v7 = vpop.f32.mrb[13].mxu1  ;;  %2953 = vmatmul.mubr.f32.gmra.mrb[118].mxu1 %v8083_v16 }
 0x36e   :  { %v6753_v58 = vadd.f32 %v3840_v7, %v3839_v33  ;;  %2960 = vmatprep.mubr.f32.mxu1 %v8085_v23  ;;  %v8113_v33 = vld [vmem:[#allocation17_spill] sm:$0xff]  ;;  %v8114_v7 = vld [vmem:[#allocation18_spill] sm:$0xff] }
 0x370   :  { %v3842_v0 = vpop.f32.mrb[14].mxu1 }
 0x371   :  { %v3843_v61 = vpop.f32.mrb[15].mxu1  ;;  %2964 = vmatmul.mubr.f32.gmra.mrb[120].mxu1 %v8087_v45  ;;  %v8118_v45 = vld [vmem:[#allocation21_spill] sm:$0xff] }
 0x372   :  { %v6759_v43 = vadd.f32 %v3843_v61, %v3842_v0  ;;  %2971 = vmatprep.mubr.f32.mxu1 %v8089_v42  ;;  %v8116_v0 = vld [vmem:[#allocation64_spill] sm:$0xff] }
 0x373   :  { %v8117_v61 = vld [vmem:[#allocation40_spill] sm:$0xff] }
 0x374   :  { %v3845_v22 = vpop.f32.mrb[16].mxu1 }
 0x375   :  { %v3846_v32 = vpop.f32.mrb[17].mxu1  ;;  %2975 = vmatmul.mubr.f32.gmra.mrb[122].mxu1 %v8091_v59  ;;  %v8120_v59 = vld [vmem:[#allocation68_spill] sm:$0xff] }
 0x376   :  { %v6765_v17 = vadd.f32 %v3846_v32, %v3845_v22  ;;  %2982 = vmatprep.mubr.f32.mxu1 %v8093_v53  ;;  %v8119_v22 = vld [vmem:[#allocation63_spill] sm:$0xff]  ;;  %v1891_v32 = vadd.f32 %v6704_v46, %v6812_v13  ;;  %v8122_v53 = vld [vmem:[#allocation41_spill] sm:$0xff]  ;;  %v8125_v46 = vld [vmem:[#allocation28_spill] sm:$0xff] }
 0x378   :  { %v3848_v29 = vpop.f32.mrb[18].mxu1 }
 0x379   :  { %v3849_v12 = vpop.f32.mrb[19].mxu1  ;;  %2986 = vmatmul.mubr.f32.gmra.mrb[124].mxu1 %v8094_v27 }
 0x37a   :  { %v6771_v50 = vadd.f32 %v3849_v12, %v3848_v29  ;;  %2993 = vmatprep.mubr.f32.mxu1 %v8096_v4  ;;  %v1906_v4 = vadd.f32 %v6718_v25, %v6812_v13  ;;  %v8129_v25 = vld [vmem:[#allocation19_spill] sm:$0xff] }
 0x37c   :  { %v3851_v18 = vpop.f32.mrb[20].mxu1 }
 0x37d   :  { %v3852_v40 = vpop.f32.mrb[21].mxu1  ;;  %2997 = vmatmul.mubr.f32.gmra.mrb[126].mxu1 %v8097_v54  ;;  %v8126_v54 = vld [vmem:[#allocation43_spill] sm:$0xff] }
 0x37e   :  { %v6777_v30 = vadd.f32 %v3852_v40, %v3851_v18  ;;  %3163 = vmatprep.mubr.f32.mxu1 %v8098_v48  ;;  %v8124_v40 = vld [vmem:[#allocation72_spill] sm:$0xff] }
 0x380   :  { %v3854_v3 = vpop.f32.mrb[22].mxu1 }
 0x381   :  { %v3855_v55 = vpop.f32.mrb[23].mxu1  ;;  %3165 = vmatmul.mubr.f32.vlgmr.msra.gmra.mrb[128].mxu1 %v8099_v56 }
 0x382   :  { %v6781_v8 = vadd.f32 %v3855_v55, %v3854_v3  ;;  %3170 = vmatprep.mubr.f32.mxu1 %v8100_v2  ;;  %4624 = vmatpush3.bf16.msra.mxu1 %v8101_v10 }
 0x383   :  { %4626 = vmatprep.subr.bf16.mxu1 %v8102_v35  ;;  %v8127_v35 = vld [vmem:[#allocation71_spill] sm:$0xff] }
 0x384   :  { %v3857_v37 = vpop.f32.mrb[24].mxu1 }
 0x385   :  { %v3858_v49 = vpop.f32.mrb[25].mxu1  ;;  %3172 = vmatmul.mubr.f32.gmra.mrb[130].mxu1 %v8103_v20 }
 0x386   :  { %v6787_v6 = vadd.f32 %v3858_v49, %v3857_v37  ;;  %3177 = vmatprep.mubr.f32.mxu1 %v8104_v19  ;;  %4628 = vmatpush3.bf16.msra.mxu1 %v8105_v41  ;;  %v1921_v37 = vadd.f32 %v6728_v39, %v6812_v13  ;;  %v8128_v41 = vld [vmem:[#allocation76_spill] sm:$0xff] }
 0x387   :  { %4630 = vmatprep.subr.bf16.mxu1 %v8106_v57 }
 0x388   :  { %v3860_v21 = vpop.f32.mrb[26].mxu1 }
 0x389   :  { %v3861_v28 = vpop.f32.mrb[27].mxu1  ;;  %3179 = vmatmul.mubr.f32.gmra.mrb[132].mxu1 %v8107_v51 }
 0x38a   :  { %v6793_v34 = vadd.f32 %v3861_v28, %v3860_v21  ;;  %3184 = vmatprep.mubr.f32.mxu1 %v8108_v31  ;;  %4632 = vmatpush3.bf16.msra.mxu1 %v8109_v63  ;;  %v8130_v63 = vld [vmem:[#allocation75_spill] sm:$0xff] }
 0x38b   :  { %4634 = vmatprep.subr.bf16.mxu1 %v8110_v38  ;;  %v1936_v38 = vadd.f32 %v6735_v26, %v6812_v13  ;;  %v8134_v26 = vld [vmem:[#allocation83_spill] sm:$0xff] }
 0x38c   :  { %v3863_v9 = vpop.f32.mrb[28].mxu1 }
 0x38d   :  { %v3864_v52 = vpop.f32.mrb[29].mxu1  ;;  %3186 = vmatmul.mubr.f32.gmra.mrb[134].mxu1 %v8111_v14 }
 0x38e   :  { %v6799_v60 = vadd.f32 %v3864_v52, %v3863_v9  ;;  %3191 = vmatprep.mubr.f32.mxu1 %v8112_v5  ;;  %4636 = vmatpush3.bf16.msra.mxu1 %v8113_v33  ;;  %v8131_v52 = vld [vmem:[#allocation80_spill] sm:$0xff] }
 0x38f   :  { %4638 = vmatprep.subr.bf16.mxu1 %v8114_v7 }
 0x390   :  { %v3866_v1 = vpop.f32.mrb[30].mxu1 }
 0x391   :  { %v3867_v16 = vpop.f32.mrb[31].mxu1  ;;  %3193 = vmatmul.mubr.f32.gmra.mrb[136].mxu1 %v8115_v15 }
 0x392   :  { %v6805_v23 = vadd.f32 %v3867_v16, %v3866_v1  ;;  %3198 = vmatprep.mubr.f32.mxu1 %v8116_v0  ;;  %4640 = vmatpush3.bf16.msra.mxu1 %v8117_v61  ;;  %v8132_v1 = vld [vmem:[#allocation79_spill] sm:$0xff]  ;;  %v1951_v16 = vadd.f32 %v6741_v62, %v6812_v13 }
 0x393   :  { %4642 = vmatprep.subr.bf16.mxu1 %v8118_v45  ;;  %v8133_v45 = vld [vmem:[#allocation84_spill] sm:$0xff]  ;;  %v8136_v62 = vld [vmem:[#allocation87_spill] sm:$0xff] }
 0x394   :  { %v3901_v36 = vpop.f32.mrb[32].mxu1 }
 0x395   :  { %v3902_v42 = vpop.f32.mrb[33].mxu1  ;;  %3200 = vmatmul.mubr.f32.gmra.mrb[138].mxu1 %v8119_v22 }
 0x396   :  { %v3903_v11 = vadd.f32 %v3902_v42, %v3901_v36  ;;  %3205 = vmatprep.mubr.f32.mxu1 %v8120_v59  ;;  %4644 = vmatpush3.bf16.msra.mxu1 %v8121_v44 }
 0x397   :  { %4646 = vmatprep.subr.bf16.mxu1 %v8122_v53  ;;  %v8135_v53 = vld [vmem:[#allocation88_spill] sm:$0xff] }
 0x398   :  { %v6821_v29 = vadd.f32 %v3903_v11, %v1891_v32  ;;  %v3904_v12 = vpop.f32.mrb[34].mxu1  ;;  %v1966_v11 = vadd.f32 %v6747_v47, %v6812_v13  ;;  %v8138_v47 = vld [vmem:[#allocation91_spill] sm:$0xff] }
 0x399   :  { %v3905_v27 = vpop.f32.mrb[35].mxu1  ;;  %3207 = vmatmul.mubr.f32.gmra.mrb[140].mxu1 %v8123_v24 }
 0x39a   :  { %v3906_v18 = vadd.f32 %v3905_v27, %v3904_v12  ;;  %3212 = vmatprep.mubr.f32.mxu1 %v8124_v40  ;;  %4648 = vmatpush3.bf16.msra.mxu1 %v8125_v46 }
 0x39b   :  { %4650 = vmatprep.subr.bf16.mxu1 %v8126_v54  ;;  %v8137_v54 = vld [vmem:[#allocation92_spill] sm:$0xff] }
 0x39c   :  { %v6829_v3 = vadd.f32 %v3906_v18, %v1906_v4  ;;  %v3907_v55 = vpop.f32.mrb[36].mxu1  ;;  %v1981_v18 = vadd.f32 %v6753_v58, %v6812_v13  ;;  %v8140_v58 = vld [vmem:[#allocation95_spill] sm:$0xff] }
 0x39d   :  { %v3908_v10 = vpop.f32.mrb[37].mxu1  ;;  %3214 = vmatmul.mubr.f32.gmra.mrb[142].mxu1 %v8127_v35 }
 0x39e   :  { %v3909_v49 = vadd.f32 %v3908_v10, %v3907_v55  ;;  %3219 = vmatprep.mubr.f32.mxu1 %v8128_v41  ;;  %4652 = vmatpush3.bf16.msra.mxu1 %v8129_v25 }
 0x3a0   :  { %v6836_v57 = vadd.f32 %v3909_v49, %v1921_v37  ;;  %v3910_v21 = vpop.f32.mrb[38].mxu1  ;;  %v1996_v49 = vadd.f32 %v6759_v43, %v6812_v13  ;;  %v8142_v43 = vld [vmem:[#allocation99_spill] sm:$0xff] }
 0x3a1   :  { %v3911_v28 = vpop.f32.mrb[39].mxu1  ;;  %3221 = vmatmul.mubr.f32.gmra.mrb[144].mxu1 %v8130_v63 }
 0x3a2   :  { %v3912_v9 = vadd.f32 %v3911_v28, %v3910_v21  ;;  %3226 = vmatprep.mubr.f32.mxu1 %v8131_v52  ;;  %v8139_v21 = vld [vmem:[#allocation96_spill] sm:$0xff] }
 0x3a4   :  { %v6842_v33 = vadd.f32 %v3912_v9, %v1936_v38  ;;  %v3913_v39 = vpop.f32.mrb[40].mxu1 }
 0x3a5   :  { %v3914_v7 = vpop.f32.mrb[41].mxu1  ;;  %3228 = vmatmul.mubr.f32.gmra.mrb[146].mxu1 %v8132_v1 }
 0x3a6   :  { %v3915_v61 = vadd.f32 %v3914_v7, %v3913_v39  ;;  %3233 = vmatprep.mubr.f32.mxu1 %v8133_v45  ;;  %v2011_v39 = vadd.f32 %v6765_v17, %v6812_v13  ;;  %v8144_v17 = vld [vmem:[#allocation102_spill] sm:$0xff] }
 0x3a8   :  { %v6848_v36 = vadd.f32 %v3915_v61, %v1951_v16  ;;  %v3916_v42 = vpop.f32.mrb[42].mxu1  ;;  %v8141_v16 = vld [vmem:[#allocation100_spill] sm:$0xff] }
 0x3a9   :  { %v3917_v32 = vpop.f32.mrb[43].mxu1  ;;  %3235 = vmatmul.mubr.f32.gmra.mrb[148].mxu1 %v8134_v26 }
 0x3aa   :  { %v3918_v44 = vadd.f32 %v3917_v32, %v3916_v42  ;;  %3240 = vmatprep.mubr.f32.mxu1 %v8135_v53 }
 0x3ac   :  { %v6854_v12 = vadd.f32 %v3918_v44, %v1966_v11  ;;  %v3919_v27 = vpop.f32.mrb[44].mxu1  ;;  %v2026_v11 = vadd.f32 %v6771_v50, %v6812_v13  ;;  %v2056_v50 = vadd.f32 %v6781_v8, %v6812_v13  ;;  %v2086_v8 = vadd.f32 %v6793_v34, %v6812_v13 }
 0x3ad   :  { %v3920_v4 = vpop.f32.mrb[45].mxu1  ;;  %3242 = vmatmul.mubr.f32.gmra.mrb[150].mxu1 %v8136_v62  ;;  %v2116_v34 = vadd.f32 %v6805_v23, %v6812_v13 }
 0x3ae   :  { %v3921_v46 = vadd.f32 %v3920_v4, %v3919_v27  ;;  %3247 = vmatprep.mubr.f32.mxu1 %v8137_v54  ;;  %v8143_v27 = vld [vmem:[#allocation103_spill] sm:$0xff] }
 0x3b0   :  { %v6860_v55 = vadd.f32 %v3921_v46, %v1981_v18  ;;  %v3922_v10 = vpop.f32.mrb[46].mxu1 }
 0x3b1   :  { %v3923_v37 = vpop.f32.mrb[47].mxu1  ;;  %3249 = vmatmul.mubr.f32.gmra.mrb[152].mxu1 %v8138_v47 }
 0x3b2   :  { %v3924_v25 = vadd.f32 %v3923_v37, %v3922_v10  ;;  %3254 = vmatprep.mubr.f32.mxu1 %v8139_v21  ;;  %v2041_v10 = vadd.f32 %v6777_v30, %v6812_v13  ;;  %v2071_v30 = vadd.f32 %v6787_v6, %v6812_v13  ;;  %v2101_v6 = vadd.f32 %v6799_v60, %v6812_v13 }
 0x3b4   :  { %v6866_v28 = vadd.f32 %v3924_v25, %v1996_v49  ;;  %v3925_v38 = vpop.f32.mrb[48].mxu1 }
 0x3b5   :  { %v3926_v9 = vpop.f32.mrb[49].mxu1  ;;  %3256 = vmatmul.mubr.f32.gmra.mrb[154].mxu1 %v8140_v58 }
 0x3b6   :  { %v3927_v7 = vadd.f32 %v3926_v9, %v3925_v38  ;;  %3261 = vmatprep.mubr.f32.mxu1 %v8141_v16 }
 0x3b8   :  { %v6872_v61 = vadd.f32 %v3927_v7, %v2011_v39  ;;  %v3928_v42 = vpop.f32.mrb[50].mxu1 }
 0x3b9   :  { %v3929_v32 = vpop.f32.mrb[51].mxu1  ;;  %3263 = vmatmul.mubr.f32.gmra.mrb[156].mxu1 %v8142_v43 }
 0x3ba   :  { %v3930_v44 = vadd.f32 %v3929_v32, %v3928_v42  ;;  %3268 = vmatprep.mubr.f32.mxu1 %v8143_v27 }
 0x3bc   :  { %v6878_v4 = vadd.f32 %v3930_v44, %v2026_v11  ;;  %v3931_v18 = vpop.f32.mrb[52].mxu1 }
 0x3bd   :  { %v3932_v46 = vpop.f32.mrb[53].mxu1  ;;  %3270 = vmatmul.mubr.f32.gmra.mrb[158].mxu1 %v8144_v17 }
 0x3be   :  { %v3933_v37 = vadd.f32 %v3932_v46, %v3931_v18  ;;  %3372 = vmatprep.mubr.f32.mxu1 %v8098_v48 }
 0x3c0   :  { %v6884_v49 = vadd.f32 %v3933_v37, %v2041_v10  ;;  %v3934_v25 = vpop.f32.mrb[54].mxu1 }
 0x3c1   :  { %v3935_v38 = vpop.f32.mrb[55].mxu1  ;;  %3374 = vmatmul.mubr.f32.vlgmr.msra.gmra.mrb[160].mxu1 %v8099_v56 }
 0x3c2   :  { %v3936_v9 = vadd.f32 %v3935_v38, %v3934_v25  ;;  %3379 = vmatprep.mubr.f32.mxu1 %v8100_v2 }
 0x3c4   :  { %v6890_v39 = vadd.f32 %v3936_v9, %v2056_v50  ;;  %v3937_v7 = vpop.f32.mrb[56].mxu1 }
 0x3c5   :  { %v3938_v42 = vpop.f32.mrb[57].mxu1  ;;  %3381 = vmatmul.mubr.f32.gmra.mrb[162].mxu1 %v8103_v20 }
 0x3c6   :  { %v3939_v48 = vadd.f32 %v3938_v42, %v3937_v7  ;;  %3386 = vmatprep.mubr.f32.mxu1 %v8104_v19 }
 0x3c8   :  { %v6896_v32 = vadd.f32 %v3939_v48, %v2071_v30  ;;  %v3940_v56 = vpop.f32.mrb[58].mxu1 }
 0x3c9   :  { %v3941_v11 = vpop.f32.mrb[59].mxu1  ;;  %3388 = vmatmul.mubr.f32.gmra.mrb[164].mxu1 %v8107_v51 }
 0x3ca   :  { %v3942_v2 = vadd.f32 %v3941_v11, %v3940_v56  ;;  %3393 = vmatprep.mubr.f32.mxu1 %v8108_v31 }
 0x3cc   :  { %v6902_v44 = vadd.f32 %v3942_v2, %v2086_v8  ;;  %v3943_v20 = vpop.f32.mrb[60].mxu1 }
 0x3cd   :  { %v3944_v18 = vpop.f32.mrb[61].mxu1  ;;  %3395 = vmatmul.mubr.f32.gmra.mrb[166].mxu1 %v8111_v14 }
 0x3ce   :  { %v3945_v19 = vadd.f32 %v3944_v18, %v3943_v20  ;;  %3400 = vmatprep.mubr.f32.mxu1 %v8112_v5 }
 0x3d0   :  { %v6908_v46 = vadd.f32 %v3945_v19, %v2101_v6  ;;  %v3946_v51 = vpop.f32.mrb[62].mxu1 }
 0x3d1   :  { %v3947_v10 = vpop.f32.mrb[63].mxu1  ;;  %3402 = vmatmul.mubr.f32.gmra.mrb[168].mxu1 %v8115_v15 }
 0x3d2   :  { %v3948_v31 = vadd.f32 %v3947_v10, %v3946_v51  ;;  %3407 = vmatprep.mubr.f32.mxu1 %v8116_v0 }
 0x3d4   :  { %v6914_v37 = vadd.f32 %v3948_v31, %v2116_v34  ;;  %v3981_v14 = vpop.f32.mrb[64].mxu1 }
 0x3d5   :  { %v3982_v25 = vpop.f32.mrb[65].mxu1  ;;  %3409 = vmatmul.mubr.f32.gmra.mrb[170].mxu1 %v8119_v22 }
 0x3d6   :  { %v3983_v60 = vadd.f32 %v3982_v25, %v3981_v14  ;;  %3414 = vmatprep.mubr.f32.mxu1 %v8120_v59 }
 0x3d8   :  { %v6919_v5 = vadd.f32 %v3983_v60, %v6821_v29  ;;  %v3984_v38 = vpop.f32.mrb[66].mxu1 }
 0x3d9   :  { %v3985_v15 = vpop.f32.mrb[67].mxu1  ;;  %3416 = vmatmul.mubr.f32.gmra.mrb[172].mxu1 %v8123_v24 }
 0x3da   :  { %v3986_v23 = vadd.f32 %v3985_v15, %v3984_v38  ;;  %3421 = vmatprep.mubr.f32.mxu1 %v8124_v40 }
 0x3dc   :  { %v6924_v0 = vadd.f32 %v3986_v23, %v6829_v3  ;;  %v3987_v13 = vpop.f32.mrb[68].mxu1 }
 0x3dd   :  { %v3988_v50 = vpop.f32.mrb[69].mxu1  ;;  %3423 = vmatmul.mubr.f32.gmra.mrb[174].mxu1 %v8127_v35 }
 0x3de   :  { %v3989_v22 = vadd.f32 %v3988_v50, %v3987_v13  ;;  %3428 = vmatprep.mubr.f32.mxu1 %v8128_v41 }
 0x3e0   :  { %v6929_v59 = vadd.f32 %v3989_v22, %v6836_v57  ;;  %v3990_v29 = vpop.f32.mrb[70].mxu1 }
 0x3e1   :  { %v3991_v9 = vpop.f32.mrb[71].mxu1  ;;  %3430 = vmatmul.mubr.f32.gmra.mrb[176].mxu1 %v8130_v63 }
 0x3e2   :  { %v3992_v24 = vadd.f32 %v3991_v9, %v3990_v29  ;;  %3435 = vmatprep.mubr.f32.mxu1 %v8131_v52 }
 0x3e4   :  { %v6934_v40 = vadd.f32 %v3992_v24, %v6842_v33  ;;  %v3993_v3 = vpop.f32.mrb[72].mxu1 }
 0x3e5   :  { %v3994_v7 = vpop.f32.mrb[73].mxu1  ;;  %3437 = vmatmul.mubr.f32.gmra.mrb[178].mxu1 %v8132_v1 }
 0x3e6   :  { %v3995_v35 = vadd.f32 %v3994_v7, %v3993_v3  ;;  %3442 = vmatprep.mubr.f32.mxu1 %v8133_v45 }
 0x3e8   :  { %v6939_v41 = vadd.f32 %v3995_v35, %v6848_v36  ;;  %v3996_v57 = vpop.f32.mrb[74].mxu1 }
 0x3e9   :  { %v3997_v42 = vpop.f32.mrb[75].mxu1  ;;  %3444 = vmatmul.mubr.f32.gmra.mrb[180].mxu1 %v8134_v26 }
 0x3ea   :  { %v3998_v63 = vadd.f32 %v3997_v42, %v3996_v57  ;;  %3449 = vmatprep.mubr.f32.mxu1 %v8135_v53 }
 0x3ec   :  { %v6944_v52 = vadd.f32 %v3998_v63, %v6854_v12  ;;  %v3999_v33 = vpop.f32.mrb[76].mxu1 }
 0x3ed   :  { %v4000_v30 = vpop.f32.mrb[77].mxu1  ;;  %3451 = vmatmul.mubr.f32.gmra.mrb[182].mxu1 %v8136_v62 }
 0x3ee   :  { %v4001_v1 = vadd.f32 %v4000_v30, %v3999_v33  ;;  %3456 = vmatprep.mubr.f32.mxu1 %v8137_v54 }
 0x3f0   :  { %v6949_v45 = vadd.f32 %v4001_v1, %v6860_v55  ;;  %v4002_v36 = vpop.f32.mrb[78].mxu1 }
 0x3f1   :  { %v4003_v48 = vpop.f32.mrb[79].mxu1  ;;  %3458 = vmatmul.mubr.f32.gmra.mrb[184].mxu1 %v8138_v47 }
 0x3f2   :  { %v4004_v26 = vadd.f32 %v4003_v48, %v4002_v36  ;;  %3463 = vmatprep.mubr.f32.mxu1 %v8139_v21 }
 0x3f4   :  { %v6954_v53 = vadd.f32 %v4004_v26, %v6866_v28  ;;  %v4005_v12 = vpop.f32.mrb[80].mxu1 }
 0x3f5   :  { %v4006_v56 = vpop.f32.mrb[81].mxu1  ;;  %3465 = vmatmul.mubr.f32.gmra.mrb[186].mxu1 %v8140_v58 }
 0x3f6   :  { %v4007_v62 = vadd.f32 %v4006_v56, %v4005_v12  ;;  %3470 = vmatprep.mubr.f32.mxu1 %v8141_v16 }
 0x3f8   :  { %v6959_v54 = vadd.f32 %v4007_v62, %v6872_v61  ;;  %v4008_v55 = vpop.f32.mrb[82].mxu1 }
 0x3f9   :  { %v4009_v11 = vpop.f32.mrb[83].mxu1  ;;  %3472 = vmatmul.mubr.f32.gmra.mrb[188].mxu1 %v8142_v43 }
 0x3fa   :  { %v4010_v47 = vadd.f32 %v4009_v11, %v4008_v55  ;;  %3477 = vmatprep.mubr.f32.mxu1 %v8143_v27 }
 0x3fc   :  { %v6964_v21 = vadd.f32 %v4010_v47, %v6878_v4  ;;  %v4011_v28 = vpop.f32.mrb[84].mxu1 }
 0x3fd   :  { %v4012_v8 = vpop.f32.mrb[85].mxu1  ;;  %3479 = vmatmul.mubr.f32.gmra.mrb[190].mxu1 %v8144_v17 }
 0x3fe   :  { %v4013_v58 = vadd.f32 %v4012_v8, %v4011_v28 }
 0x400   :  { %v6968_v16 = vadd.f32 %v4013_v58, %v6884_v49  ;;  %v4014_v61 = vpop.f32.mrb[86].mxu1 }
 0x401   :  { %v4015_v2 = vpop.f32.mrb[87].mxu1 }
 0x402   :  { %v4016_v20 = vadd.f32 %v4015_v2, %v4014_v61 }
 0x404   :  { %v6971_v18 = vadd.f32 %v4016_v20, %v6890_v39  ;;  %v4017_v43 = vpop.f32.mrb[88].mxu1 }
 0x405   :  { %v4018_v6 = vpop.f32.mrb[89].mxu1 }
 0x406   :  { %v4019_v27 = vadd.f32 %v4018_v6, %v4017_v43 }
 0x408   :  { %v6974_v4 = vadd.f32 %v4019_v27, %v6896_v32  ;;  %v4020_v19 = vpop.f32.mrb[90].mxu1 }
 0x409   :  { %v4021_v51 = vpop.f32.mrb[91].mxu1 }
 0x40a   :  { %v4022_v10 = vadd.f32 %v4021_v51, %v4020_v19 }
 0x40c   :  { %v6977_v17 = vadd.f32 %v4022_v10, %v6902_v44  ;;  %v4023_v49 = vpop.f32.mrb[92].mxu1 }
 0x40d   :  { %v4024_v34 = vpop.f32.mrb[93].mxu1 }
 0x40e   :  { %v4025_v31 = vadd.f32 %v4024_v34, %v4023_v49 }
 0x410   :  { %v6980_v14 = vadd.f32 %v4025_v31, %v6908_v46  ;;  %v4026_v39 = vpop.f32.mrb[94].mxu1 }
 0x411   :  { %v4027_v25 = vpop.f32.mrb[95].mxu1 }
 0x412   :  { %v4028_v60 = vadd.f32 %v4027_v25, %v4026_v39 }
 0x414   :  { %v6983_v38 = vadd.f32 %v4028_v60, %v6914_v37  ;;  %v4061_v32 = vpop.f32.mrb[96].mxu1 }
 0x415   :  { %v4062_v15 = vpop.f32.mrb[97].mxu1 }
 0x416   :  { %v4063_v23 = vadd.f32 %v4062_v15, %v4061_v32 }
 0x418   :  { %v6986_v13 = vadd.f32 %v4063_v23, %v6919_v5  ;;  %v4064_v44 = vpop.f32.mrb[98].mxu1 }
 0x419   :  { %v4065_v50 = vpop.f32.mrb[99].mxu1 }
 0x41a   :  { %v4066_v22 = vadd.f32 %v4065_v50, %v4064_v44 }
 0x41c   :  { %v6989_v29 = vadd.f32 %v4066_v22, %v6924_v0  ;;  %v4067_v46 = vpop.f32.mrb[100].mxu1 }
 0x41d   :  { %v4068_v9 = vpop.f32.mrb[101].mxu1 }
 0x41e   :  { %v4069_v24 = vadd.f32 %v4068_v9, %v4067_v46 }
 0x420   :  { %v6992_v3 = vadd.f32 %v4069_v24, %v6929_v59  ;;  %v4070_v37 = vpop.f32.mrb[102].mxu1 }
 0x421   :  { %v4071_v7 = vpop.f32.mrb[103].mxu1 }
 0x422   :  { %v4072_v35 = vadd.f32 %v4071_v7, %v4070_v37 }
 0x424   :  { %v6995_v57 = vadd.f32 %v4072_v35, %v6934_v40  ;;  %v4073_v5 = vpop.f32.mrb[104].mxu1 }
 0x425   :  { %v4074_v42 = vpop.f32.mrb[105].mxu1 }
 0x426   :  { %v4075_v63 = vadd.f32 %v4074_v42, %v4073_v5 }
 0x428   :  { %v6998_v33 = vadd.f32 %v4075_v63, %v6939_v41  ;;  %v4076_v0 = vpop.f32.mrb[106].mxu1 }
 0x429   :  { %v4077_v30 = vpop.f32.mrb[107].mxu1 }
 0x42a   :  { %v4078_v1 = vadd.f32 %v4077_v30, %v4076_v0 }
 0x42c   :  { %v7001_v36 = vadd.f32 %v4078_v1, %v6944_v52  ;;  %v4079_v59 = vpop.f32.mrb[108].mxu1 }
 0x42d   :  { %v4080_v48 = vpop.f32.mrb[109].mxu1 }
 0x42e   :  { %v4081_v26 = vadd.f32 %v4080_v48, %v4079_v59 }
 0x430   :  { %v7004_v12 = vadd.f32 %v4081_v26, %v6949_v45  ;;  %v4082_v40 = vpop.f32.mrb[110].mxu1 }
 0x431   :  { %v4083_v56 = vpop.f32.mrb[111].mxu1 }
 0x432   :  { %v4084_v62 = vadd.f32 %v4083_v56, %v4082_v40 }
 0x434   :  { %v7007_v55 = vadd.f32 %v4084_v62, %v6954_v53  ;;  %v4085_v41 = vpop.f32.mrb[112].mxu1 }
 0x435   :  { %v4086_v11 = vpop.f32.mrb[113].mxu1 }
 0x436   :  { %v4087_v47 = vadd.f32 %v4086_v11, %v4085_v41 }
 0x438   :  { %v7010_v28 = vadd.f32 %v4087_v47, %v6959_v54  ;;  %v4088_v52 = vpop.f32.mrb[114].mxu1 }
 0x439   :  { %v4089_v8 = vpop.f32.mrb[115].mxu1 }
 0x43a   :  { %v4090_v58 = vadd.f32 %v4089_v8, %v4088_v52 }
 0x43c   :  { %v7013_v61 = vadd.f32 %v4090_v58, %v6964_v21  ;;  %v4091_v45 = vpop.f32.mrb[116].mxu1 }
 0x43d   :  { %v4092_v2 = vpop.f32.mrb[117].mxu1 }
 0x43e   :  { %v4093_v20 = vadd.f32 %v4092_v2, %v4091_v45 }
 0x440   :  { %v7016_v43 = vadd.f32 %v4093_v20, %v6968_v16  ;;  %v4094_v53 = vpop.f32.mrb[118].mxu1 }
 0x441   :  { %v4095_v6 = vpop.f32.mrb[119].mxu1 }
 0x442   :  { %v4096_v27 = vadd.f32 %v4095_v6, %v4094_v53 }
 0x444   :  { %v7019_v19 = vadd.f32 %v4096_v27, %v6971_v18  ;;  %v4097_v54 = vpop.f32.mrb[120].mxu1 }
 0x445   :  { %v4098_v51 = vpop.f32.mrb[121].mxu1 }
 0x446   :  { %v4099_v10 = vadd.f32 %v4098_v51, %v4097_v54 }
 0x448   :  { %v7022_v49 = vadd.f32 %v4099_v10, %v6974_v4  ;;  %v4100_v21 = vpop.f32.mrb[122].mxu1 }
 0x449   :  { %v4101_v34 = vpop.f32.mrb[123].mxu1 }
 0x44a   :  { %v4102_v31 = vadd.f32 %v4101_v34, %v4100_v21 }
 0x44c   :  { %v7025_v39 = vadd.f32 %v4102_v31, %v6977_v17  ;;  %v4103_v16 = vpop.f32.mrb[124].mxu1 }
 0x44d   :  { %v4104_v25 = vpop.f32.mrb[125].mxu1 }
 0x44e   :  { %v4105_v60 = vadd.f32 %v4104_v25, %v4103_v16 }
 0x450   :  { %v7028_v32 = vadd.f32 %v4105_v60, %v6980_v14  ;;  %v4106_v18 = vpop.f32.mrb[126].mxu1 }
 0x451   :  { %v4107_v15 = vpop.f32.mrb[127].mxu1 }
 0x452   :  { %v4108_v23 = vadd.f32 %v4107_v15, %v4106_v18 }
 0x454   :  { %v7031_v44 = vadd.f32 %v4108_v23, %v6983_v38  ;;  %v4141_v4 = vpop.f32.mrb[128].mxu1 }
 0x455   :  { %v4142_v50 = vpop.f32.mrb[129].mxu1 }
 0x456   :  { %v4143_v22 = vadd.f32 %v4142_v50, %v4141_v4 }
 0x458   :  { %v7034_v46 = vadd.f32 %v4143_v22, %v6986_v13  ;;  %v4144_v17 = vpop.f32.mrb[130].mxu1 }
 0x459   :  { %v4145_v9 = vpop.f32.mrb[131].mxu1 }
 0x45a   :  { %v4146_v24 = vadd.f32 %v4145_v9, %v4144_v17 }
 0x45c   :  { %v7037_v37 = vadd.f32 %v4146_v24, %v6989_v29  ;;  %v4147_v14 = vpop.f32.mrb[132].mxu1 }
 0x45d   :  { %v4148_v7 = vpop.f32.mrb[133].mxu1 }
 0x45e   :  { %v4149_v35 = vadd.f32 %v4148_v7, %v4147_v14 }
 0x460   :  { %v7040_v5 = vadd.f32 %v4149_v35, %v6992_v3  ;;  %v4150_v38 = vpop.f32.mrb[134].mxu1 }
 0x461   :  { %v4151_v42 = vpop.f32.mrb[135].mxu1 }
 0x462   :  { %v4152_v63 = vadd.f32 %v4151_v42, %v4150_v38  ;;  %v4886_v38 = vld [vmem:[#allocation2] sm:$0xff] }
 0x464   :  { %v7043_v0 = vadd.f32 %v4152_v63, %v6995_v57  ;;  %v4153_v13 = vpop.f32.mrb[136].mxu1 }
 0x465   :  { %v4154_v30 = vpop.f32.mrb[137].mxu1 }
 0x466   :  { %v4155_v1 = vadd.f32 %v4154_v30, %v4153_v13 }
 0x468   :  { %v7046_v59 = vadd.f32 %v4155_v1, %v6998_v33  ;;  %v4156_v29 = vpop.f32.mrb[138].mxu1  ;;  %v4887_v1 = vld [vmem:[#allocation2 + $0x8] sm:$0xff] }
 0x469   :  { %v4157_v48 = vpop.f32.mrb[139].mxu1 }
 0x46a   :  { %v4158_v26 = vadd.f32 %v4157_v48, %v4156_v29 }
 0x46c   :  { %v7049_v40 = vadd.f32 %v4158_v26, %v7001_v36  ;;  %v4159_v3 = vpop.f32.mrb[140].mxu1 }
 0x46d   :  { %v4160_v56 = vpop.f32.mrb[141].mxu1 }
 0x46e   :  { %v4161_v62 = vadd.f32 %v4160_v56, %v4159_v3  ;;  %v4888_v56 = vld [vmem:[#allocation2 + $0x10] sm:$0xff] }
 0x470   :  { %v7052_v41 = vadd.f32 %v4161_v62, %v7004_v12  ;;  %v4162_v57 = vpop.f32.mrb[142].mxu1 }
 0x471   :  { %v4163_v11 = vpop.f32.mrb[143].mxu1 }
 0x472   :  { %v4164_v47 = vadd.f32 %v4163_v11, %v4162_v57 }
 0x474   :  { %v7055_v52 = vadd.f32 %v4164_v47, %v7007_v55  ;;  %v4165_v33 = vpop.f32.mrb[144].mxu1 }
 0x475   :  { %v4166_v8 = vpop.f32.mrb[145].mxu1 }
 0x476   :  { %v4167_v58 = vadd.f32 %v4166_v8, %v4165_v33 }
 0x478   :  { %v7058_v45 = vadd.f32 %v4167_v58, %v7010_v28  ;;  %v4168_v36 = vpop.f32.mrb[146].mxu1 }
 0x479   :  { %v4169_v2 = vpop.f32.mrb[147].mxu1 }
 0x47a   :  { %v4170_v20 = vadd.f32 %v4169_v2, %v4168_v36  ;;  %v4889_v36 = vld [vmem:[#allocation2 + $0x18] sm:$0xff] }
 0x47c   :  { %v7061_v53 = vadd.f32 %v4170_v20, %v7013_v61  ;;  %v4171_v12 = vpop.f32.mrb[148].mxu1 }
 0x47d   :  { %v4172_v6 = vpop.f32.mrb[149].mxu1 }
 0x47e   :  { %v4173_v27 = vadd.f32 %v4172_v6, %v4171_v12 }
 0x480   :  { %v7064_v54 = vadd.f32 %v4173_v27, %v7016_v43  ;;  %v4174_v55 = vpop.f32.mrb[150].mxu1 }
 0x481   :  { %v4175_v51 = vpop.f32.mrb[151].mxu1 }
 0x482   :  { %v4176_v10 = vadd.f32 %v4175_v51, %v4174_v55 }
 0x484   :  { %v7067_v21 = vadd.f32 %v4176_v10, %v7019_v19  ;;  %v4177_v28 = vpop.f32.mrb[152].mxu1 }
 0x485   :  { %v4178_v34 = vpop.f32.mrb[153].mxu1 }
 0x486   :  { %v4179_v31 = vadd.f32 %v4178_v34, %v4177_v28 }
 0x488   :  { %v7070_v16 = vadd.f32 %v4179_v31, %v7022_v49  ;;  %v4180_v61 = vpop.f32.mrb[154].mxu1 }
 0x489   :  { %v4181_v25 = vpop.f32.mrb[155].mxu1 }
 0x48a   :  { %v4182_v60 = vadd.f32 %v4181_v25, %v4180_v61  ;;  %v4891_v61 = vld [vmem:[#allocation2 + $0x28] sm:$0xff] }
 0x48c   :  { %v7073_v18 = vadd.f32 %v4182_v60, %v7025_v39  ;;  %v4183_v43 = vpop.f32.mrb[156].mxu1 }
 0x48d   :  { %v4184_v15 = vpop.f32.mrb[157].mxu1 }
 0x48e   :  { %v4185_v23 = vadd.f32 %v4184_v15, %v4183_v43  ;;  %v4892_v43 = vld [vmem:[#allocation2 + $0x30] sm:$0xff] }
 0x490   :  { %v7076_v4 = vadd.f32 %v4185_v23, %v7028_v32  ;;  %v4186_v19 = vpop.f32.mrb[158].mxu1 }
 0x491   :  { %v4187_v50 = vpop.f32.mrb[159].mxu1 }
 0x492   :  { %v4188_v22 = vadd.f32 %v4187_v50, %v4186_v19 }
 0x494   :  { %v7079_v17 = vadd.f32 %v4188_v22, %v7031_v44  ;;  %v4221_v49 = vpop.f32.mrb[160].mxu1 }
 0x495   :  { %v4222_v9 = vpop.f32.mrb[161].mxu1 }
 0x496   :  { %v4223_v24 = vadd.f32 %v4222_v9, %v4221_v49 }
 0x498   :  { %v3376_v14 = vadd.f32 %v4223_v24, %v7034_v46  ;;  %v4224_v7 = vpop.f32.mrb[162].mxu1 }
 0x499   :  { %v4225_v39 = vpop.f32.mrb[163].mxu1 }
 0x49a   :  { %v4226_v35 = vadd.f32 %v4225_v39, %v4224_v7  ;;  %v7082_v42 = vadd.f32 %v4886_v38, %v3376_v14  ;;  %v4893_v14 = vld [vmem:[#allocation2 + $0x38] sm:$0xff] }
 0x49c   :  { %v3383_v32 = vadd.f32 %v4226_v35, %v7037_v37  ;;  %v4227_v63 = vpop.f32.mrb[164].mxu1  ;;  %3500 = vadd.xlane.f32.xlu0 %v7082_v42  ;;  %v3532_v44 = vmul.f32 %v7082_v42, %v7082_v42  ;;  %v4894_v35 = vld [vmem:[#allocation2 + $0x40] sm:$0xff] }
 0x49d   :  { %v4228_v13 = vpop.f32.mrb[165].mxu1 }
 0x49e   :  { %v4229_v30 = vadd.f32 %v4228_v13, %v4227_v63  ;;  %v7088_v29 = vadd.f32 %v4887_v1, %v3383_v32 }
 0x4a0   :  { %v3390_v46 = vadd.f32 %v4229_v30, %v7040_v5  ;;  %v4230_v48 = vpop.f32.mrb[166].mxu1  ;;  %3548 = vadd.xlane.f32.xlu0 %v3532_v44  ;;  %v3533_v26 = vmul.f32 %v7088_v29, %v7088_v29 }
 0x4a1   :  { %v4231_v3 = vpop.f32.mrb[167].mxu1 }
 0x4a2   :  { %v4232_v37 = vadd.f32 %v4231_v3, %v4230_v48  ;;  %3550 = vadd.xlane.f32.xlu1 %v3533_v26  ;;  %v7093_v62 = vadd.f32 %v4888_v56, %v3390_v46  ;;  %v4895_v48 = vld [vmem:[#allocation2 + $0x48] sm:$0xff] }
 0x4a4   :  { %v3397_v57 = vadd.f32 %v4232_v37, %v7043_v0  ;;  %v4233_v11 = vpop.f32.mrb[168].mxu1  ;;  %3502 = vadd.xlane.f32.xlu0 %v7088_v29  ;;  %v3534_v5 = vmul.f32 %v7093_v62, %v7093_v62  ;;  %v4890_v0 = vld [vmem:[#allocation2 + $0x20] sm:$0xff]  ;;  %v4896_v37 = vld [vmem:[#allocation2 + $0x50] sm:$0xff] }
 0x4a5   :  { %v4234_v47 = vpop.f32.mrb[169].mxu1 }
 0x4a6   :  { %v4235_v33 = vadd.f32 %v4234_v47, %v4233_v11  ;;  %3504 = vadd.xlane.f32.xlu1 %v7093_v62  ;;  %v7101_v2 = vadd.f32 %v4889_v36, %v3397_v57  ;;  %v4897_v36 = vld [vmem:[#allocation2 + $0x58] sm:$0xff] }
 0x4a8   :  { %v3404_v8 = vadd.f32 %v4235_v33, %v7046_v59  ;;  %v4236_v58 = vpop.f32.mrb[170].mxu1  ;;  %3552 = vadd.xlane.f32.xlu0 %v3534_v5  ;;  %v3535_v59 = vmul.f32 %v7101_v2, %v7101_v2 }
 0x4a9   :  { %v4237_v20 = vpop.f32.mrb[171].mxu1 }
 0x4aa   :  { %v4238_v12 = vadd.f32 %v4237_v20, %v4236_v58  ;;  %3506 = vadd.xlane.f32.xlu1 %v7101_v2  ;;  %v7104_v6 = vadd.f32 %v4890_v0, %v3404_v8  ;;  %v4898_v0 = vld [vmem:[#allocation2 + $0x60] sm:$0xff] }
 0x4ac   :  { %v3411_v27 = vadd.f32 %v4238_v12, %v7049_v40  ;;  %v4239_v55 = vpop.f32.mrb[172].mxu1  ;;  %3508 = vadd.xlane.f32.xlu0 %v7104_v6  ;;  %v3536_v28 = vmul.f32 %v7104_v6, %v7104_v6 }
 0x4ad   :  { %v4240_v51 = vpop.f32.mrb[173].mxu1 }
 0x4ae   :  { %v4241_v10 = vadd.f32 %v4240_v51, %v4239_v55  ;;  %3554 = vadd.xlane.f32.xlu1 %v3535_v59  ;;  %v7113_v25 = vadd.f32 %v4891_v61, %v3411_v27  ;;  %v4899_v61 = vld [vmem:[#allocation2 + $0x68] sm:$0xff] }
 0x4b0   :  { %v3418_v34 = vadd.f32 %v4241_v10, %v7052_v41  ;;  %v4242_v31 = vpop.f32.mrb[174].mxu1  ;;  %3556 = vadd.xlane.f32.xlu0 %v3536_v28  ;;  %v3537_v41 = vmul.f32 %v7113_v25, %v7113_v25 }
 0x4b1   :  { %v4243_v40 = vpop.f32.mrb[175].mxu1 }
 0x4b2   :  { %v4244_v60 = vadd.f32 %v4243_v40, %v4242_v31  ;;  %3510 = vadd.xlane.f32.xlu1 %v7113_v25  ;;  %v7116_v15 = vadd.f32 %v4892_v43, %v3418_v34  ;;  %v4900_v43 = vld [vmem:[#allocation2 + $0x70] sm:$0xff] }
 0x4b4   :  { %v3425_v23 = vadd.f32 %v4244_v60, %v7055_v52  ;;  %v4245_v19 = vpop.f32.mrb[176].mxu1  ;;  %3512 = vadd.xlane.f32.xlu0 %v7116_v15  ;;  %v3538_v49 = vmul.f32 %v7116_v15, %v7116_v15 }
 0x4b5   :  { %v4246_v50 = vpop.f32.mrb[177].mxu1 }
 0x4b6   :  { %v4247_v22 = vadd.f32 %v4246_v50, %v4245_v19  ;;  %3558 = vadd.xlane.f32.xlu1 %v3537_v41  ;;  %v7125_v7 = vadd.f32 %v4893_v14, %v3425_v23  ;;  %v4901_v50 = vld [vmem:[#allocation2 + $0x78] sm:$0xff] }
 0x4b8   :  { %v3432_v9 = vadd.f32 %v4247_v22, %v7058_v45  ;;  %v4248_v24 = vpop.f32.mrb[178].mxu1  ;;  %3560 = vadd.xlane.f32.xlu0 %v3538_v49  ;;  %v3539_v45 = vmul.f32 %v7125_v7, %v7125_v7 }
 0x4b9   :  { %v4249_v52 = vpop.f32.mrb[179].mxu1 }
 0x4ba   :  { %v4250_v39 = vadd.f32 %v4249_v52, %v4248_v24  ;;  %3514 = vadd.xlane.f32.xlu1 %v7125_v7  ;;  %v7128_v38 = vadd.f32 %v4894_v35, %v3432_v9 }
 0x4bc   :  { %v3439_v32 = vadd.f32 %v4250_v39, %v7061_v53  ;;  %v4251_v63 = vpop.f32.mrb[180].mxu1  ;;  %3516 = vadd.xlane.f32.xlu0 %v7128_v38  ;;  %v3540_v44 = vmul.f32 %v7128_v38, %v7128_v38 }
 0x4bd   :  { %v4252_v13 = vpop.f32.mrb[181].mxu1 }
 0x4be   :  { %v4253_v30 = vadd.f32 %v4252_v13, %v4251_v63  ;;  %3562 = vadd.xlane.f32.xlu1 %v3539_v45  ;;  %v7137_v26 = vadd.f32 %v4895_v48, %v3439_v32 }
 0x4c0   :  { %v3446_v1 = vadd.f32 %v4253_v30, %v7064_v54  ;;  %v4254_v46 = vpop.f32.mrb[182].mxu1  ;;  %3564 = vadd.xlane.f32.xlu0 %v3540_v44  ;;  %v3541_v54 = vmul.f32 %v7137_v26, %v7137_v26 }
 0x4c1   :  { %v4255_v53 = vpop.f32.mrb[183].mxu1 }
 0x4c2   :  { %v4256_v3 = vadd.f32 %v4255_v53, %v4254_v46  ;;  %3518 = vadd.xlane.f32.xlu1 %v7137_v26  ;;  %v7140_v56 = vadd.f32 %v4896_v37, %v3446_v1 }
 0x4c4   :  { %v3453_v57 = vadd.f32 %v4256_v3, %v7067_v21  ;;  %v4257_v11 = vpop.f32.mrb[184].mxu1  ;;  %3520 = vadd.xlane.f32.xlu0 %v7140_v56  ;;  %v3542_v5 = vmul.f32 %v7140_v56, %v7140_v56 }
 0x4c5   :  { %v4258_v47 = vpop.f32.mrb[185].mxu1 }
 0x4c6   :  { %v4259_v33 = vadd.f32 %v4258_v47, %v4257_v11  ;;  %3566 = vadd.xlane.f32.xlu1 %v3541_v54  ;;  %v7149_v20 = vadd.f32 %v4897_v36, %v3453_v57 }
 0x4c8   :  { %v3460_v8 = vadd.f32 %v4259_v33, %v7070_v16  ;;  %v4260_v58 = vpop.f32.mrb[186].mxu1  ;;  %3568 = vadd.xlane.f32.xlu0 %v3542_v5  ;;  %v3543_v16 = vmul.f32 %v7149_v20, %v7149_v20 }
 0x4c9   :  { %v4261_v21 = vpop.f32.mrb[187].mxu1 }
 0x4ca   :  { %v4262_v12 = vadd.f32 %v4261_v21, %v4260_v58  ;;  %3522 = vadd.xlane.f32.xlu1 %v7149_v20  ;;  %v7152_v27 = vadd.f32 %v4898_v0, %v3460_v8 }
 0x4cc   :  { %v3467_v55 = vadd.f32 %v4262_v12, %v7073_v18  ;;  %v4263_v59 = vpop.f32.mrb[188].mxu1  ;;  %3524 = vadd.xlane.f32.xlu0 %v7152_v27  ;;  %v3544_v28 = vmul.f32 %v7152_v27, %v7152_v27 }
 0x4cd   :  { %v4264_v51 = vpop.f32.mrb[189].mxu1 }
 0x4ce   :  { %v4265_v10 = vadd.f32 %v4264_v51, %v4263_v59  ;;  %3570 = vadd.xlane.f32.xlu1 %v3543_v16  ;;  %v7161_v40 = vadd.f32 %v4899_v61, %v3467_v55  ;;  %v7187_v55 = vld [vmem:[%s7303_s3 + $0x3] ss:$0 sm:$0xff] }
 0x4d0   :  { %v3474_v34 = vadd.f32 %v4265_v10, %v7076_v4  ;;  %v4266_v31 = vpop.f32.mrb[190].mxu1  ;;  %3572 = vadd.xlane.f32.xlu0 %v3544_v28  ;;  %v3545_v41 = vmul.f32 %v7161_v40, %v7161_v40 }
 0x4d1   :  { %v4267_v18 = vpop.f32.mrb[191].mxu1 }
 0x4d2   :  { %v4268_v60 = vadd.f32 %v4267_v18, %v4266_v31  ;;  %3526 = vadd.xlane.f32.xlu1 %v7161_v40  ;;  %v7164_v23 = vadd.f32 %v4900_v43, %v3474_v34  ;;  %v7194_v34 = vld [vmem:[%s7303_s3 + $0x4] ss:$0 sm:$0xff]  ;;  %s5004_s3 = smov [#allocation8]  }
 0x4d3   :  { %s3773_s8 = sshll.u32 %s5004_s3, 4  ;;  %s3774_s8 = int_to_ptr.vmem [resolvable:$true] %s3773_s8 }
 0x4d4   :  { %v3481_v19 = vadd.f32 %v4268_v60, %v7079_v17  ;;  %3528 = vadd.xlane.f32.xlu0 %v7164_v23  ;;  %v3546_v4 = vmul.f32 %v7164_v23, %v7164_v23  ;;  %s4968_s9 = scalar_lea.vmem %s3774_s8, 2048  ;;  %p4973_p11 = scmp.lt.s32.totalorder %s3774_s8, %s3774_s8 }
 0x4d5   :  { %p4969_p10 = scmp.ne.s32.totalorder %s3774_s8, %s4968_s9  ;;  %p4974_p12 = scmp.lt.s32.totalorder %s4968_s9, %s4968_s9 }
 0x4d6   :  { %3574 = vadd.xlane.f32.xlu1 %v3545_v41  ;;  %v7172_v22 = vadd.f32 %v4901_v50, %v3481_v19 }
 0x4d7   :  { %p4975_p13 = por %p4974_p12, %p4973_p11 }
 0x4d8   :  { %3576 = vadd.xlane.f32.xlu0 %v3546_v4  ;;  %v3547_v49 = vmul.f32 %v7172_v22, %v7172_v22 }
 0x4d9   :  { %p4976_p0 = pnand %p4975_p13, %p4969_p10 }
 0x4da   :  { %3530 = vadd.xlane.f32.xlu1 %v7172_v22 }
 0x4de   :  { %3578 = vadd.xlane.f32.xlu1 %v3547_v49 }
 0x529   :  { %v3501_v17 = vpop.xlane.xlu0 %3500 }
 0x52a   :  { %v3580_v9 = vmul.f32 0.0078125, %v3501_v17 }
 0x52c   :  { %v3612_v14 = vmul.f32 %v3580_v9, %v3580_v9  ;;  %v3644_v21 = vsub.f32 %v7082_v42, %v3580_v9 }
 0x52d   :  { %v3549_v24 = vpop.xlane.xlu0 %3548 }
 0x52e   :  { %v3596_v52 = vmul.f32 0.0078125, %v3549_v24 }
 0x52f   :  { %v3551_v39 = vpop.xlane.xlu1 %3550 }
 0x530   :  { %v3628_v35 = vsub.f32 %v3596_v52, %v3612_v14  ;;  %v3597_v30 = vmul.f32 0.0078125, %v3551_v39 }
 0x531   :  { %v3503_v32 = vpop.xlane.xlu0 %3502 }
 0x532   :  { %v3660_v63 = vadd.f32 1e-05, %v3628_v35  ;;  %v3581_v45 = vmul.f32 0.0078125, %v3503_v32 }
 0x533   :  { %v3505_v13 = vpop.xlane.xlu1 %3504 }
 0x534   :  { %4854 = vrsqrt.f32 %v3660_v63  ;;  %v3613_v44 = vmul.f32 %v3581_v45, %v3581_v45  ;;  %v3582_v1 = vmul.f32 0.0078125, %v3505_v13  ;;  %v3645_v41 = vsub.f32 %v7088_v29, %v3581_v45 }
 0x535   :  { %v3553_v46 = vpop.xlane.xlu0 %3552 }
 0x536   :  { %v3629_v48 = vsub.f32 %v3597_v30, %v3613_v44  ;;  %v3614_v53 = vmul.f32 %v3582_v1, %v3582_v1  ;;  %v3598_v3 = vmul.f32 0.0078125, %v3553_v46  ;;  %v3646_v14 = vsub.f32 %v7093_v62, %v3582_v1 }
 0x537   :  { %v3507_v37 = vpop.xlane.xlu1 %3506 }
 0x538   :  { %v3661_v57 = vadd.f32 1e-05, %v3629_v48  ;;  %v3630_v11 = vsub.f32 %v3598_v3, %v3614_v53  ;;  %v7177_v54 = vmul.f32 0.0078125, %v3507_v37 }
 0x539   :  { %v3509_v47 = vpop.xlane.xlu0 %3508 }
 0x53a   :  { %4856 = vrsqrt.f32 %v3661_v57  ;;  %v3662_v33 = vadd.f32 1e-05, %v3630_v11  ;;  %v7179_v5 = vmul.f32 0.0078125, %v3509_v47  ;;  %v3615_v58 = vmul.f32 %v7177_v54, %v7177_v54 }
 0x53b   :  { %v3555_v8 = vpop.xlane.xlu1 %3554  ;;  %v3647_v37 = vsub.f32 %v7101_v2, %v7177_v54 }
 0x53c   :  { %4858 = vrsqrt.f32 %v3662_v33  ;;  %v3599_v36 = vmul.f32 0.0078125, %v3555_v8  ;;  %v3616_v59 = vmul.f32 %v7179_v5, %v7179_v5 }
 0x53d   :  { %v3557_v12 = vpop.xlane.xlu0 %3556 }
 0x53e   :  { %v4855_v0 = vpop.eup %4854  ;;  %v3631_v16 = vsub.f32 %v3599_v36, %v3615_v58  ;;  %v3600_v51 = vmul.f32 0.0078125, %v3557_v12  ;;  %v3648_v58 = vsub.f32 %v7104_v6, %v7179_v5 }
 0x53f   :  { %v3692_v10 = vmul.f32 %v4855_v0, %v3644_v21  ;;  %v3511_v28 = vpop.xlane.xlu1 %3510 }
 0x540   :  { %v3663_v42 = vadd.f32 1e-05, %v3631_v16  ;;  %v3632_v31 = vsub.f32 %v3600_v51, %v3616_v59  ;;  %v7196_v61 = vmul.f32 0.0078125, %v3511_v28 }
 0x541   :  { %v3714_v18 = vmul.f32 %v7187_v55, %v3692_v10  ;;  %v3513_v60 = vpop.xlane.xlu0 %3512 }
 0x542   :  { %4860 = vrsqrt.f32 %v3663_v42  ;;  %v3664_v43 = vadd.f32 1e-05, %v3632_v31  ;;  %v7201_v4 = vmul.f32 0.0078125, %v3513_v60  ;;  %v3617_v17 = vmul.f32 %v7196_v61, %v7196_v61 }
 0x543   :  { %v3736_v19 = vadd.f32 %v7194_v34, %v3714_v18  ;;  %v3559_v50 = vpop.xlane.xlu1 %3558 }
 0x544   :  { %v4857_v49 = vpop.eup %4856  ;;  %4862 = vrsqrt.f32 %v3664_v43  ;;  %v3601_v9 = vmul.f32 0.0078125, %v3559_v50  ;;  %v3618_v35 = vmul.f32 %v7201_v4, %v7201_v4  ;;  %v3649_v43 = vsub.f32 %v7113_v25, %v7196_v61 }
 0x545   :  { %3752 = vst [vmem:[#allocation8] sm:$0xff] %v3736_v19  ;;  %v3693_v24 = vmul.f32 %v4857_v49, %v3645_v41  ;;  %v3561_v52 = vpop.xlane.xlu0 %3560 }
 0x546   :  { %v4859_v39 = vpop.eup %4858  ;;  %v3633_v32 = vsub.f32 %v3601_v9, %v3617_v17  ;;  %v3602_v29 = vmul.f32 0.0078125, %v3561_v52  ;;  %v3650_v9 = vsub.f32 %v7116_v15, %v7201_v4 }
 0x547   :  { %v3715_v63 = vmul.f32 %v7187_v55, %v3693_v24  ;;  %v3694_v45 = vmul.f32 %v4859_v39, %v3646_v14  ;;  %v3515_v13 = vpop.xlane.xlu1 %3514 }
 0x548   :  { %v3665_v30 = vadd.f32 1e-05, %v3633_v32  ;;  %v3634_v44 = vsub.f32 %v3602_v29, %v3618_v35  ;;  %v7209_v46 = vmul.f32 0.0078125, %v3515_v13 }
 0x549   :  { %v3737_v48 = vadd.f32 %v7194_v34, %v3715_v63  ;;  %v3716_v53 = vmul.f32 %v7187_v55, %v3694_v45  ;;  %v3517_v62 = vpop.xlane.xlu0 %3516 }
 0x54a   :  { %4864 = vrsqrt.f32 %v3665_v30  ;;  %v3666_v1 = vadd.f32 1e-05, %v3634_v44  ;;  %v7216_v57 = vmul.f32 0.0078125, %v3517_v62  ;;  %v3619_v33 = vmul.f32 %v7209_v46, %v7209_v46 }
 0x54b   :  { %3753 = vst [vmem:[#allocation8 + $0x8] sm:$0xff] %v3737_v48  ;;  %v3738_v3 = vadd.f32 %v7194_v34, %v3716_v53  ;;  %v3563_v11 = vpop.xlane.xlu1 %3562  ;;  %v3651_v53 = vsub.f32 %v7125_v7, %v7209_v46 }
 0x54c   :  { %v4861_v47 = vpop.eup %4860  ;;  %4866 = vrsqrt.f32 %v3666_v1  ;;  %v3603_v8 = vmul.f32 0.0078125, %v3563_v11  ;;  %v3620_v0 = vmul.f32 %v7216_v57, %v7216_v57 }
 0x54d   :  { %3754 = vst [vmem:[#allocation8 + $0x10] sm:$0xff] %v3738_v3  ;;  %v3695_v36 = vmul.f32 %v4861_v47, %v3647_v37  ;;  %v3565_v21 = vpop.xlane.xlu0 %3564  ;;  %v3652_v47 = vsub.f32 %v7128_v38, %v7216_v57 }
 0x54e   :  { %v4863_v12 = vpop.eup %4862  ;;  %v3635_v2 = vsub.f32 %v3603_v8, %v3619_v33  ;;  %v3604_v54 = vmul.f32 0.0078125, %v3565_v21 }
 0x54f   :  { %v3717_v59 = vmul.f32 %v7187_v55, %v3695_v36  ;;  %v3696_v16 = vmul.f32 %v4863_v12, %v3648_v58  ;;  %v3519_v51 = vpop.xlane.xlu1 %3518 }
 0x550   :  { %v3667_v10 = vadd.f32 1e-05, %v3635_v2  ;;  %v3636_v28 = vsub.f32 %v3604_v54, %v3620_v0  ;;  %v7225_v42 = vmul.f32 0.0078125, %v3519_v51 }
 0x551   :  { %v3739_v31 = vadd.f32 %v7194_v34, %v3717_v59  ;;  %v3718_v6 = vmul.f32 %v7187_v55, %v3696_v16  ;;  %v3521_v5 = vpop.xlane.xlu0 %3520 }
 0x552   :  { %4868 = vrsqrt.f32 %v3667_v10  ;;  %v3668_v18 = vadd.f32 1e-05, %v3636_v28  ;;  %v7232_v19 = vmul.f32 0.0078125, %v3521_v5  ;;  %v3621_v49 = vmul.f32 %v7225_v42, %v7225_v42 }
 0x553   :  { %3755 = vst [vmem:[#allocation8 + $0x18] sm:$0xff] %v3739_v31  ;;  %v3740_v60 = vadd.f32 %v7194_v34, %v3718_v6  ;;  %v3567_v41 = vpop.xlane.xlu1 %3566  ;;  %v3653_v28 = vsub.f32 %v7137_v26, %v7225_v42 }
 0x554   :  { %v4865_v50 = vpop.eup %4864  ;;  %4870 = vrsqrt.f32 %v3668_v18  ;;  %v3605_v17 = vmul.f32 0.0078125, %v3567_v41  ;;  %v3622_v39 = vmul.f32 %v7232_v19, %v7232_v19 }
 0x555   :  { %3756 = vst [vmem:[#allocation8 + $0x20] sm:$0xff] %v3740_v60  ;;  %v3697_v24 = vmul.f32 %v4865_v50, %v3649_v43  ;;  %v3569_v14 = vpop.xlane.xlu0 %3568  ;;  %v3654_v43 = vsub.f32 %v7140_v56, %v7232_v19 }
 0x556   :  { %v4867_v52 = vpop.eup %4866  ;;  %v3637_v25 = vsub.f32 %v3605_v17, %v3621_v49  ;;  %v3606_v61 = vmul.f32 0.0078125, %v3569_v14 }
 0x557   :  { %v3719_v35 = vmul.f32 %v7187_v55, %v3697_v24  ;;  %v3698_v32 = vmul.f32 %v4867_v52, %v3650_v9  ;;  %v3523_v29 = vpop.xlane.xlu1 %3522 }
 0x558   :  { %v3669_v63 = vadd.f32 1e-05, %v3637_v25  ;;  %v3638_v45 = vsub.f32 %v3606_v61, %v3622_v39  ;;  %v7241_v13 = vmul.f32 0.0078125, %v3523_v29 }
 0x559   :  { %v3741_v30 = vadd.f32 %v7194_v34, %v3719_v35  ;;  %v3720_v15 = vmul.f32 %v7187_v55, %v3698_v32  ;;  %v3525_v4 = vpop.xlane.xlu0 %3524 }
 0x55a   :  { %4872 = vrsqrt.f32 %v3669_v63  ;;  %v3670_v44 = vadd.f32 1e-05, %v3638_v45  ;;  %v7248_v62 = vmul.f32 0.0078125, %v3525_v4  ;;  %v3623_v37 = vmul.f32 %v7241_v13, %v7241_v13 }
 0x55b   :  { %3757 = vst [vmem:[#allocation8 + $0x28] sm:$0xff] %v3741_v30  ;;  %v3742_v48 = vadd.f32 %v7194_v34, %v3720_v15  ;;  %v3571_v1 = vpop.xlane.xlu1 %3570  ;;  %v3655_v19 = vsub.f32 %v7149_v20, %v7241_v13 }
 0x55c   :  { %v4869_v3 = vpop.eup %4868  ;;  %4874 = vrsqrt.f32 %v3670_v44  ;;  %v3607_v11 = vmul.f32 0.0078125, %v3571_v1  ;;  %v3624_v36 = vmul.f32 %v7248_v62, %v7248_v62  ;;  %v3656_v15 = vsub.f32 %v7152_v27, %v7248_v62 }
 0x55d   :  { %3758 = vst [vmem:[#allocation8 + $0x30] sm:$0xff] %v3742_v48  ;;  %v3699_v33 = vmul.f32 %v4869_v3, %v3651_v53  ;;  %v3573_v8 = vpop.xlane.xlu0 %3572 }
 0x55e   :  { %v4871_v58 = vpop.eup %4870  ;;  %v3639_v7 = vsub.f32 %v3607_v11, %v3623_v37  ;;  %v3608_v46 = vmul.f32 0.0078125, %v3573_v8 }
 0x55f   :  { %v3721_v21 = vmul.f32 %v7187_v55, %v3699_v33  ;;  %v3700_v12 = vmul.f32 %v4871_v58, %v3652_v47  ;;  %v3527_v0 = vpop.xlane.xlu1 %3526 }
 0x560   :  { %v3671_v2 = vadd.f32 1e-05, %v3639_v7  ;;  %v3640_v54 = vsub.f32 %v3608_v46, %v3624_v36  ;;  %v3593_v59 = vmul.f32 0.0078125, %v3527_v0 }
 0x561   :  { %v3743_v16 = vadd.f32 %v7194_v34, %v3721_v21  ;;  %v3722_v51 = vmul.f32 %v7187_v55, %v3700_v12  ;;  %v3529_v38 = vpop.xlane.xlu0 %3528 }
 0x562   :  { %4876 = vrsqrt.f32 %v3671_v2  ;;  %v3672_v57 = vadd.f32 1e-05, %v3640_v54  ;;  %v3594_v31 = vmul.f32 0.0078125, %v3529_v38  ;;  %v3625_v18 = vmul.f32 %v3593_v59, %v3593_v59 }
 0x563   :  { %3759 = vst [vmem:[#allocation8 + $0x38] sm:$0xff] %v3743_v16  ;;  %v3744_v10 = vadd.f32 %v7194_v34, %v3722_v51  ;;  %v3575_v6 = vpop.xlane.xlu1 %3574  ;;  %v3657_v11 = vsub.f32 %v7161_v40, %v3593_v59 }
 0x564   :  { %v4873_v5 = vpop.eup %4872  ;;  %4878 = vrsqrt.f32 %v3672_v57  ;;  %v3609_v60 = vmul.f32 0.0078125, %v3575_v6  ;;  %v3626_v17 = vmul.f32 %v3594_v31, %v3594_v31  ;;  %v3658_v27 = vsub.f32 %v7164_v23, %v3594_v31 }
 0x565   :  { %3760 = vst [vmem:[#allocation8 + $0x40] sm:$0xff] %v3744_v10  ;;  %v3701_v41 = vmul.f32 %v4873_v5, %v3653_v28  ;;  %v3577_v50 = vpop.xlane.xlu0 %3576 }
 0x566   :  { %v4875_v49 = vpop.eup %4874  ;;  %v3641_v9 = vsub.f32 %v3609_v60, %v3625_v18  ;;  %v3610_v24 = vmul.f32 0.0078125, %v3577_v50 }
 0x567   :  { %v3723_v14 = vmul.f32 %v7187_v55, %v3701_v41  ;;  %v3702_v52 = vmul.f32 %v4875_v49, %v3654_v43  ;;  %v3531_v26 = vpop.xlane.xlu1 %3530 }
 0x568   :  { %v3673_v42 = vadd.f32 1e-05, %v3641_v9  ;;  %v3642_v39 = vsub.f32 %v3610_v24, %v3626_v17  ;;  %v3595_v25 = vmul.f32 0.0078125, %v3531_v26 }
 0x569   :  { %v3745_v61 = vadd.f32 %v7194_v34, %v3723_v14  ;;  %v3724_v35 = vmul.f32 %v7187_v55, %v3702_v52 }
 0x56a   :  { %4880 = vrsqrt.f32 %v3673_v42  ;;  %v3674_v32 = vadd.f32 1e-05, %v3642_v39  ;;  %v3627_v45 = vmul.f32 %v3595_v25, %v3595_v25  ;;  %v3659_v21 = vsub.f32 %v7172_v22, %v3595_v25 }
 0x56b   :  { %3761 = vst [vmem:[#allocation8 + $0x48] sm:$0xff] %v3745_v61  ;;  %v3746_v56 = vadd.f32 %v7194_v34, %v3724_v35  ;;  %v3579_v29 = vpop.xlane.xlu1 %3578 }
 0x56c   :  { %v4877_v63 = vpop.eup %4876  ;;  %4882 = vrsqrt.f32 %v3674_v32  ;;  %v3611_v30 = vmul.f32 0.0078125, %v3579_v29 }
 0x56d   :  { %3762 = vst [vmem:[#allocation8 + $0x50] sm:$0xff] %v3746_v56  ;;  %v3703_v4 = vmul.f32 %v4877_v63, %v3655_v19 }
 0x56e   :  { %v4879_v44 = vpop.eup %4878  ;;  %v3643_v48 = vsub.f32 %v3611_v30, %v3627_v45 }
 0x56f   :  { %v3725_v53 = vmul.f32 %v7187_v55, %v3703_v4  ;;  %v3704_v1 = vmul.f32 %v4879_v44, %v3656_v15 }
 0x570   :  { %v3675_v3 = vadd.f32 1e-05, %v3643_v48 }
 0x571   :  { %v3747_v37 = vadd.f32 %v7194_v34, %v3725_v53  ;;  %v3726_v20 = vmul.f32 %v7187_v55, %v3704_v1 }
 0x572   :  { %4884 = vrsqrt.f32 %v3675_v3 }
 0x573   :  { %3763 = vst [vmem:[#allocation8 + $0x58] sm:$0xff] %v3747_v37  ;;  %v3748_v13 = vadd.f32 %v7194_v34, %v3726_v20 }
 0x574   :  { %v4881_v47 = vpop.eup %4880 }
 0x575   :  { %3764 = vst [vmem:[#allocation8 + $0x60] sm:$0xff] %v3748_v13  ;;  %v3705_v62 = vmul.f32 %v4881_v47, %v3657_v11 }
 0x576   :  { %v4883_v33 = vpop.eup %4882 }
 0x577   :  { %v3727_v8 = vmul.f32 %v7187_v55, %v3705_v62  ;;  %v3706_v58 = vmul.f32 %v4883_v33, %v3658_v27 }
 0x579   :  { %v3749_v36 = vadd.f32 %v7194_v34, %v3727_v8  ;;  %v3728_v7 = vmul.f32 %v7187_v55, %v3706_v58 }
 0x57b   :  { %3765 = vst [vmem:[#allocation8 + $0x68] sm:$0xff] %v3749_v36  ;;  %v3750_v46 = vadd.f32 %v7194_v34, %v3728_v7 }
 0x57c   :  { %v4885_v12 = vpop.eup %4884 }
 0x57d   :  { %3766 = vst [vmem:[#allocation8 + $0x70] sm:$0xff] %v3750_v46  ;;  %v3707_v40 = vmul.f32 %v4885_v12, %v3659_v21 }
 0x57f   :  { %v3729_v23 = vmul.f32 %v7187_v55, %v3707_v40 }
 0x581   :  { %v3751_v0 = vadd.f32 %v7194_v34, %v3729_v23 }
 0x583   :  { %3767 = vst [vmem:[#allocation8 + $0x78] sm:$0xff] %v3751_v0 }
 0x584   :  { %4979 = shalt.err (!%p4976_p0)
}
 0x585   :  { %s4980_s12 = scalar_lea.hbm %s7304_s4, 2048 }
 0x586   :  { %p4981_p1 = scmp.ne.s32.totalorder %s7304_s4, %s4980_s12  ;;  %p4984_p2 = scmp.lt.u32.totalorder %s4980_s12, %s7304_s4 }
 0x588   :  { %p4986_p3 = pnand %p4984_p2, %p4981_p1 }
 0x58a   :  { %4989 = shalt.err (!%p4986_p3)
}
 0x58b   :  { %3779 = dma.vmem_to_hbm [thread:$0]  %s3774_s8, 2048, %s7304_s4, [#allocation4], %s5000_s1, %s5000_s1, %s5001_s13  }
 0x58c   :  { %4994 = dma.done.wait [#allocation4], 2048  }
 0x58d   :  { %4995 = vsyncadd [#allocation4], 4294965248 }
 0x58e   :  { %3783 = vsyncpa [#allocation3], 1 }
 0x58f   :  { %3784 = vsyncpa [#allocation6], 1 }
 0x590   :  { %3785 = vsyncpa [#allocation4], 1 }

</bundles_post_ra>
